<compile_context>
chip_gen: v5e
topology: v5e:2x2
jax: 0.10.0
libtpu: 0.0.40
codegen_flags: <defaults>
</compile_context>

<pallas_src>
import functools
import math

import jax
import jax.numpy as jnp
import numpy as np
from jax.experimental import pallas as pl
from jax.experimental.pallas import tpu as pltpu


def _layernorm(x, gamma, beta, eps):
    # TF-style layernorm: biased variance, eps inside the sqrt.
    mean = jnp.mean(x, axis=-1, keepdims=True)
    var = jnp.mean((x - mean) ** 2, axis=-1, keepdims=True)
    return gamma * ((x - mean) * jax.lax.rsqrt(var + eps)) + beta


def encoder_layer_kernel(
    xq_ref,                        # (TQ, D)        f32  queries / residual, this tile
    k_ref, v_ref,                  # (H, S, dk)     bf16 precomputed keys / values (this batch)
    wq_ref, bq_ref,                # (H, D, dk) bf16 / (H, 1, dk) f32 (scale folded in)
    wo_ref, bo_ref,                # (D, D) bf16 / (1, D) f32
    w1_ref, b1_ref,                # (D, F) bf16 / (1, F) f32
    w2_ref, b2_ref,                # (F, D) bf16 / (1, D) f32
    g_in_ref, bt_in_ref,           # (1, D) f32
    g_out_ref, bt_out_ref,         # (1, D) f32
    out_ref,                       # (TQ, D)
    *,
    num_heads,
):
    xq = xq_ref[...]                                   # (TQ, D) f32
    xq_b = xq.astype(jnp.bfloat16)

    # --- multi-head self-attention (mask=None path) -------------------------
    ctx_parts = []
    for h in range(num_heads):                          # H is small & static -> unrolled
        # Per-head query projection; 1/sqrt(dk) is already folded into Wq, bq.
        q = jnp.dot(xq_b, wq_ref[h],
                    preferred_element_type=jnp.float32) + bq_ref[h]   # (TQ, dk) f32
        # Scores: contract over dk without transposing K.
        s = jax.lax.dot_general(
            q.astype(jnp.bfloat16), k_ref[h],
            dimension_numbers=(((1,), (1,)), ((), ())),
            preferred_element_type=jnp.float32,
        )                                               # (TQ, S) f32
        # Softmax; normalization deferred until after the p@v matmul.
        m = jnp.max(s, axis=-1, keepdims=True)
        p = jnp.exp(s - m)                              # f32 exp (portable to v5e)
        denom = jnp.sum(p, axis=-1, keepdims=True)
        ctx = jnp.dot(p.astype(jnp.bfloat16), v_ref[h],
                      preferred_element_type=jnp.float32)             # (TQ, dk) f32
        ctx = ctx * pl.reciprocal(denom, approx=True)   # scales (TQ, dk), EUP slot
        ctx_parts.append(ctx.astype(jnp.bfloat16))

    # Head-concatenated context -> one full-depth (TQ, D) @ (D, D) Wo matmul.
    ctx_all = jnp.concatenate(ctx_parts, axis=-1)       # (TQ, D) bf16
    attn = jnp.dot(ctx_all, wo_ref[...],
                   preferred_element_type=jnp.float32) + bo_ref[...]

    # --- residual + LN + FFN + residual + LN --------------------------------
    x1 = xq + attn                                      # dropout = identity (eval)
    ln1 = _layernorm(x1, g_in_ref[...], bt_in_ref[...], 1e-12)

    h1 = jnp.dot(ln1.astype(jnp.bfloat16), w1_ref[...],
                 preferred_element_type=jnp.float32) + b1_ref[...]
    h1 = jnp.maximum(h1, 0.0)
    # TODO(synk): on v7x with large F (>=4096), tile this second matmul over F
    # chunks to bound the (TQ, F) intermediate under the 64 MiB VMEM budget.
    ff = jnp.dot(h1.astype(jnp.bfloat16), w2_ref[...],
                 preferred_element_type=jnp.float32) + b2_ref[...]

    x2 = x1 + ff                                        # dropout = identity (eval)
    out = _layernorm(x2, g_out_ref[...], bt_out_ref[...], 1e-12)
    out_ref[...] = out.astype(out_ref.dtype)


def encoder_layer(x, params, num_heads, *, q_tile=128):
    B, S, D = x.shape
    assert D % num_heads == 0, "hidden size must divide evenly across heads"
    dk = D // num_heads
    TQ = min(q_tile, S)
    assert S % TQ == 0, "sequence length must be a multiple of the query tile"
    n_qt = S // TQ
    scale = 1.0 / math.sqrt(dk)
    bf16 = jnp.bfloat16

    # --- host-side (XLA) preprocessing --------------------------------------
    # Fold the softmax scale into the query projection; per-head weight blocks
    # are stacked on a leading head axis (no in-kernel lane slicing).
    wq_h = jnp.transpose((params["wq"] * scale).reshape(D, num_heads, dk),
                         (1, 0, 2)).astype(bf16)                     # (H, D, dk)
    bq_h = jnp.transpose((params["bq"] * scale).reshape(1, num_heads, dk),
                         (1, 0, 2))                                   # (H, 1, dk) f32

    # Precompute K / V once for all heads (they don't depend on the query tile).
    def proj_heads(w, b):
        y = jnp.einsum("bsd,de->bse", x, w) + b                       # (B, S, D)
        return jnp.transpose(y.reshape(B, S, num_heads, dk),
                             (0, 2, 1, 3)).astype(bf16)               # (B, H, S, dk)

    k_all = proj_heads(params["wk"], params["bk"])
    v_all = proj_heads(params["wv"], params["bv"])

    wo = params["wo"].astype(bf16)                                    # (D, D)
    w1 = params["w1"].astype(bf16)                                    # (D, F)
    w2 = params["w2"].astype(bf16)                                    # (F, D)

    def const_spec(shape):
        nd = len(shape)
        return pl.BlockSpec(tuple(shape), lambda b, qi, nd=nd: (0,) * nd)

    in_specs = [
        pl.BlockSpec((None, TQ, D), lambda b, qi: (b, qi, 0)),               # xq tile
        pl.BlockSpec((None, num_heads, S, dk), lambda b, qi: (b, 0, 0, 0)),  # K (per batch)
        pl.BlockSpec((None, num_heads, S, dk), lambda b, qi: (b, 0, 0, 0)),  # V (per batch)
        const_spec(wq_h.shape), const_spec(bq_h.shape),
        const_spec(wo.shape), const_spec(params["bo"].shape),
        const_spec(w1.shape), const_spec(params["b1"].shape),
        const_spec(w2.shape), const_spec(params["b2"].shape),
        const_spec(params["g_in"].shape), const_spec(params["bt_in"].shape),
        const_spec(params["g_out"].shape), const_spec(params["bt_out"].shape),
    ]
    args = [
        x, k_all, v_all, wq_h, bq_h, wo, params["bo"],
        w1, params["b1"], w2, params["b2"],
        params["g_in"], params["bt_in"], params["g_out"], params["bt_out"],
    ]

    kernel = functools.partial(encoder_layer_kernel, num_heads=num_heads)
    return pl.pallas_call(
        kernel,
        out_shape=jax.ShapeDtypeStruct((B, S, D), x.dtype),
        grid=(B, n_qt),
        in_specs=in_specs,
        out_specs=pl.BlockSpec((None, TQ, D), lambda b, qi: (b, qi, 0)),
        compiler_params=pltpu.CompilerParams(
            dimension_semantics=("parallel", "parallel"),
            # Tiny at demo shapes; raise to 64-96 MiB (and sweep q_tile 256/512)
            # on v6e/v5e, keep <= 32 MiB and single-buffer invariants on v7x.
            vmem_limit_bytes=32 * 1024 * 1024,
        ),
    )(*args)


# --------------------- pure-JAX f32 reference (for checking) ----------------
def encoder_layer_ref(x, params, num_heads):
    B, S, D = x.shape
    dk = D // num_heads
    q = x @ params["wq"] + params["bq"]
    k = x @ params["wk"] + params["bk"]
    v = x @ params["wv"] + params["bv"]
    q = q.reshape(B, S, num_heads, dk).transpose(0, 2, 1, 3)
    k = k.reshape(B, S, num_heads, dk).transpose(0, 2, 1, 3)
    v = v.reshape(B, S, num_heads, dk).transpose(0, 2, 1, 3)
    s = jnp.einsum("bhqd,bhkd->bhqk", q, k) / (dk ** 0.5)
    p = jax.nn.softmax(s, axis=-1)
    ctx = jnp.einsum("bhqk,bhkd->bhqd", p, v).transpose(0, 2, 1, 3).reshape(B, S, D)
    attn = ctx @ params["wo"] + params["bo"]
    x1 = x + attn

    def ln(y, g, b):
        m = y.mean(-1, keepdims=True)
        var = ((y - m) ** 2).mean(-1, keepdims=True)
        return g * ((y - m) / jnp.sqrt(var + 1e-12)) + b

    ln1 = ln(x1, params["g_in"], params["bt_in"])
    ff = jnp.maximum(ln1 @ params["w1"] + params["b1"], 0.0) @ params["w2"] + params["b2"]
    x2 = x1 + ff
    return ln(x2, params["g_out"], params["bt_out"])


if __name__ == "__main__":
    # Lane-friendly small demo shapes: D multiple of 128 (lane-dense stores),
    # two query tiles per batch (TQ=64) and B*n_qt=4 so both v7x cores shard.
    B, S, D, H, F = 2, 128, 128, 4, 256
    key = jax.random.PRNGKey(0)
    ks = jax.random.split(key, 18)

    def w(k, shape, scl=0.02):
        return (scl * jax.random.normal(k, shape)).astype(jnp.float32)

    params = {
        "wq": w(ks[0], (D, D)), "bq": w(ks[1], (1, D)),
        "wk": w(ks[2], (D, D)), "bk": w(ks[3], (1, D)),
        "wv": w(ks[4], (D, D)), "bv": w(ks[5], (1, D)),
        "wo": w(ks[6], (D, D)), "bo": w(ks[7], (1, D)),
        "w1": w(ks[8], (D, F)), "b1": w(ks[9], (1, F)),
        "w2": w(ks[10], (F, D)), "b2": w(ks[11], (1, D)),
        "g_in": 1.0 + w(ks[12], (1, D), 0.1), "bt_in": w(ks[13], (1, D), 0.1),
        "g_out": 1.0 + w(ks[14], (1, D), 0.1), "bt_out": w(ks[15], (1, D), 0.1),
    }

    x = jax.random.normal(ks[16], (B, S, D), dtype=jnp.float32)

    out = encoder_layer(x, params, num_heads=H, q_tile=64)
    out = jax.block_until_ready(out)

    ref = encoder_layer_ref(x, params, num_heads=H)
    # bf16 MXU operands + approx reciprocal vs a pure-f32 reference.
    np.testing.assert_allclose(np.asarray(out), np.asarray(ref), rtol=2e-2, atol=2e-2)

    print("KERNEL_OK")
</pallas_src>

<mosaic_0001>
module attributes {stable_mosaic.version = 11 : i64} {
  func.func @encoder_layer_kernel(%arg0: i32, %arg1: i32, %arg2: memref<1x64x128xf32, #tpu.memory_space<vmem>>, %arg3: memref<1x4x128x32xbf16, #tpu.memory_space<vmem>>, %arg4: memref<1x4x128x32xbf16, #tpu.memory_space<vmem>>, %arg5: memref<4x128x32xbf16, #tpu.memory_space<vmem>>, %arg6: memref<4x1x32xf32, #tpu.memory_space<vmem>>, %arg7: memref<128x128xbf16, #tpu.memory_space<vmem>>, %arg8: memref<1x128xf32, #tpu.memory_space<vmem>>, %arg9: memref<128x256xbf16, #tpu.memory_space<vmem>>, %arg10: memref<1x256xf32, #tpu.memory_space<vmem>>, %arg11: memref<256x128xbf16, #tpu.memory_space<vmem>>, %arg12: memref<1x128xf32, #tpu.memory_space<vmem>>, %arg13: memref<1x128xf32, #tpu.memory_space<vmem>>, %arg14: memref<1x128xf32, #tpu.memory_space<vmem>>, %arg15: memref<1x128xf32, #tpu.memory_space<vmem>>, %arg16: memref<1x128xf32, #tpu.memory_space<vmem>>, %arg17: memref<1x64x128xf32, #tpu.memory_space<vmem>>) attributes {dimension_semantics = [#tpu.dimension_semantics<parallel>, #tpu.dimension_semantics<parallel>], iteration_bounds = array<i64: 2, 2>, scalar_prefetch = 0 : i64, scratch_operands = 0 : i64, tpu.core_type = #tpu.core_type<tc>, window_params = [{transform_indices = @transform_0, window_bounds = array<i64: 1, 64, 128>}, {transform_indices = @transform_1, window_bounds = array<i64: 1, 4, 128, 32>}, {transform_indices = @transform_2, window_bounds = array<i64: 1, 4, 128, 32>}, {pipeline_mode = #tpu.pipeline_mode<synchronous>, transform_indices = @transform_3, window_bounds = array<i64: 4, 128, 32>}, {pipeline_mode = #tpu.pipeline_mode<synchronous>, transform_indices = @transform_4, window_bounds = array<i64: 4, 1, 32>}, {pipeline_mode = #tpu.pipeline_mode<synchronous>, transform_indices = @transform_5, window_bounds = array<i64: 128, 128>}, {pipeline_mode = #tpu.pipeline_mode<synchronous>, transform_indices = @transform_6, window_bounds = array<i64: 1, 128>}, {pipeline_mode = #tpu.pipeline_mode<synchronous>, transform_indices = @transform_7, window_bounds = array<i64: 128, 256>}, {pipeline_mode = #tpu.pipeline_mode<synchronous>, transform_indices = @transform_8, window_bounds = array<i64: 1, 256>}, {pipeline_mode = #tpu.pipeline_mode<synchronous>, transform_indices = @transform_9, window_bounds = array<i64: 256, 128>}, {pipeline_mode = #tpu.pipeline_mode<synchronous>, transform_indices = @transform_10, window_bounds = array<i64: 1, 128>}, {pipeline_mode = #tpu.pipeline_mode<synchronous>, transform_indices = @transform_11, window_bounds = array<i64: 1, 128>}, {pipeline_mode = #tpu.pipeline_mode<synchronous>, transform_indices = @transform_12, window_bounds = array<i64: 1, 128>}, {pipeline_mode = #tpu.pipeline_mode<synchronous>, transform_indices = @transform_13, window_bounds = array<i64: 1, 128>}, {pipeline_mode = #tpu.pipeline_mode<synchronous>, transform_indices = @transform_14, window_bounds = array<i64: 1, 128>}, {transform_indices = @transform_15, window_bounds = array<i64: 1, 64, 128>}]} {
    %c0 = arith.constant 0 : index
    %c0_0 = arith.constant 0 : index
    %c0_1 = arith.constant 0 : index
    %0 = vector.load %arg2[%c0, %c0_0, %c0_1] : memref<1x64x128xf32, #tpu.memory_space<vmem>>, vector<1x64x128xf32>
    %1 = vector.shape_cast %0 : vector<1x64x128xf32> to vector<64x128xf32>
    %2 = arith.truncf %1 : vector<64x128xf32> to vector<64x128xbf16>
    %c0_2 = arith.constant 0 : index
    %c0_3 = arith.constant 0 : index
    %c0_4 = arith.constant 0 : index
    %3 = vector.load %arg5[%c0_2, %c0_3, %c0_4] : memref<4x128x32xbf16, #tpu.memory_space<vmem>>, vector<1x128x32xbf16>
    %4 = vector.shape_cast %3 : vector<1x128x32xbf16> to vector<128x32xbf16>
    %cst = arith.constant dense<0.000000e+00> : vector<64x32xf32>
    %5 = tpu.matmul %2, %4, %cst {dimension_numbers = #tpu.dot_dimension_numbers<[1], [0], [0], [1], [0, 0, 1, 1], [], []>} : vector<64x128xbf16>, vector<128x32xbf16>, vector<64x32xf32> -> vector<64x32xf32>
    %c0_5 = arith.constant 0 : index
    %c0_6 = arith.constant 0 : index
    %c0_7 = arith.constant 0 : index
    %6 = vector.load %arg6[%c0_5, %c0_6, %c0_7] : memref<4x1x32xf32, #tpu.memory_space<vmem>>, vector<1x1x32xf32>
    %7 = vector.shape_cast %6 : vector<1x1x32xf32> to vector<1x32xf32>
    %8 = vector.broadcast %7 : vector<1x32xf32> to vector<64x32xf32>
    %9 = arith.addf %5, %8 : vector<64x32xf32>
    %10 = arith.truncf %9 : vector<64x32xf32> to vector<64x32xbf16>
    %c0_8 = arith.constant 0 : index
    %c0_9 = arith.constant 0 : index
    %c0_10 = arith.constant 0 : index
    %c0_11 = arith.constant 0 : index
    %11 = vector.load %arg3[%c0_8, %c0_9, %c0_10, %c0_11] : memref<1x4x128x32xbf16, #tpu.memory_space<vmem>>, vector<1x1x128x32xbf16>
    %12 = vector.shape_cast %11 : vector<1x1x128x32xbf16> to vector<128x32xbf16>
    %cst_12 = arith.constant dense<0.000000e+00> : vector<64x128xf32>
    %13 = tpu.matmul %10, %12, %cst_12 {dimension_numbers = #tpu.dot_dimension_numbers<[1], [1], [0], [0], [0, 0, 1, 0], [], []>} : vector<64x32xbf16>, vector<128x32xbf16>, vector<64x128xf32> -> vector<64x128xf32>
    %cst_13 = arith.constant dense<0xFF800000> : vector<64xf32>
    %14 = vector.multi_reduction <maximumf>, %13, %cst_13 [1] : vector<64x128xf32> to vector<64xf32>
    %15 = vector.shape_cast %14 : vector<64xf32> to vector<64x1xf32>
    %16 = vector.broadcast %15 : vector<64x1xf32> to vector<64x128xf32>
    %17 = arith.subf %13, %16 : vector<64x128xf32>
    %18 = math.exp %17 : vector<64x128xf32>
    %cst_14 = arith.constant dense<0.000000e+00> : vector<64xf32>
    %19 = vector.multi_reduction <add>, %18, %cst_14 [1] : vector<64x128xf32> to vector<64xf32>
    %20 = vector.shape_cast %19 : vector<64xf32> to vector<64x1xf32>
    %21 = arith.truncf %18 : vector<64x128xf32> to vector<64x128xbf16>
    %c0_15 = arith.constant 0 : index
    %c0_16 = arith.constant 0 : index
    %c0_17 = arith.constant 0 : index
    %c0_18 = arith.constant 0 : index
    %22 = vector.load %arg4[%c0_15, %c0_16, %c0_17, %c0_18] : memref<1x4x128x32xbf16, #tpu.memory_space<vmem>>, vector<1x1x128x32xbf16>
    %23 = vector.shape_cast %22 : vector<1x1x128x32xbf16> to vector<128x32xbf16>
    %cst_19 = arith.constant dense<0.000000e+00> : vector<64x32xf32>
    %24 = tpu.matmul %21, %23, %cst_19 {dimension_numbers = #tpu.dot_dimension_numbers<[1], [0], [0], [1], [0, 0, 1, 1], [], []>} : vector<64x128xbf16>, vector<128x32xbf16>, vector<64x32xf32> -> vector<64x32xf32>
    %25 = tpu.reciprocal %20 {approx = true} : vector<64x1xf32> -> vector<64x1xf32>
    %26 = vector.broadcast %25 : vector<64x1xf32> to vector<64x32xf32>
    %27 = arith.mulf %24, %26 : vector<64x32xf32>
    %28 = arith.truncf %27 : vector<64x32xf32> to vector<64x32xbf16>
    %c1 = arith.constant 1 : index
    %c0_20 = arith.constant 0 : index
    %c0_21 = arith.constant 0 : index
    %29 = vector.load %arg5[%c1, %c0_20, %c0_21] : memref<4x128x32xbf16, #tpu.memory_space<vmem>>, vector<1x128x32xbf16>
    %30 = vector.shape_cast %29 : vector<1x128x32xbf16> to vector<128x32xbf16>
    %cst_22 = arith.constant dense<0.000000e+00> : vector<64x32xf32>
    %31 = tpu.matmul %2, %30, %cst_22 {dimension_numbers = #tpu.dot_dimension_numbers<[1], [0], [0], [1], [0, 0, 1, 1], [], []>} : vector<64x128xbf16>, vector<128x32xbf16>, vector<64x32xf32> -> vector<64x32xf32>
    %c1_23 = arith.constant 1 : index
    %c0_24 = arith.constant 0 : index
    %c0_25 = arith.constant 0 : index
    %32 = vector.load %arg6[%c1_23, %c0_24, %c0_25] : memref<4x1x32xf32, #tpu.memory_space<vmem>>, vector<1x1x32xf32>
    %33 = vector.shape_cast %32 : vector<1x1x32xf32> to vector<1x32xf32>
    %34 = vector.broadcast %33 : vector<1x32xf32> to vector<64x32xf32>
    %35 = arith.addf %31, %34 : vector<64x32xf32>
    %36 = arith.truncf %35 : vector<64x32xf32> to vector<64x32xbf16>
    %c0_26 = arith.constant 0 : index
    %c1_27 = arith.constant 1 : index
    %c0_28 = arith.constant 0 : index
    %c0_29 = arith.constant 0 : index
    %37 = vector.load %arg3[%c0_26, %c1_27, %c0_28, %c0_29] : memref<1x4x128x32xbf16, #tpu.memory_space<vmem>>, vector<1x1x128x32xbf16>
    %38 = vector.shape_cast %37 : vector<1x1x128x32xbf16> to vector<128x32xbf16>
    %cst_30 = arith.constant dense<0.000000e+00> : vector<64x128xf32>
    %39 = tpu.matmul %36, %38, %cst_30 {dimension_numbers = #tpu.dot_dimension_numbers<[1], [1], [0], [0], [0, 0, 1, 0], [], []>} : vector<64x32xbf16>, vector<128x32xbf16>, vector<64x128xf32> -> vector<64x128xf32>
    %cst_31 = arith.constant dense<0xFF800000> : vector<64xf32>
    %40 = vector.multi_reduction <maximumf>, %39, %cst_31 [1] : vector<64x128xf32> to vector<64xf32>
    %41 = vector.shape_cast %40 : vector<64xf32> to vector<64x1xf32>
    %42 = vector.broadcast %41 : vector<64x1xf32> to vector<64x128xf32>
    %43 = arith.subf %39, %42 : vector<64x128xf32>
    %44 = math.exp %43 : vector<64x128xf32>
    %cst_32 = arith.constant dense<0.000000e+00> : vector<64xf32>
    %45 = vector.multi_reduction <add>, %44, %cst_32 [1] : vector<64x128xf32> to vector<64xf32>
    %46 = vector.shape_cast %45 : vector<64xf32> to vector<64x1xf32>
    %47 = arith.truncf %44 : vector<64x128xf32> to vector<64x128xbf16>
    %c0_33 = arith.constant 0 : index
    %c1_34 = arith.constant 1 : index
    %c0_35 = arith.constant 0 : index
    %c0_36 = arith.constant 0 : index
    %48 = vector.load %arg4[%c0_33, %c1_34, %c0_35, %c0_36] : memref<1x4x128x32xbf16, #tpu.memory_space<vmem>>, vector<1x1x128x32xbf16>
    %49 = vector.shape_cast %48 : vector<1x1x128x32xbf16> to vector<128x32xbf16>
    %cst_37 = arith.constant dense<0.000000e+00> : vector<64x32xf32>
    %50 = tpu.matmul %47, %49, %cst_37 {dimension_numbers = #tpu.dot_dimension_numbers<[1], [0], [0], [1], [0, 0, 1, 1], [], []>} : vector<64x128xbf16>, vector<128x32xbf16>, vector<64x32xf32> -> vector<64x32xf32>
    %51 = tpu.reciprocal %46 {approx = true} : vector<64x1xf32> -> vector<64x1xf32>
    %52 = vector.broadcast %51 : vector<64x1xf32> to vector<64x32xf32>
    %53 = arith.mulf %50, %52 : vector<64x32xf32>
    %54 = arith.truncf %53 : vector<64x32xf32> to vector<64x32xbf16>
    %c2 = arith.constant 2 : index
    %c0_38 = arith.constant 0 : index
    %c0_39 = arith.constant 0 : index
    %55 = vector.load %arg5[%c2, %c0_38, %c0_39] : memref<4x128x32xbf16, #tpu.memory_space<vmem>>, vector<1x128x32xbf16>
    %56 = vector.shape_cast %55 : vector<1x128x32xbf16> to vector<128x32xbf16>
    %cst_40 = arith.constant dense<0.000000e+00> : vector<64x32xf32>
    %57 = tpu.matmul %2, %56, %cst_40 {dimension_numbers = #tpu.dot_dimension_numbers<[1], [0], [0], [1], [0, 0, 1, 1], [], []>} : vector<64x128xbf16>, vector<128x32xbf16>, vector<64x32xf32> -> vector<64x32xf32>
    %c2_41 = arith.constant 2 : index
    %c0_42 = arith.constant 0 : index
    %c0_43 = arith.constant 0 : index
    %58 = vector.load %arg6[%c2_41, %c0_42, %c0_43] : memref<4x1x32xf32, #tpu.memory_space<vmem>>, vector<1x1x32xf32>
    %59 = vector.shape_cast %58 : vector<1x1x32xf32> to vector<1x32xf32>
    %60 = vector.broadcast %59 : vector<1x32xf32> to vector<64x32xf32>
    %61 = arith.addf %57, %60 : vector<64x32xf32>
    %62 = arith.truncf %61 : vector<64x32xf32> to vector<64x32xbf16>
    %c0_44 = arith.constant 0 : index
    %c2_45 = arith.constant 2 : index
    %c0_46 = arith.constant 0 : index
    %c0_47 = arith.constant 0 : index
    %63 = vector.load %arg3[%c0_44, %c2_45, %c0_46, %c0_47] : memref<1x4x128x32xbf16, #tpu.memory_space<vmem>>, vector<1x1x128x32xbf16>
    %64 = vector.shape_cast %63 : vector<1x1x128x32xbf16> to vector<128x32xbf16>
    %cst_48 = arith.constant dense<0.000000e+00> : vector<64x128xf32>
    %65 = tpu.matmul %62, %64, %cst_48 {dimension_numbers = #tpu.dot_dimension_numbers<[1], [1], [0], [0], [0, 0, 1, 0], [], []>} : vector<64x32xbf16>, vector<128x32xbf16>, vector<64x128xf32> -> vector<64x128xf32>
    %cst_49 = arith.constant dense<0xFF800000> : vector<64xf32>
    %66 = vector.multi_reduction <maximumf>, %65, %cst_49 [1] : vector<64x128xf32> to vector<64xf32>
    %67 = vector.shape_cast %66 : vector<64xf32> to vector<64x1xf32>
    %68 = vector.broadcast %67 : vector<64x1xf32> to vector<64x128xf32>
    %69 = arith.subf %65, %68 : vector<64x128xf32>
    %70 = math.exp %69 : vector<64x128xf32>
    %cst_50 = arith.constant dense<0.000000e+00> : vector<64xf32>
    %71 = vector.multi_reduction <add>, %70, %cst_50 [1] : vector<64x128xf32> to vector<64xf32>
    %72 = vector.shape_cast %71 : vector<64xf32> to vector<64x1xf32>
    %73 = arith.truncf %70 : vector<64x128xf32> to vector<64x128xbf16>
    %c0_51 = arith.constant 0 : index
    %c2_52 = arith.constant 2 : index
    %c0_53 = arith.constant 0 : index
    %c0_54 = arith.constant 0 : index
    %74 = vector.load %arg4[%c0_51, %c2_52, %c0_53, %c0_54] : memref<1x4x128x32xbf16, #tpu.memory_space<vmem>>, vector<1x1x128x32xbf16>
    %75 = vector.shape_cast %74 : vector<1x1x128x32xbf16> to vector<128x32xbf16>
    %cst_55 = arith.constant dense<0.000000e+00> : vector<64x32xf32>
    %76 = tpu.matmul %73, %75, %cst_55 {dimension_numbers = #tpu.dot_dimension_numbers<[1], [0], [0], [1], [0, 0, 1, 1], [], []>} : vector<64x128xbf16>, vector<128x32xbf16>, vector<64x32xf32> -> vector<64x32xf32>
    %77 = tpu.reciprocal %72 {approx = true} : vector<64x1xf32> -> vector<64x1xf32>
    %78 = vector.broadcast %77 : vector<64x1xf32> to vector<64x32xf32>
    %79 = arith.mulf %76, %78 : vector<64x32xf32>
    %80 = arith.truncf %79 : vector<64x32xf32> to vector<64x32xbf16>
    %c3 = arith.constant 3 : index
    %c0_56 = arith.constant 0 : index
    %c0_57 = arith.constant 0 : index
    %81 = vector.load %arg5[%c3, %c0_56, %c0_57] : memref<4x128x32xbf16, #tpu.memory_space<vmem>>, vector<1x128x32xbf16>
    %82 = vector.shape_cast %81 : vector<1x128x32xbf16> to vector<128x32xbf16>
    %cst_58 = arith.constant dense<0.000000e+00> : vector<64x32xf32>
    %83 = tpu.matmul %2, %82, %cst_58 {dimension_numbers = #tpu.dot_dimension_numbers<[1], [0], [0], [1], [0, 0, 1, 1], [], []>} : vector<64x128xbf16>, vector<128x32xbf16>, vector<64x32xf32> -> vector<64x32xf32>
    %c3_59 = arith.constant 3 : index
    %c0_60 = arith.constant 0 : index
    %c0_61 = arith.constant 0 : index
    %84 = vector.load %arg6[%c3_59, %c0_60, %c0_61] : memref<4x1x32xf32, #tpu.memory_space<vmem>>, vector<1x1x32xf32>
    %85 = vector.shape_cast %84 : vector<1x1x32xf32> to vector<1x32xf32>
    %86 = vector.broadcast %85 : vector<1x32xf32> to vector<64x32xf32>
    %87 = arith.addf %83, %86 : vector<64x32xf32>
    %88 = arith.truncf %87 : vector<64x32xf32> to vector<64x32xbf16>
    %c0_62 = arith.constant 0 : index
    %c3_63 = arith.constant 3 : index
    %c0_64 = arith.constant 0 : index
    %c0_65 = arith.constant 0 : index
    %89 = vector.load %arg3[%c0_62, %c3_63, %c0_64, %c0_65] : memref<1x4x128x32xbf16, #tpu.memory_space<vmem>>, vector<1x1x128x32xbf16>
    %90 = vector.shape_cast %89 : vector<1x1x128x32xbf16> to vector<128x32xbf16>
    %cst_66 = arith.constant dense<0.000000e+00> : vector<64x128xf32>
    %91 = tpu.matmul %88, %90, %cst_66 {dimension_numbers = #tpu.dot_dimension_numbers<[1], [1], [0], [0], [0, 0, 1, 0], [], []>} : vector<64x32xbf16>, vector<128x32xbf16>, vector<64x128xf32> -> vector<64x128xf32>
    %cst_67 = arith.constant dense<0xFF800000> : vector<64xf32>
    %92 = vector.multi_reduction <maximumf>, %91, %cst_67 [1] : vector<64x128xf32> to vector<64xf32>
    %93 = vector.shape_cast %92 : vector<64xf32> to vector<64x1xf32>
    %94 = vector.broadcast %93 : vector<64x1xf32> to vector<64x128xf32>
    %95 = arith.subf %91, %94 : vector<64x128xf32>
    %96 = math.exp %95 : vector<64x128xf32>
    %cst_68 = arith.constant dense<0.000000e+00> : vector<64xf32>
    %97 = vector.multi_reduction <add>, %96, %cst_68 [1] : vector<64x128xf32> to vector<64xf32>
    %98 = vector.shape_cast %97 : vector<64xf32> to vector<64x1xf32>
    %99 = arith.truncf %96 : vector<64x128xf32> to vector<64x128xbf16>
    %c0_69 = arith.constant 0 : index
    %c3_70 = arith.constant 3 : index
    %c0_71 = arith.constant 0 : index
    %c0_72 = arith.constant 0 : index
    %100 = vector.load %arg4[%c0_69, %c3_70, %c0_71, %c0_72] : memref<1x4x128x32xbf16, #tpu.memory_space<vmem>>, vector<1x1x128x32xbf16>
    %101 = vector.shape_cast %100 : vector<1x1x128x32xbf16> to vector<128x32xbf16>
    %cst_73 = arith.constant dense<0.000000e+00> : vector<64x32xf32>
    %102 = tpu.matmul %99, %101, %cst_73 {dimension_numbers = #tpu.dot_dimension_numbers<[1], [0], [0], [1], [0, 0, 1, 1], [], []>} : vector<64x128xbf16>, vector<128x32xbf16>, vector<64x32xf32> -> vector<64x32xf32>
    %103 = tpu.reciprocal %98 {approx = true} : vector<64x1xf32> -> vector<64x1xf32>
    %104 = vector.broadcast %103 : vector<64x1xf32> to vector<64x32xf32>
    %105 = arith.mulf %102, %104 : vector<64x32xf32>
    %106 = arith.truncf %105 : vector<64x32xf32> to vector<64x32xbf16>
    %107 = tpu.concatenate %28, %54, %80, %106 in 1 : vector<64x32xbf16>, vector<64x32xbf16>, vector<64x32xbf16>, vector<64x32xbf16> -> vector<64x128xbf16>
    %c0_74 = arith.constant 0 : index
    %c0_75 = arith.constant 0 : index
    %108 = vector.load %arg7[%c0_74, %c0_75] : memref<128x128xbf16, #tpu.memory_space<vmem>>, vector<128x128xbf16>
    %cst_76 = arith.constant dense<0.000000e+00> : vector<64x128xf32>
    %109 = tpu.matmul %107, %108, %cst_76 {dimension_numbers = #tpu.dot_dimension_numbers<[1], [0], [0], [1], [0, 0, 1, 1], [], []>} : vector<64x128xbf16>, vector<128x128xbf16>, vector<64x128xf32> -> vector<64x128xf32>
    %c0_77 = arith.constant 0 : index
    %c0_78 = arith.constant 0 : index
    %110 = vector.load %arg8[%c0_77, %c0_78] : memref<1x128xf32, #tpu.memory_space<vmem>>, vector<1x128xf32>
    %111 = vector.broadcast %110 : vector<1x128xf32> to vector<64x128xf32>
    %112 = arith.addf %109, %111 : vector<64x128xf32>
    %113 = arith.addf %1, %112 : vector<64x128xf32>
    %c0_79 = arith.constant 0 : index
    %c0_80 = arith.constant 0 : index
    %114 = vector.load %arg13[%c0_79, %c0_80] : memref<1x128xf32, #tpu.memory_space<vmem>>, vector<1x128xf32>
    %c0_81 = arith.constant 0 : index
    %c0_82 = arith.constant 0 : index
    %115 = vector.load %arg14[%c0_81, %c0_82] : memref<1x128xf32, #tpu.memory_space<vmem>>, vector<1x128xf32>
    %cst_83 = arith.constant dense<0.000000e+00> : vector<64xf32>
    %116 = vector.multi_reduction <add>, %113, %cst_83 [1] : vector<64x128xf32> to vector<64xf32>
    %117 = vector.shape_cast %116 : vector<64xf32> to vector<64x1xf32>
    %cst_84 = arith.constant 1.280000e+02 : f32
    %118 = vector.broadcast %cst_84 : f32 to vector<64x1xf32>
    %119 = arith.divf %117, %118 : vector<64x1xf32>
    %120 = vector.broadcast %119 : vector<64x1xf32> to vector<64x128xf32>
    %121 = arith.subf %113, %120 : vector<64x128xf32>
    %122 = arith.mulf %121, %121 : vector<64x128xf32>
    %cst_85 = arith.constant dense<0.000000e+00> : vector<64xf32>
    %123 = vector.multi_reduction <add>, %122, %cst_85 [1] : vector<64x128xf32> to vector<64xf32>
    %124 = vector.shape_cast %123 : vector<64xf32> to vector<64x1xf32>
    %cst_86 = arith.constant 1.280000e+02 : f32
    %125 = vector.broadcast %cst_86 : f32 to vector<64x1xf32>
    %126 = arith.divf %124, %125 : vector<64x1xf32>
    %127 = vector.broadcast %119 : vector<64x1xf32> to vector<64x128xf32>
    %128 = arith.subf %113, %127 : vector<64x128xf32>
    %cst_87 = arith.constant 9.99999996E-13 : f32
    %129 = vector.broadcast %cst_87 : f32 to vector<64x1xf32>
    %130 = arith.addf %126, %129 : vector<64x1xf32>
    %131 = math.rsqrt %130 : vector<64x1xf32>
    %132 = vector.broadcast %131 : vector<64x1xf32> to vector<64x128xf32>
    %133 = arith.mulf %128, %132 : vector<64x128xf32>
    %134 = vector.broadcast %114 : vector<1x128xf32> to vector<64x128xf32>
    %135 = arith.mulf %134, %133 : vector<64x128xf32>
    %136 = vector.broadcast %115 : vector<1x128xf32> to vector<64x128xf32>
    %137 = arith.addf %135, %136 : vector<64x128xf32>
    %138 = arith.truncf %137 : vector<64x128xf32> to vector<64x128xbf16>
    %c0_88 = arith.constant 0 : index
    %c0_89 = arith.constant 0 : index
    %139 = vector.load %arg9[%c0_88, %c0_89] : memref<128x256xbf16, #tpu.memory_space<vmem>>, vector<128x256xbf16>
    %cst_90 = arith.constant dense<0.000000e+00> : vector<64x256xf32>
    %140 = tpu.matmul %138, %139, %cst_90 {dimension_numbers = #tpu.dot_dimension_numbers<[1], [0], [0], [1], [0, 0, 1, 1], [], []>} : vector<64x128xbf16>, vector<128x256xbf16>, vector<64x256xf32> -> vector<64x256xf32>
    %c0_91 = arith.constant 0 : index
    %c0_92 = arith.constant 0 : index
    %141 = vector.load %arg10[%c0_91, %c0_92] : memref<1x256xf32, #tpu.memory_space<vmem>>, vector<1x256xf32>
    %142 = vector.broadcast %141 : vector<1x256xf32> to vector<64x256xf32>
    %143 = arith.addf %140, %142 : vector<64x256xf32>
    %cst_93 = arith.constant 0.000000e+00 : f32
    %144 = vector.broadcast %cst_93 : f32 to vector<64x256xf32>
    %145 = arith.maximumf %143, %144 : vector<64x256xf32>
    %146 = arith.truncf %145 : vector<64x256xf32> to vector<64x256xbf16>
    %c0_94 = arith.constant 0 : index
    %c0_95 = arith.constant 0 : index
    %147 = vector.load %arg11[%c0_94, %c0_95] : memref<256x128xbf16, #tpu.memory_space<vmem>>, vector<256x128xbf16>
    %cst_96 = arith.constant dense<0.000000e+00> : vector<64x128xf32>
    %148 = tpu.matmul %146, %147, %cst_96 {dimension_numbers = #tpu.dot_dimension_numbers<[1], [0], [0], [1], [0, 0, 1, 1], [], []>} : vector<64x256xbf16>, vector<256x128xbf16>, vector<64x128xf32> -> vector<64x128xf32>
    %c0_97 = arith.constant 0 : index
    %c0_98 = arith.constant 0 : index
    %149 = vector.load %arg12[%c0_97, %c0_98] : memref<1x128xf32, #tpu.memory_space<vmem>>, vector<1x128xf32>
    %150 = vector.broadcast %149 : vector<1x128xf32> to vector<64x128xf32>
    %151 = arith.addf %148, %150 : vector<64x128xf32>
    %152 = arith.addf %113, %151 : vector<64x128xf32>
    %c0_99 = arith.constant 0 : index
    %c0_100 = arith.constant 0 : index
    %153 = vector.load %arg15[%c0_99, %c0_100] : memref<1x128xf32, #tpu.memory_space<vmem>>, vector<1x128xf32>
    %c0_101 = arith.constant 0 : index
    %c0_102 = arith.constant 0 : index
    %154 = vector.load %arg16[%c0_101, %c0_102] : memref<1x128xf32, #tpu.memory_space<vmem>>, vector<1x128xf32>
    %cst_103 = arith.constant dense<0.000000e+00> : vector<64xf32>
    %155 = vector.multi_reduction <add>, %152, %cst_103 [1] : vector<64x128xf32> to vector<64xf32>
    %156 = vector.shape_cast %155 : vector<64xf32> to vector<64x1xf32>
    %cst_104 = arith.constant 1.280000e+02 : f32
    %157 = vector.broadcast %cst_104 : f32 to vector<64x1xf32>
    %158 = arith.divf %156, %157 : vector<64x1xf32>
    %159 = vector.broadcast %158 : vector<64x1xf32> to vector<64x128xf32>
    %160 = arith.subf %152, %159 : vector<64x128xf32>
    %161 = arith.mulf %160, %160 : vector<64x128xf32>
    %cst_105 = arith.constant dense<0.000000e+00> : vector<64xf32>
    %162 = vector.multi_reduction <add>, %161, %cst_105 [1] : vector<64x128xf32> to vector<64xf32>
    %163 = vector.shape_cast %162 : vector<64xf32> to vector<64x1xf32>
    %cst_106 = arith.constant 1.280000e+02 : f32
    %164 = vector.broadcast %cst_106 : f32 to vector<64x1xf32>
    %165 = arith.divf %163, %164 : vector<64x1xf32>
    %166 = vector.broadcast %158 : vector<64x1xf32> to vector<64x128xf32>
    %167 = arith.subf %152, %166 : vector<64x128xf32>
    %cst_107 = arith.constant 9.99999996E-13 : f32
    %168 = vector.broadcast %cst_107 : f32 to vector<64x1xf32>
    %169 = arith.addf %165, %168 : vector<64x1xf32>
    %170 = math.rsqrt %169 : vector<64x1xf32>
    %171 = vector.broadcast %170 : vector<64x1xf32> to vector<64x128xf32>
    %172 = arith.mulf %167, %171 : vector<64x128xf32>
    %173 = vector.broadcast %153 : vector<1x128xf32> to vector<64x128xf32>
    %174 = arith.mulf %173, %172 : vector<64x128xf32>
    %175 = vector.broadcast %154 : vector<1x128xf32> to vector<64x128xf32>
    %176 = arith.addf %174, %175 : vector<64x128xf32>
    %c0_108 = arith.constant 0 : index
    %c0_109 = arith.constant 0 : index
    %c0_110 = arith.constant 0 : index
    %177 = vector.load %arg17[%c0_108, %c0_109, %c0_110] : memref<1x64x128xf32, #tpu.memory_space<vmem>>, vector<1x64x128xf32>
    %178 = vector.shape_cast %177 : vector<1x64x128xf32> to vector<64x128xf32>
    %179 = vector.shape_cast %176 : vector<64x128xf32> to vector<1x64x128xf32>
    tpu.vector_store %arg17[%c0_108, %c0_109, %c0_110], %179 {strides = array<i32>} : memref<1x64x128xf32, #tpu.memory_space<vmem>>, vector<1x64x128xf32>,
    return
  }
  func.func @transform_0(%arg0: i32, %arg1: i32) -> (i32, i32, i32) {
    %c0_i32 = arith.constant 0 : i32
    %c0_i32_0 = arith.constant 0 : i32
    return %arg0, %arg1, %c0_i32 : i32, i32, i32
  }
  func.func @transform_1(%arg0: i32, %arg1: i32) -> (i32, i32, i32, i32) {
    %c0_i32 = arith.constant 0 : i32
    %c0_i32_0 = arith.constant 0 : i32
    %c0_i32_1 = arith.constant 0 : i32
    %c0_i32_2 = arith.constant 0 : i32
    return %arg0, %c0_i32, %c0_i32_0, %c0_i32_1 : i32, i32, i32, i32
  }
  func.func @transform_2(%arg0: i32, %arg1: i32) -> (i32, i32, i32, i32) {
    %c0_i32 = arith.constant 0 : i32
    %c0_i32_0 = arith.constant 0 : i32
    %c0_i32_1 = arith.constant 0 : i32
    %c0_i32_2 = arith.constant 0 : i32
    return %arg0, %c0_i32, %c0_i32_0, %c0_i32_1 : i32, i32, i32, i32
  }
  func.func @transform_3(%arg0: i32, %arg1: i32) -> (i32, i32, i32) {
    %c0_i32 = arith.constant 0 : i32
    %c0_i32_0 = arith.constant 0 : i32
    %c0_i32_1 = arith.constant 0 : i32
    %c0_i32_2 = arith.constant 0 : i32
    return %c0_i32, %c0_i32_0, %c0_i32_1 : i32, i32, i32
  }
  func.func @transform_4(%arg0: i32, %arg1: i32) -> (i32, i32, i32) {
    %c0_i32 = arith.constant 0 : i32
    %c0_i32_0 = arith.constant 0 : i32
    %c0_i32_1 = arith.constant 0 : i32
    %c0_i32_2 = arith.constant 0 : i32
    return %c0_i32, %c0_i32_0, %c0_i32_1 : i32, i32, i32
  }
  func.func @transform_5(%arg0: i32, %arg1: i32) -> (i32, i32) {
    %c0_i32 = arith.constant 0 : i32
    %c0_i32_0 = arith.constant 0 : i32
    %c0_i32_1 = arith.constant 0 : i32
    return %c0_i32, %c0_i32_0 : i32, i32
  }
  func.func @transform_6(%arg0: i32, %arg1: i32) -> (i32, i32) {
    %c0_i32 = arith.constant 0 : i32
    %c0_i32_0 = arith.constant 0 : i32
    %c0_i32_1 = arith.constant 0 : i32
    return %c0_i32, %c0_i32_0 : i32, i32
  }
  func.func @transform_7(%arg0: i32, %arg1: i32) -> (i32, i32) {
    %c0_i32 = arith.constant 0 : i32
    %c0_i32_0 = arith.constant 0 : i32
    %c0_i32_1 = arith.constant 0 : i32
    return %c0_i32, %c0_i32_0 : i32, i32
  }
  func.func @transform_8(%arg0: i32, %arg1: i32) -> (i32, i32) {
    %c0_i32 = arith.constant 0 : i32
    %c0_i32_0 = arith.constant 0 : i32
    %c0_i32_1 = arith.constant 0 : i32
    return %c0_i32, %c0_i32_0 : i32, i32
  }
  func.func @transform_9(%arg0: i32, %arg1: i32) -> (i32, i32) {
    %c0_i32 = arith.constant 0 : i32
    %c0_i32_0 = arith.constant 0 : i32
    %c0_i32_1 = arith.constant 0 : i32
    return %c0_i32, %c0_i32_0 : i32, i32
  }
  func.func @transform_10(%arg0: i32, %arg1: i32) -> (i32, i32) {
    %c0_i32 = arith.constant 0 : i32
    %c0_i32_0 = arith.constant 0 : i32
    %c0_i32_1 = arith.constant 0 : i32
    return %c0_i32, %c0_i32_0 : i32, i32
  }
  func.func @transform_11(%arg0: i32, %arg1: i32) -> (i32, i32) {
    %c0_i32 = arith.constant 0 : i32
    %c0_i32_0 = arith.constant 0 : i32
    %c0_i32_1 = arith.constant 0 : i32
    return %c0_i32, %c0_i32_0 : i32, i32
  }
  func.func @transform_12(%arg0: i32, %arg1: i32) -> (i32, i32) {
    %c0_i32 = arith.constant 0 : i32
    %c0_i32_0 = arith.constant 0 : i32
    %c0_i32_1 = arith.constant 0 : i32
    return %c0_i32, %c0_i32_0 : i32, i32
  }
  func.func @transform_13(%arg0: i32, %arg1: i32) -> (i32, i32) {
    %c0_i32 = arith.constant 0 : i32
    %c0_i32_0 = arith.constant 0 : i32
    %c0_i32_1 = arith.constant 0 : i32
    return %c0_i32, %c0_i32_0 : i32, i32
  }
  func.func @transform_14(%arg0: i32, %arg1: i32) -> (i32, i32) {
    %c0_i32 = arith.constant 0 : i32
    %c0_i32_0 = arith.constant 0 : i32
    %c0_i32_1 = arith.constant 0 : i32
    return %c0_i32, %c0_i32_0 : i32, i32
  }
  func.func @transform_15(%arg0: i32, %arg1: i32) -> (i32, i32, i32) {
    %c0_i32 = arith.constant 0 : i32
    %c0_i32_0 = arith.constant 0 : i32
    return %arg0, %arg1, %c0_i32 : i32, i32, i32
  }
}

</mosaic_0001>

<bundles_post_ra>
// kernel: tpu_custom_call.1
= control target key start
LH: loop header
LB: loop body
LE: loop exit
PB: predicated region body
PF: predicated region fallthrough
CT: control target
= control target key end

     0   :  { %s5758_s0 = inlined_call_operand.vmem [shape: f32[2,128,128], index: 0, kind: input, shape index: {}]   ;;  %s5759_s1 = inlined_call_operand.vmem [shape: bf16[2,4,128,32], index: 1, kind: input, shape index: {}]   ;;  %s5760_s2 = inlined_call_operand.vmem [shape: bf16[2,4,128,32], index: 2, kind: input, shape index: {}]   ;;  %s5761_s3 = inlined_call_operand.vmem [shape: bf16[4,128,32], index: 3, kind: input, shape index: {}]   ;;  %s5762_s4 = inlined_call_operand.vmem [shape: f32[4,1,32], index: 4, kind: input, shape index: {}]   ;;  %s5763_s5 = inlined_call_operand.vmem [shape: bf16[128,128], index: 5, kind: input, shape index: {}]   ;;  %s5764_s6 = inlined_call_operand.vmem [shape: f32[1,128], index: 6, kind: input, shape index: {}]   ;;  %s5765_s7 = inlined_call_operand.vmem [shape: bf16[128,256], index: 7, kind: input, shape index: {}]   ;;  %s5766_s8 = inlined_call_operand.vmem [shape: f32[1,256], index: 8, kind: input, shape index: {}]   ;;  %s5767_s9 = inlined_call_operand.vmem [shape: bf16[256,128], index: 9, kind: input, shape index: {}]   ;;  %s5768_s10 = inlined_call_operand.vmem [shape: f32[1,128], index: 10, kind: input, shape index: {}]   ;;  %s5769_s11 = inlined_call_operand.vmem [shape: f32[1,128], index: 11, kind: input, shape index: {}]   ;;  %s5770_s12 = inlined_call_operand.vmem [shape: f32[1,128], index: 12, kind: input, shape index: {}]   ;;  %s5771_s13 = inlined_call_operand.vmem [shape: f32[1,128], index: 13, kind: input, shape index: {}]   ;;  %s5772_s14 = inlined_call_operand.vmem [shape: f32[1,128], index: 14, kind: input, shape index: {}]   ;;  %s5773_s15 = inlined_call_operand.hbm [shape: f32[2,128,128], index: 15, kind: output, shape index: {}]  }
   0x1   :  { %5784 = sst [smem:[#allocation14_spill]] %s5758_s0 }
   0x2   :  { %5785 = sst [smem:[#allocation15_spill]] %s5772_s14 }
   0x3   :  { %5786 = sst [smem:[#allocation16_spill]] %s5773_s15 }
   0x4   :  { %20 = vsyncpa [#allocation3], 0 }
   0x5   :  { %22 = vsyncpa [#allocation3 + $0x1], 0  ;;  %s4632_s18 = smov 0   ;;  %s4634_s19 = smov 0  }
   0x6   :  { %s4636_s20 = smov 0   ;;  %s4638_s21 = smov 0  }
   0x7   :  { %s4640_s22 = smov 0   ;;  %s4642_s23 = smov 0  }
   0x8   :  { %s4644_s24 = smov 0   ;;  %s4646_s25 = smov 0  }
   0x9 LB: > { %5787 = sst [smem:[#allocation5_spill]] %s4516_s18  ;;  %s3321_s26 = sadd.s32 4294967295, %s4544_s25   ;;  %s4544_s25 = sphi %s4646_s25, %s28_s25   ;;  %s4540_s24 = sphi %s4644_s24, %s5809_s24   ;;  %s4536_s23 = sphi %s4642_s23, %s5808_s23   ;;  %s4532_s22 = sphi %s4640_s22, %s5807_s22   ;;  %s4528_s21 = sphi %s4638_s21, %s5806_s21   ;;  %s4524_s20 = sphi %s4636_s20, %s5805_s20   ;;  %s4520_s19 = sphi %s4634_s19, %s5811_s19   ;;  %s4516_s18 = sphi %s4632_s18, %s5810_s18  }
   0xa   : > { %5788 = sst [smem:[#allocation6_spill]] %s4524_s20  ;;  %s3322_s27 = sadd.s32 4294967294, %s4544_s25  }
   0xb   : > { %5789 = sst [smem:[#allocation7_spill]] %s4536_s23  ;;  %s37_s28 = sadd.s32 1, %s4536_s23 }
   0xc   : > { %5790 = sst [smem:[#allocation8_spill]] %s4540_s24  ;;  %p38_p0 = scmp.ge.s32.totalorder %s37_s28, 2 }
   0xd   : > { %s40_s29 = sadd.s32 1, %s4540_s24  ;;  %p391_p1 = scmp.ne.s32.totalorder %s4524_s20, %s4520_s19 }
   0xe   : > { %p392_p2 = scmp.eq.s32.totalorder %s3321_s26, 3  ;;  %s5813_s28 = smov (%p38_p0, %s37_s28), 0 }
   0xf   : > { %5791 = sst [smem:[#allocation9_spill]] %s5813_s28  ;;  %s5815_s29 = smov (!%p38_p0, %s40_s29), %s4540_s24 }
  0x10   : > { %s377_s30 = ssub.s32 %s4536_s23, %s5813_s28  ;;  %p4683_p3 = por %p392_p2, %p391_p1 }
  0x11   : > { %p42_p4 = scmp.ge.s32.totalorder %s5815_s29, 2  ;;  %p397_p5 = scmp.ne.s32.totalorder %s4520_s19, %s4516_s18 }
  0x12   : > { %s5792_s16 = scalar_select %p4683_p3, 1, 0 }
  0x13   : > { %p398_p6 = scmp.eq.s32.totalorder %s3322_s27, 3  ;;  %p3325_p7 = scmp.ge.s32.totalorder %s4544_s25, 1 }
  0x14   : > { %5793 = sst [smem:[#allocation10_spill]] %s5792_s16  ;;  %s5817_s29 = smov (%p42_p4, %s5815_s29), 0 }
  0x15   : > { %5794 = sst [smem:[#allocation11_spill]] %s5817_s29  ;;  %p4692_p8 = por %p398_p6, %p397_p5 }
  0x16   : > { %p481_p9 = scmp.lt.s32.totalorder %s4544_s25, 5  ;;  %s376_s26 = ssub.s32 %s4540_s24, %s5817_s29 }
  0x17   : > { %s5795_s17 = scalar_select %p4692_p8, 1, 0 }
  0x18   : > { %s381_s15 = sadd.s32 1, %s4524_s20  ;;  %s378_s14 = sor.u32 %s377_s30, %s376_s26 }
  0x19   : > { %5796 = sst [smem:[#allocation12_spill]] %s5795_s17  ;;  %p482_p10 = pnand %p3325_p7, %p481_p9 }
  0x1a   : > { %p379_p11 = scmp.eq.s32.totalorder %s378_s14, 0  ;;  %s4713_s14 = sshll.u32 (!%p482_p10), %s4528_s21, 3 }
  0x1b   : > { %485 = sbr.rel (%p482_p10) target bundleno = 2664 (0xa68), region = 80  ;;  %p544_p12 = scmp.lt.s32.totalorder (!%p482_p10), %s4532_s22, 1 }
  0x1c   : > { %s4701_s28 = scalar_select %p379_p11, %s4524_s20, %s381_s15  }
  0x1d   : > { %p546_p13 = scmp.lt.s32.totalorder (!%p482_p10), %s4713_s14, 15  ;;  %s5798_s0 = sld [smem:[#allocation14_spill]] (!%p482_p10) }
  0x1e   : > { %5797 = sst [smem:[#allocation13_spill]] %s4701_s28  ;;  %s4547_s17 = smov (!%p482_p10), 64  }
  0x1f   : > { %s4548_s27 = smov (!%p482_p10), 96   ;;  %s5799_s26 = sld [smem:[#allocation15_spill]] (!%p482_p10) }
  0x20   : > { %v4056_v0 = vld [vmem:[%s5761_s3 + $0x38] sm:$0xff]  ;;  %v4055_v1 = vld [vmem:[%s5761_s3 + $0x30] sm:$0xff]  ;;  %v4054_v2 = vld [vmem:[%s5761_s3 + $0x28] sm:$0xff]  ;;  %s4721_s23 = scalar_select %p544_p12, %s4532_s22, 1  ;;  %vm733_vm0 = vcmask 261120   ;;  %vm2301_vm1 = vcmask 523264  }
  0x21   : > { %644 = vmatpush.bf16.msra.mxu0 %v4056_v0  ;;  %v4053_v3 = vld [vmem:[%s5761_s3 + $0x20] sm:$0xff]  ;;  %s547_s30 = scalar_select %p546_p13, %s4713_s14, 15  ;;  %v4052_v4 = vld [vmem:[%s5761_s3 + $0x18] sm:$0xff]  ;;  %v4051_v5 = vld [vmem:[%s5761_s3 + $0x10] sm:$0xff]  ;;  %vm2310_vm2 = vcmask 785408  }
  0x22   : > { %s3328_s21 = sshll.u32 %s4721_s23, 4  ;;  %v4050_v6 = vld [vmem:[%s5761_s3 + $0x8] sm:$0xff]  ;;  %v4049_v7 = vld [vmem:[%s5761_s3] sm:$0xff]  ;;  %s4047_s20 = sshll.u32 %s4721_s23, 8  ;;  %v4080_v20 = vld [vmem:[%s5761_s3 + $0x78] sm:$0xff] }
  0x23   : > { %s549_s29 = sadd.s32 %s3328_s21, %s547_s30  ;;  %s4757_s21 = scalar_lea.vmem %s5759_s1, %s4047_s20  ;;  %1046 = vmatpush.bf16.msra.mxu3 %v4080_v20  ;;  %v4079_v23 = vld [vmem:[%s5761_s3 + $0x70] sm:$0xff]  ;;  %v4078_v36 = vld [vmem:[%s5761_s3 + $0x68] sm:$0xff]  ;;  %v4077_v37 = vld [vmem:[%s5761_s3 + $0x60] sm:$0xff] }
  0x24   : > { %s3329_s15 = sshll.u32 %s549_s29, 3  ;;  %v4064_v14 = vld [vmem:[%s4757_s21 + $0x38] sm:$0xff]  ;;  %v4063_v16 = vld [vmem:[%s4757_s21 + $0x30] sm:$0xff]  ;;  %v4062_v22 = vld [vmem:[%s4757_s21 + $0x28] sm:$0xff]  ;;  %s4877_s18 = scalar_lea.vmem %s5760_s2, %s4047_s20 }
  0x25   : > { %645 = vmatpush.bf16.msra.mxu0 %v4055_v1  ;;  %s4737_s16 = scalar_lea.vmem %s5798_s0, %s3329_s15  ;;  %v768_v15 = vsel %vm733_vm0, %v4064_v14, 0  ;;  %v765_v17 = vsel %vm733_vm0, %v4063_v16, 0  ;;  %v762_v24 = vsel %vm733_vm0, %v4062_v22, 0  ;;  %v4061_v25 = vld [vmem:[%s4757_s21 + $0x20] sm:$0xff]  ;;  %v4060_v30 = vld [vmem:[%s4757_s21 + $0x18] sm:$0xff]  ;;  %v4059_v32 = vld [vmem:[%s4757_s21 + $0x10] sm:$0xff] }
  0x26   : > { %v564_v8 = vld [vmem:[%s4737_s16] sm:$0xff]  ;;  %v565_v9 = vld [vmem:[%s4737_s16 + $0x8] sm:$0xff]  ;;  %v566_v11 = vld [vmem:[%s4737_s16 + $0x10] sm:$0xff]  ;;  %770 = vmatpush.bf16.xpose.msra.mxu1 %v768_v15  ;;  %v759_v26 = vsel %vm733_vm0, %v4061_v25, 0  ;;  %v756_v31 = vsel %vm733_vm0, %v4060_v30, 0  ;;  %v753_v33 = vsel %vm733_vm0, %v4059_v32, 0 }
  0x27   : > { %v4744_v10 = vpack.c.bf16 %v565_v9, %v564_v8  ;;  %v567_v12 = vld [vmem:[%s4737_s16 + $0x18] sm:$0xff]  ;;  %v568_v18 = vld [vmem:[%s4737_s16 + $0x20] sm:$0xff]  ;;  %v569_v19 = vld [vmem:[%s4737_s16 + $0x28] sm:$0xff]  ;;  %1047 = vmatpush.bf16.msra.mxu3 %v4079_v23  ;;  %s4043_s20 = sshll.u32 %s4532_s22, 4 }
  0x28   : > { %v4750_v13 = vpack.c.bf16 %v567_v12, %v566_v11  ;;  %v4769_v21 = vpack.c.bf16 %v569_v19, %v568_v18  ;;  %v570_v27 = vld [vmem:[%s4737_s16 + $0x30] sm:$0xff]  ;;  %v571_v28 = vld [vmem:[%s4737_s16 + $0x38] sm:$0xff]  ;;  %v4058_v34 = vld [vmem:[%s4757_s21 + $0x8] sm:$0xff]  ;;  %s3209_s30 = sadd.s32 %s4043_s20, %s4713_s14 }
  0x29   : > { %646 = vmatpush.bf16.msra.mxu0 %v4054_v2  ;;  %v4781_v29 = vpack.c.bf16 %v571_v28, %v570_v27  ;;  %v750_v35 = vsel %vm733_vm0, %v4058_v34, 0  ;;  %v4057_v38 = vld [vmem:[%s4757_s21] sm:$0xff]  ;;  %v4076_v40 = vld [vmem:[%s5761_s3 + $0x58] sm:$0xff]  ;;  %v4075_v41 = vld [vmem:[%s5761_s3 + $0x50] sm:$0xff]  ;;  %s4044_s24 = sshll.u32 %s3209_s30, 3 }
  0x2a   : > { %v747_v39 = vsel %vm733_vm0, %v4057_v38, 0  ;;  %v4074_v42 = vld [vmem:[%s5761_s3 + $0x48] sm:$0xff]  ;;  %v4073_v43 = vld [vmem:[%s5761_s3 + $0x40] sm:$0xff]  ;;  %v4088_v55 = vld [vmem:[%s4757_s21 + $0x78] sm:$0xff] }
  0x2b   : > { %1048 = vmatpush.bf16.msra.mxu3 %v4078_v36  ;;  %v4270_v45 = vld [vmem:[%s5762_s4] ss:$0 sm:$0xff]  ;;  %v4820_v56 = vsel %vm733_vm0, %v4088_v55, 0  ;;  %v4087_v58 = vld [vmem:[%s4757_s21 + $0x70] sm:$0xff]  ;;  %v4086_v63 = vld [vmem:[%s4757_s21 + $0x68] sm:$0xff] }
  0x2c   : > { %v4825_v59 = vsel %vm733_vm0, %v4087_v58, 0  ;;  %v4832_v1 = vsel %vm733_vm0, %v4086_v63, 0  ;;  %v4084_v8 = vld [vmem:[%s4757_s21 + $0x58] sm:$0xff]  ;;  %v4083_v12 = vld [vmem:[%s4757_s21 + $0x50] sm:$0xff]  ;;  %v4082_v15 = vld [vmem:[%s4757_s21 + $0x48] sm:$0xff] }
  0x2d   : > { %647 = vmatpush.bf16.msra.mxu0 %v4053_v3  ;;  %v4085_v3 = vld [vmem:[%s4757_s21 + $0x60] sm:$0xff]  ;;  %v4843_v11 = vsel %vm733_vm0, %v4084_v8, 0  ;;  %v4848_v14 = vsel %vm733_vm0, %v4083_v12, 0  ;;  %v4853_v16 = vsel %vm733_vm0, %v4082_v15, 0  ;;  %v4072_v36 = vld [vmem:[%s4877_s18 + $0x38] sm:$0xff]  ;;  %v4070_v38 = vld [vmem:[%s4877_s18 + $0x28] sm:$0xff] }
  0x2e   : > { %771 = vmatpush.bf16.xpose.msra.mxu1 %v765_v17  ;;  %v4081_v18 = vld [vmem:[%s4757_s21 + $0x40] sm:$0xff]  ;;  %923 = vmatpush.bf16.msra.mxu2 %v4072_v36 }
  0x2f   : > { %1049 = vmatpush.bf16.msra.mxu3 %v4077_v37  ;;  %v4858_v19 = vsel %vm733_vm0, %v4081_v18, 0  ;;  %v4863_v20 = vld [vmem:[%s5762_s4 + $0x1] ss:$0 sm:$0xff]  ;;  %v4071_v37 = vld [vmem:[%s4877_s18 + $0x30] sm:$0xff] }
  0x31   : > { %648 = vmatpush.bf16.msra.mxu0 %v4052_v4  ;;  %v4837_v4 = vsel %vm733_vm0, %v4085_v3, 0 }
  0x32   : > { %924 = vmatpush.bf16.msra.mxu2 %v4071_v37 }
  0x33   : > { %1050 = vmatpush.bf16.msra.mxu3 %v4076_v40 }
  0x35   : > { %649 = vmatpush.bf16.msra.mxu0 %v4051_v5 }
  0x36   : > { %772 = vmatpush.bf16.xpose.msra.mxu1 %v762_v24  ;;  %925 = vmatpush.bf16.msra.mxu2 %v4070_v38 }
  0x37   : > { %1051 = vmatpush.bf16.msra.mxu3 %v4075_v41 }
  0x39   : > { %650 = vmatpush.bf16.msra.mxu0 %v4050_v6 }
  0x3b   : > { %1052 = vmatpush.bf16.msra.mxu3 %v4074_v42 }
  0x3d   : > { %651 = vmatpush.bf16.msra.mxu0 %v4049_v7 }
  0x3e   : > { %773 = vmatpush.bf16.xpose.msra.mxu1 %v759_v26 }
  0x3f   : > { %1053 = vmatpush.bf16.msra.mxu3 %v4073_v43  ;;  %v4069_v43 = vld [vmem:[%s4877_s18 + $0x20] sm:$0xff] }
  0x40   : > { %652 = vmatmul.bf16.vlgmr.msra.gmra.mxu0 %v4744_v10  ;;  %926 = vmatpush.bf16.msra.mxu2 %v4069_v43  ;;  %v4103_v43 = vld [vmem:[%s5761_s3 + $0xb0] sm:$0xff] }
  0x41   : > { %1172 = vmatpush.bf16.xpose.msrb.mxu0 %v4820_v56 }
  0x42   : > { %1054 = vmatmul.bf16.vlgmr.msra.gmra.mxu3 %v4744_v10 }
  0x46   : > { %774 = vmatpush.bf16.xpose.msra.mxu1 %v756_v31 }
  0x49   : > { %1173 = vmatpush.bf16.xpose.msrb.mxu0 %v4825_v59 }
  0x4e   : > { %775 = vmatpush.bf16.xpose.msra.mxu1 %v753_v33 }
  0x50   : > { %657 = vmatmul.bf16.gmra.mxu0 %v4750_v13 }
  0x51   : > { %1174 = vmatpush.bf16.xpose.msrb.mxu0 %v4832_v1 }
  0x52   : > { %1059 = vmatmul.bf16.gmra.mxu3 %v4750_v13 }
  0x56   : > { %776 = vmatpush.bf16.xpose.msra.mxu1 %v750_v35 }
  0x59   : > { %1175 = vmatpush.bf16.xpose.msrb.mxu0 %v4837_v4 }
  0x5e   : > { %777 = vmatpush.bf16.xpose.msra.mxu1 %v747_v39 }
  0x60   : > { %662 = vmatmul.bf16.gmra.mxu0 %v4769_v21 }
  0x61   : > { %1176 = vmatpush.bf16.xpose.msrb.mxu0 %v4843_v11 }
  0x62   : > { %1064 = vmatmul.bf16.gmra.mxu3 %v4769_v21 }
  0x69   : > { %1177 = vmatpush.bf16.xpose.msrb.mxu0 %v4848_v14 }
  0x70   : > { %667 = vmatmul.bf16.gmra.mxu0 %v4781_v29 }
  0x71   : > { %1178 = vmatpush.bf16.xpose.msrb.mxu0 %v4853_v16 }
  0x72   : > { %1069 = vmatmul.bf16.gmra.mxu3 %v4781_v29 }
  0x79   : > { %1179 = vmatpush.bf16.xpose.msrb.mxu0 %v4858_v19 }
  0xbd   : > { %v653_v44 = vpop.f32.mrf.mxu0 }
  0xbe   : > { %v654_v47 = vadd.f32 %v4270_v45, %v653_v44  ;;  %v4068_v44 = vld [vmem:[%s4877_s18 + $0x18] sm:$0xff] }
  0xbf   : > { %927 = vmatpush.bf16.msra.mxu2 %v4068_v44  ;;  %v4093_v44 = vld [vmem:[%s4877_s18 + $0x60] sm:$0xff] }
  0xc5   : > { %v655_v46 = vpop.f32.mrf.mxu0  ;;  %v1055_v17 = vpop.f32.mrf.mxu3 }
  0xc6   : > { %v656_v48 = vadd.f32 %v4270_v45, %v655_v46  ;;  %v1056_v22 = vadd.f32 %v4863_v20, %v1055_v17  ;;  %v4066_v46 = vld [vmem:[%s4877_s18 + $0x8] sm:$0xff] }
  0xc8   : > { %v673_v49 = vpack.c.bf16 %v656_v48, %v654_v47  ;;  %v4065_v47 = vld [vmem:[%s4877_s18] sm:$0xff] }
  0xca   : > { %3398 = vmatmul.msk.bf16.vlgmr.msra.gmra.mxu1 %vm733_vm0, %v673_v49 }
  0xcd   : > { %v658_v50 = vpop.f32.mrf.mxu0  ;;  %v1057_v23 = vpop.f32.mrf.mxu3 }
  0xce   : > { %v659_v52 = vadd.f32 %v4270_v45, %v658_v50  ;;  %v1058_v24 = vadd.f32 %v4863_v20, %v1057_v23 }
  0xd0   : > { %v1075_v25 = vpack.c.bf16 %v1058_v24, %v1056_v22 }
  0xd2   : > { %3531 = vmatmul.msk.bf16.vlgmr.msrb.gmra.mxu0 %vm733_vm0, %v1075_v25 }
  0xd5   : > { %v660_v51 = vpop.f32.mrf.mxu0  ;;  %v1060_v27 = vpop.f32.mrf.mxu3 }
  0xd6   : > { %v661_v53 = vadd.f32 %v4270_v45, %v660_v51  ;;  %v1061_v30 = vadd.f32 %v4863_v20, %v1060_v27 }
  0xd8   : > { %v674_v54 = vpack.c.bf16 %v661_v53, %v659_v52 }
  0xda   : > { %3399 = vmatmul.msk.bf16.gmra.mxu1 %vm733_vm0, %v674_v54 }
  0xdd   : > { %v663_v57 = vpop.f32.mrf.mxu0  ;;  %v1062_v31 = vpop.f32.mrf.mxu3 }
  0xde   : > { %v664_v61 = vadd.f32 %v4270_v45, %v663_v57  ;;  %v1063_v32 = vadd.f32 %v4863_v20, %v1062_v31  ;;  %v4104_v31 = vld [vmem:[%s5761_s3 + $0xb8] sm:$0xff] }
  0xdf   : > { %1449 = vmatpush.bf16.msrb.mxu3 %v4104_v31  ;;  %v4111_v31 = vld [vmem:[%s4757_s21 + $0xb0] sm:$0xff] }
  0xe0   : > { %v1076_v33 = vpack.c.bf16 %v1063_v32, %v1061_v30  ;;  %v4096_v30 = vld [vmem:[%s4877_s18 + $0x78] sm:$0xff]  ;;  %v4095_v32 = vld [vmem:[%s4877_s18 + $0x70] sm:$0xff] }
  0xe2   : > { %3532 = vmatmul.msk.bf16.gmra.mxu0 %vm733_vm0, %v1076_v33 }
  0xe3   : > { %1450 = vmatpush.bf16.msrb.mxu3 %v4103_v43  ;;  %v4107_v43 = vld [vmem:[%s4757_s21 + $0x90] sm:$0xff] }
  0xe5   : > { %v665_v60 = vpop.f32.mrf.mxu0 }
  0xe6   : > { %v666_v62 = vadd.f32 %v4270_v45, %v665_v60 }
  0xe8   : > { %v675_v0 = vpack.c.bf16 %v666_v62, %v664_v61 }
  0xea   : > { %3400 = vmatmul.msk.bf16.gmra.mxu1 %vm733_vm0, %v675_v0 }
  0xed   : > { %v668_v2 = vpop.f32.mrf.mxu0 }
  0xee   : > { %v669_v6 = vadd.f32 %v4270_v45, %v668_v2 }
  0xf5   : > { %v670_v5 = vpop.f32.mrf.mxu0 }
  0xf6   : > { %v671_v7 = vadd.f32 %v4270_v45, %v670_v5  ;;  %v4067_v45 = vld [vmem:[%s4877_s18 + $0x10] sm:$0xff] }
  0xf7   : > { %928 = vmatpush.bf16.msra.mxu2 %v4067_v45  ;;  %v4102_v45 = vld [vmem:[%s5761_s3 + $0xa8] sm:$0xff] }
  0xf8   : > { %v676_v9 = vpack.c.bf16 %v671_v7, %v669_v6  ;;  %1451 = vmatpush.bf16.msrb.mxu3 %v4102_v45  ;;  %v4106_v45 = vld [vmem:[%s4757_s21 + $0x88] sm:$0xff] }
  0xfa   : > { %3401 = vmatmul.msk.bf16.gmra.mxu1 %vm733_vm0, %v676_v9 }
  0xfb   : > { %929 = vmatpush.bf16.msra.mxu2 %v4066_v46  ;;  %v4092_v46 = vld [vmem:[%s4877_s18 + $0x58] sm:$0xff] }
  0xff   : > { %930 = vmatpush.bf16.msra.mxu2 %v4065_v47 }
 0x103   : > { %4185 = vmatpush.bf16.xpose.msrb.mxu2 %v4820_v56 }
 0x10b   : > { %4186 = vmatpush.bf16.xpose.msrb.mxu2 %v4825_v59 }
 0x113   : > { %4187 = vmatpush.bf16.xpose.msrb.mxu2 %v4832_v1 }
 0x11b   : > { %4188 = vmatpush.bf16.xpose.msrb.mxu2 %v4837_v4 }
 0x123   : > { %4189 = vmatpush.bf16.xpose.msrb.mxu2 %v4843_v11 }
 0x12b   : > { %4190 = vmatpush.bf16.xpose.msrb.mxu2 %v4848_v14 }
 0x133   : > { %4191 = vmatpush.bf16.xpose.msrb.mxu2 %v4853_v16 }
 0x13b   : > { %4192 = vmatpush.bf16.xpose.msrb.mxu2 %v4858_v19  ;;  %v1065_v19 = vpop.f32.mrf.mxu3 }
 0x143   : > { %v1067_v33 = vpop.f32.mrf.mxu3 }
 0x147   : > { %v779_v26 = vpop.f32.mrf.mxu1 }
 0x148   : > { %799 = vmax.xlane.f32.xlu0 %v779_v26 }
 0x14b   : > { %v1070_v36 = vpop.f32.mrf.mxu3 }
 0x14f   : > { %v781_v28 = vpop.f32.mrf.mxu1  ;;  %v4896_v50 = vpop.f32.mrf.mxu0 }
 0x150   : > { %801 = vmax.xlane.f32.xlu0 %v781_v28 }
 0x153   : > { %v1072_v38 = vpop.f32.mrf.mxu3 }
 0x157   : > { %v784_v34 = vpop.f32.mrf.mxu1  ;;  %v4900_v55 = vpop.f32.mrf.mxu0 }
 0x158   : > { %803 = vmax.xlane.f32.xlu1 %v784_v34 }
 0x15f   : > { %v786_v35 = vpop.f32.mrf.mxu1  ;;  %v4910_v61 = vpop.f32.mrf.mxu0 }
 0x160   : > { %805 = vmax.xlane.f32.xlu1 %v786_v35 }
 0x167   : > { %v789_v39 = vpop.f32.mrf.mxu1  ;;  %v4914_v2 = vpop.f32.mrf.mxu0 }
 0x168   : > { %807 = vmax.xlane.f32.xlu2 %v789_v39 }
 0x16f   : > { %v791_v40 = vpop.f32.mrf.mxu1 }
 0x170   : > { %809 = vmax.xlane.f32.xlu2 %v791_v40 }
 0x177   : > { %v4882_v41 = vpop.f32.mrf.mxu1 }
 0x178   : > { %811 = vmax.xlane.f32.xlu0 %v4882_v41  ;;  %1201 = vmax.xlane.f32.xlu2 %v4896_v50 }
 0x17f   : > { %v4885_v42 = vpop.f32.mrf.mxu1 }
 0x180   : > { %813 = vmax.xlane.f32.xlu1 %v4885_v42  ;;  %1203 = vmax.xlane.f32.xlu0 %v4900_v55 }
 0x181   : > { %1207 = vmax.xlane.f32.xlu2 %v4914_v2 }
 0x188   : > { %1205 = vmax.xlane.f32.xlu1 %v4910_v61 }
 0x1bb   : > { %v800_v48 = vpop.xlane.xlu0 %799 }
 0x1bc   : > { %v815_v49 = vsub.f32 %v779_v26, %v800_v48 }
 0x1be   : > { %v823_v51 = vmul.f32 1.442695, %v815_v49  ;;  %v4091_v49 = vld [vmem:[%s4877_s18 + $0x50] sm:$0xff] }
 0x1c0   : > { %4280 = vpow2.f32 %v823_v51 }
 0x1c3   : > { %v802_v52 = vpop.xlane.xlu0 %801 }
 0x1c4   : > { %v816_v53 = vsub.f32 %v781_v28, %v802_v52  ;;  %v4100_v52 = vld [vmem:[%s5761_s3 + $0x98] sm:$0xff] }
 0x1c6   : > { %v825_v54 = vmul.f32 1.442695, %v816_v53  ;;  %v4903_v57 = vpop.eup %4280 }
 0x1c8   : > { %4282 = vpow2.f32 %v825_v54 }
 0x1cb   : > { %v804_v56 = vpop.xlane.xlu1 %803 }
 0x1cc   : > { %v817_v59 = vsub.f32 %v784_v34, %v804_v56  ;;  %v1066_v34 = vadd.f32 %v4863_v20, %v1065_v19 }
 0x1ce   : > { %v4905_v58 = vpop.eup %4282  ;;  %v827_v62 = vmul.f32 1.442695, %v817_v59  ;;  %v4090_v59 = vld [vmem:[%s4877_s18 + $0x48] sm:$0xff] }
 0x1cf   : > { %v855_v60 = vpack.c.bf16 %v4905_v58, %v4903_v57 }
 0x1d0   : > { %4284 = vpow2.f32 %v827_v62  ;;  %v4098_v62 = vld [vmem:[%s5761_s3 + $0x88] sm:$0xff] }
 0x1d1   : > { %931 = vmatmul.bf16.vlgmr.msra.gmra.mxu2 %v855_v60  ;;  %v4089_v60 = vld [vmem:[%s4877_s18 + $0x40] sm:$0xff] }
 0x1d2   : > { %1326 = vmatpush.bf16.msra.mxu2 %v4096_v30 }
 0x1d3   : > { %v806_v63 = vpop.xlane.xlu1 %805 }
 0x1d4   : > { %v818_v0 = vsub.f32 %v786_v35, %v806_v63  ;;  %v1068_v35 = vadd.f32 %v4863_v20, %v1067_v33  ;;  %v1570_v33 = vsel %vm733_vm0, %v4111_v31, 0 }
 0x1d6   : > { %v829_v1 = vmul.f32 1.442695, %v818_v0  ;;  %v4917_v4 = vpop.eup %4284  ;;  %1327 = vmatpush.bf16.msra.mxu2 %v4095_v32  ;;  %v1077_v37 = vpack.c.bf16 %v1068_v35, %v1066_v34  ;;  %v4110_v34 = vld [vmem:[%s4757_s21 + $0xa8] sm:$0xff] }
 0x1d8   : > { %4286 = vpow2.f32 %v829_v1  ;;  %v4097_v1 = vld [vmem:[%s5761_s3 + $0x80] sm:$0xff] }
 0x1db   : > { %v808_v3 = vpop.xlane.xlu2 %807 }
 0x1dc   : > { %v819_v6 = vsub.f32 %v789_v39, %v808_v3  ;;  %v1071_v39 = vadd.f32 %v4863_v20, %v1070_v36  ;;  %v1567_v36 = vsel %vm733_vm0, %v4110_v34, 0 }
 0x1de   : > { %v4919_v5 = vpop.eup %4286  ;;  %v831_v8 = vmul.f32 1.442695, %v819_v6 }
 0x1df   : > { %v856_v7 = vpack.c.bf16 %v4919_v5, %v4917_v4 }
 0x1e0   : > { %4288 = vpow2.f32 %v831_v8 }
 0x1e1   : > { %936 = vmatmul.bf16.gmra.mxu2 %v856_v7 }
 0x1e3   : > { %v810_v9 = vpop.xlane.xlu2 %809 }
 0x1e4   : > { %v820_v11 = vsub.f32 %v791_v40, %v810_v9  ;;  %v1073_v40 = vadd.f32 %v4863_v20, %v1072_v38  ;;  %v4101_v20 = vld [vmem:[%s5761_s3 + $0xa0] sm:$0xff] }
 0x1e5   : > { %1452 = vmatpush.bf16.msrb.mxu3 %v4101_v20  ;;  %v4128_v20 = vld [vmem:[%s5761_s3 + $0xf8] sm:$0xff] }
 0x1e6   : > { %v833_v12 = vmul.f32 1.442695, %v820_v11  ;;  %v4925_v15 = vpop.eup %4288 }
 0x1e8   : > { %4290 = vpow2.f32 %v833_v12 }
 0x1e9   : > { %1453 = vmatpush.bf16.msrb.mxu3 %v4100_v52  ;;  %v5038_v52 = vld [vmem:[%s5762_s4 + $0x2] ss:$0 sm:$0xff] }
 0x1eb   : > { %v812_v14 = vpop.xlane.xlu0 %811  ;;  %v1202_v47 = vpop.xlane.xlu2 %1201 }
 0x1ec   : > { %v821_v18 = vsub.f32 %v4882_v41, %v812_v14  ;;  %v1078_v41 = vpack.c.bf16 %v1073_v40, %v1071_v39  ;;  %v1217_v48 = vsub.f32 %v4896_v50, %v1202_v47  ;;  %v4099_v50 = vld [vmem:[%s5761_s3 + $0x90] sm:$0xff]  ;;  %v4108_v40 = vld [vmem:[%s4757_s21 + $0x98] sm:$0xff]  ;;  %v4105_v47 = vld [vmem:[%s4757_s21 + $0x80] sm:$0xff] }
 0x1ed   : > { %1454 = vmatpush.bf16.msrb.mxu3 %v4099_v50  ;;  %v4126_v50 = vld [vmem:[%s5761_s3 + $0xe8] sm:$0xff] }
 0x1ee   : > { %v4927_v17 = vpop.eup %4290  ;;  %v835_v22 = vmul.f32 1.442695, %v821_v18  ;;  %v1225_v53 = vmul.f32 1.442695, %v1217_v48  ;;  %v4127_v48 = vld [vmem:[%s5761_s3 + $0xf0] sm:$0xff] }
 0x1ef   : > { %v857_v16 = vpack.c.bf16 %v4927_v17, %v4925_v15 }
 0x1f0   : > { %4292 = vpow2.f32 %v835_v22 }
 0x1f1   : > { %941 = vmatmul.bf16.gmra.mxu2 %v857_v16  ;;  %1455 = vmatpush.bf16.msrb.mxu3 %v4098_v62  ;;  %v4124_v62 = vld [vmem:[%s5761_s3 + $0xd8] sm:$0xff] }
 0x1f3   : > { %v814_v23 = vpop.xlane.xlu1 %813  ;;  %v1204_v51 = vpop.xlane.xlu0 %1203 }
 0x1f4   : > { %v822_v24 = vsub.f32 %v4885_v42, %v814_v23  ;;  %v4094_v42 = vld [vmem:[%s4877_s18 + $0x68] sm:$0xff]  ;;  %v1218_v54 = vsub.f32 %v4900_v55, %v1204_v51  ;;  %v1208_v7 = vpop.xlane.xlu2 %1207 }
 0x1f5   : > { %1328 = vmatpush.bf16.msra.mxu2 %v4094_v42  ;;  %1456 = vmatpush.bf16.msrb.mxu3 %v4097_v1  ;;  %v1220_v8 = vsub.f32 %v4914_v2, %v1208_v7  ;;  %v1561_v42 = vsel %vm733_vm0, %v4108_v40, 0 }
 0x1f6   : > { %v837_v25 = vmul.f32 1.442695, %v822_v24  ;;  %v4933_v26 = vpop.eup %4292  ;;  %v1227_v56 = vmul.f32 1.442695, %v1218_v54 }
 0x1f7   : > { %v1231_v11 = vmul.f32 1.442695, %v1220_v8 }
 0x1f8   : > { %4294 = vpow2.f32 %v837_v25  ;;  %1457 = vmatmul.bf16.vlgmr.msrb.gmra.mxu3 %v4744_v10 }
 0x1f9   : > { %1329 = vmatpush.bf16.msra.mxu2 %v4093_v44  ;;  %4296 = vpow2.f32 %v1225_v53  ;;  %v1558_v44 = vsel %vm733_vm0, %v4107_v43, 0 }
 0x1fa   : > { %4298 = vpow2.f32 %v1227_v56 }
 0x1fb   : > { %v1206_v3 = vpop.xlane.xlu1 %1205 }
 0x1fc   : > { %v1219_v6 = vsub.f32 %v4910_v61, %v1206_v3 }
 0x1fd   : > { %1330 = vmatpush.bf16.msra.mxu2 %v4092_v46  ;;  %v1555_v46 = vsel %vm733_vm0, %v4106_v45, 0 }
 0x1fe   : > { %v4935_v27 = vpop.eup %4294  ;;  %v1229_v9 = vmul.f32 1.442695, %v1219_v6  ;;  %v4122_v6 = vld [vmem:[%s5761_s3 + $0xc8] sm:$0xff] }
 0x1ff   : > { %v858_v28 = vpack.c.bf16 %v4935_v27, %v4933_v26  ;;  %v4976_v63 = vpop.eup %4296 }
 0x200   : > { %v4978_v55 = vpop.eup %4298  ;;  %4300 = vpow2.f32 %v1229_v9  ;;  %v4121_v9 = vld [vmem:[%s5761_s3 + $0xc0] sm:$0xff] }
 0x201   : > { %946 = vmatmul.bf16.gmra.mxu2 %v858_v28  ;;  %v1257_v0 = vpack.c.bf16 %v4978_v55, %v4976_v63  ;;  %4302 = vpow2.f32 %v1231_v11  ;;  %v4112_v28 = vld [vmem:[%s4757_s21 + $0xb8] sm:$0xff] }
 0x202   : > { %1331 = vmatpush.bf16.msra.mxu2 %v4091_v49  ;;  %v1573_v30 = vsel %vm733_vm0, %v4112_v28, 0  ;;  %v1552_v49 = vsel %vm733_vm0, %v4105_v47, 0  ;;  %v4135_v47 = vld [vmem:[%s4757_s21 + $0xf0] sm:$0xff] }
 0x203   : > { %1575 = vmatpush.bf16.xpose.msrb.mxu1 %v1573_v30 }
 0x206   : > { %1332 = vmatpush.bf16.msra.mxu2 %v4090_v59  ;;  %v4990_v14 = vpop.eup %4300 }
 0x207   : > { %v4992_v18 = vpop.eup %4302 }
 0x208   : > { %v1258_v61 = vpack.c.bf16 %v4992_v18, %v4990_v14  ;;  %1462 = vmatmul.bf16.gmra.mxu3 %v4750_v13 }
 0x20a   : > { %1333 = vmatpush.bf16.msra.mxu2 %v4089_v60  ;;  %v4125_v60 = vld [vmem:[%s5761_s3 + $0xe0] sm:$0xff] }
 0x20b   : > { %1576 = vmatpush.bf16.xpose.msrb.mxu1 %v1570_v33 }
 0x211   : > { %3533 = vmatmul.msk.bf16.vlgmr.msrb.gmra.mxu2 %vm733_vm0, %v1077_v37  ;;  %v4109_v37 = vld [vmem:[%s4757_s21 + $0xa0] sm:$0xff] }
 0x212   : > { %v1564_v39 = vsel %vm733_vm0, %v4109_v37, 0  ;;  %1852 = vmatpush.bf16.msrb.mxu2 %v4128_v20 }
 0x213   : > { %1577 = vmatpush.bf16.xpose.msrb.mxu1 %v1567_v36 }
 0x216   : > { %1853 = vmatpush.bf16.msrb.mxu2 %v4127_v48  ;;  %v1973_v48 = vsel %vm733_vm0, %v4135_v47, 0 }
 0x218   : > { %1467 = vmatmul.bf16.gmra.mxu3 %v4769_v21 }
 0x21a   : > { %1854 = vmatpush.bf16.msrb.mxu2 %v4126_v50 }
 0x21b   : > { %1578 = vmatpush.bf16.xpose.msrb.mxu1 %v1564_v39 }
 0x21e   : > { %1855 = vmatpush.bf16.msrb.mxu2 %v4125_v60 }
 0x221   : > { %3534 = vmatmul.msk.bf16.gmra.mxu2 %vm733_vm0, %v1078_v41 }
 0x222   : > { %1856 = vmatpush.bf16.msrb.mxu2 %v4124_v62  ;;  %v4131_v62 = vld [vmem:[%s4757_s21 + $0xd0] sm:$0xff] }
 0x223   : > { %1579 = vmatpush.bf16.xpose.msrb.mxu1 %v1561_v42 }
 0x228   : > { %1472 = vmatmul.bf16.gmra.mxu3 %v4781_v29 }
 0x22b   : > { %1580 = vmatpush.bf16.xpose.msrb.mxu1 %v1558_v44 }
 0x231   : > { %1334 = vmatmul.bf16.vlgmr.msra.gmra.mxu2 %v1257_v0  ;;  %v4123_v0 = vld [vmem:[%s5761_s3 + $0xd0] sm:$0xff] }
 0x232   : > { %1857 = vmatpush.bf16.msrb.mxu2 %v4123_v0  ;;  %v1961_v0 = vsel %vm733_vm0, %v4131_v62, 0 }
 0x233   : > { %1581 = vmatpush.bf16.xpose.msrb.mxu1 %v1555_v46  ;;  %v4136_v46 = vld [vmem:[%s4757_s21 + $0xf8] sm:$0xff] }
 0x234   : > { %v1976_v20 = vsel %vm733_vm0, %v4136_v46, 0  ;;  %v4273_v46 = vld [vmem:[%s5762_s4 + $0x3] ss:$0 sm:$0xff] }
 0x235   : > { %1978 = vmatpush.bf16.xpose.msra.mxu3 %v1976_v20 }
 0x236   : > { %1858 = vmatpush.bf16.msrb.mxu2 %v4122_v6 }
 0x23a   : > { %1859 = vmatpush.bf16.msrb.mxu2 %v4121_v9 }
 0x23b   : > { %1582 = vmatpush.bf16.xpose.msrb.mxu1 %v1552_v49  ;;  %v4134_v49 = vld [vmem:[%s4757_s21 + $0xe8] sm:$0xff] }
 0x23d   : > { %1979 = vmatpush.bf16.xpose.msra.mxu3 %v1973_v48 }
 0x241   : > { %1339 = vmatmul.bf16.gmra.mxu2 %v1258_v61 }
 0x254   : > { %v4988_v12 = vpop.f32.mrf.mxu2 }
 0x25c   : > { %v4996_v16 = vpop.f32.mrf.mxu2 }
 0x264   : > { %v4999_v2 = vpop.f32.mrf.mxu2 }
 0x26c   : > { %v5001_v22 = vpop.f32.mrf.mxu2 }
 0x274   : > { %v5004_v23 = vpop.f32.mrf.mxu2 }
 0x27b   : > { %v1458_v51 = vpop.f32.mrf.mxu3 }
 0x27c   : > { %v5006_v24 = vpop.f32.mrf.mxu2  ;;  %v1459_v53 = vadd.f32 %v5038_v52, %v1458_v51 }
 0x283   : > { %v1460_v54 = vpop.f32.mrf.mxu3 }
 0x284   : > { %v5009_v25 = vpop.f32.mrf.mxu2  ;;  %v1461_v56 = vadd.f32 %v5038_v52, %v1460_v54  ;;  %v4133_v54 = vld [vmem:[%s4757_s21 + $0xe0] sm:$0xff] }
 0x286   : > { %v1478_v59 = vpack.c.bf16 %v1461_v56, %v1459_v53 }
 0x288   : > { %3680 = vmatmul.msk.bf16.vlgmr.msrb.gmra.mxu1 %vm733_vm0, %v1478_v59  ;;  %v4132_v59 = vld [vmem:[%s4757_s21 + $0xd8] sm:$0xff] }
 0x289   : > { %v1964_v50 = vsel %vm733_vm0, %v4132_v59, 0  ;;  %v4116_v59 = vld [vmem:[%s4877_s18 + $0x98] sm:$0xff] }
 0x28c   : > { %v5011_v19 = vpop.f32.mrf.mxu2 }
 0x294   : > { %v1191_v32 = vpop.f32.mrf.mxu2 }
 0x295   : > { %1209 = vmax.xlane.f32.xlu0 %v1191_v32 }
 0x29c   : > { %v1193_v35 = vpop.f32.mrf.mxu2 }
 0x29d   : > { %1211 = vmax.xlane.f32.xlu1 %v1193_v35 }
 0x2a4   : > { %v1196_v38 = vpop.f32.mrf.mxu2 }
 0x2a5   : > { %1213 = vmax.xlane.f32.xlu2 %v1196_v38 }
 0x2ac   : > { %v1198_v41 = vpop.f32.mrf.mxu2 }
 0x2ad   : > { %1215 = vmax.xlane.f32.xlu0 %v1198_v41 }
 0x2b4   : > { %v5092_v53 = vpop.f32.mrf.mxu2 }
 0x2bc   : > { %v5096_v56 = vpop.f32.mrf.mxu2 }
 0x2c4   : > { %v5100_v60 = vpop.f32.mrf.mxu2 }
 0x305   : > { %v5084_v51 = vpop.f32.mrf.mxu1 }
 0x306   : > { %1604 = vmax.xlane.f32.xlu1 %v5084_v51 }
 0x308   : > { %v1210_v1 = vpop.xlane.xlu0 %1209 }
 0x309   : > { %v1221_v3 = vsub.f32 %v1191_v32, %v1210_v1  ;;  %v4130_v1 = vld [vmem:[%s4757_s21 + $0xc8] sm:$0xff] }
 0x30b   : > { %v1233_v7 = vmul.f32 1.442695, %v1221_v3  ;;  %v1958_v3 = vsel %vm733_vm0, %v4130_v1, 0 }
 0x30d   : > { %4304 = vpow2.f32 %v1233_v7  ;;  %v4129_v7 = vld [vmem:[%s4757_s21 + $0xc0] sm:$0xff] }
 0x310   : > { %v1212_v8 = vpop.xlane.xlu1 %1211 }
 0x311   : > { %v1222_v11 = vsub.f32 %v1193_v35, %v1212_v8  ;;  %v1463_v35 = vpop.f32.mrf.mxu3  ;;  %v1955_v8 = vsel %vm733_vm0, %v4129_v7, 0 }
 0x312   : > { %v1464_v43 = vadd.f32 %v5038_v52, %v1463_v35 }
 0x313   : > { %v1235_v61 = vmul.f32 1.442695, %v1222_v11  ;;  %v5061_v30 = vpop.eup %4304 }
 0x315   : > { %4306 = vpow2.f32 %v1235_v61 }
 0x318   : > { %v1214_v28 = vpop.xlane.xlu2 %1213 }
 0x319   : > { %v1223_v32 = vsub.f32 %v1196_v38, %v1214_v28  ;;  %v1465_v44 = vpop.f32.mrf.mxu3 }
 0x31b   : > { %v5063_v31 = vpop.eup %4306  ;;  %v1237_v34 = vmul.f32 1.442695, %v1223_v32 }
 0x31c   : > { %v1259_v33 = vpack.c.bf16 %v5063_v31, %v5061_v30 }
 0x31d   : > { %4308 = vpow2.f32 %v1237_v34 }
 0x31e   : > { %1344 = vmatmul.bf16.gmra.mxu2 %v1259_v33 }
 0x320   : > { %v1216_v36 = vpop.xlane.xlu0 %1215 }
 0x321   : > { %v1224_v37 = vsub.f32 %v1198_v41, %v1216_v36  ;;  %v1466_v41 = vadd.f32 %v5038_v52, %v1465_v44  ;;  %v1468_v9 = vpop.f32.mrf.mxu3 }
 0x322   : > { %v1469_v61 = vadd.f32 %v5038_v52, %v1468_v9  ;;  %v4115_v9 = vld [vmem:[%s4877_s18 + $0x90] sm:$0xff] }
 0x323   : > { %v1239_v39 = vmul.f32 1.442695, %v1224_v37  ;;  %v5067_v40 = vpop.eup %4308  ;;  %v1479_v45 = vpack.c.bf16 %v1466_v41, %v1464_v43 }
 0x325   : > { %4310 = vpow2.f32 %v1239_v39  ;;  %3681 = vmatmul.msk.bf16.gmra.mxu1 %vm733_vm0, %v1479_v45  ;;  %v4120_v45 = vld [vmem:[%s4877_s18 + $0xb8] sm:$0xff] }
 0x326   : > { %1729 = vmatpush.bf16.msra.mxu0 %v4120_v45 }
 0x329   : > { %v1470_v28 = vpop.f32.mrf.mxu3 }
 0x32a   : > { %v1471_v32 = vadd.f32 %v5038_v52, %v1470_v28 }
 0x32b   : > { %v5069_v42 = vpop.eup %4310 }
 0x32c   : > { %v1260_v38 = vpack.c.bf16 %v5069_v42, %v5067_v40  ;;  %v1480_v34 = vpack.c.bf16 %v1471_v32, %v1469_v61 }
 0x32e   : > { %1349 = vmatmul.bf16.gmra.mxu2 %v1260_v38 }
 0x331   : > { %v1473_v37 = vpop.f32.mrf.mxu3 }
 0x332   : > { %v1474_v35 = vadd.f32 %v5038_v52, %v1473_v37 }
 0x335   : > { %3682 = vmatmul.msk.bf16.gmra.mxu1 %vm733_vm0, %v1480_v34  ;;  %v4114_v34 = vld [vmem:[%s4877_s18 + $0x88] sm:$0xff] }
 0x339   : > { %v1475_v38 = vpop.f32.mrf.mxu3 }
 0x33a   : > { %v1476_v43 = vadd.f32 %v5038_v52, %v1475_v38  ;;  %v4118_v52 = vld [vmem:[%s4877_s18 + $0xa8] sm:$0xff] }
 0x33c   : > { %v1481_v41 = vpack.c.bf16 %v1476_v43, %v1474_v35  ;;  %v4113_v35 = vld [vmem:[%s4877_s18 + $0x80] sm:$0xff] }
 0x33e   : > { %1860 = vmatmul.bf16.vlgmr.msrb.gmra.mxu2 %v4744_v10  ;;  %v1970_v10 = vsel %vm733_vm0, %v4134_v49, 0  ;;  %v4119_v49 = vld [vmem:[%s4877_s18 + $0xb0] sm:$0xff] }
 0x33f   : > { %1980 = vmatpush.bf16.xpose.msra.mxu3 %v1970_v10  ;;  %1730 = vmatpush.bf16.msra.mxu0 %v4119_v49 }
 0x343   : > { %1731 = vmatpush.bf16.msra.mxu0 %v4118_v52 }
 0x345   : > { %3683 = vmatmul.msk.bf16.gmra.mxu1 %vm733_vm0, %v1481_v41 }
 0x34e   : > { %1865 = vmatmul.bf16.gmra.mxu2 %v4750_v13  ;;  %v5088_v13 = vpop.f32.mrf.mxu1 }
 0x34f   : > { %1606 = vmax.xlane.f32.xlu2 %v5088_v13 }
 0x35e   : > { %1870 = vmatmul.bf16.gmra.mxu2 %v4769_v21  ;;  %v1967_v21 = vsel %vm733_vm0, %v4133_v54, 0 }
 0x35f   : > { %1981 = vmatpush.bf16.xpose.msra.mxu3 %v1967_v21  ;;  %v4117_v21 = vld [vmem:[%s4877_s18 + $0xa0] sm:$0xff] }
 0x360   : > { %1732 = vmatpush.bf16.msra.mxu0 %v4117_v21 }
 0x364   : > { %1733 = vmatpush.bf16.msra.mxu0 %v4116_v59 }
 0x367   : > { %1982 = vmatpush.bf16.xpose.msra.mxu3 %v1964_v50 }
 0x368   : > { %1734 = vmatpush.bf16.msra.mxu0 %v4115_v9 }
 0x36c   : > { %1735 = vmatpush.bf16.msra.mxu0 %v4114_v34  ;;  %v4143_v34 = vld [vmem:[%s4877_s18 + $0xf0] sm:$0xff] }
 0x36e   : > { %1875 = vmatmul.bf16.gmra.mxu2 %v4781_v29  ;;  %v5104_v29 = vpop.f32.mrf.mxu2 }
 0x36f   : > { %1983 = vmatpush.bf16.xpose.msra.mxu3 %v1961_v0 }
 0x370   : > { %1736 = vmatpush.bf16.msra.mxu0 %v4113_v35  ;;  %v4140_v35 = vld [vmem:[%s4877_s18 + $0xd8] sm:$0xff] }
 0x377   : > { %1984 = vmatpush.bf16.xpose.msra.mxu3 %v1958_v3 }
 0x379   : > { %v1605_v1 = vpop.xlane.xlu1 %1604 }
 0x37a   : > { %v1620_v7 = vsub.f32 %v5084_v51, %v1605_v1 }
 0x37c   : > { %v1628_v28 = vmul.f32 1.442695, %v1620_v7 }
 0x37e   : > { %4312 = vpow2.f32 %v1628_v28 }
 0x37f   : > { %1985 = vmatpush.bf16.xpose.msra.mxu3 %v1955_v8 }
 0x384   : > { %v4313_v38 = vpop.eup %4312 }
 0x3a1   : > { %v5108_v6 = vpop.f32.mrf.mxu2 }
 0x3a2   : > { %v5118_v36 = vpop.f32.mrf.mxu1 }
 0x3a3   : > { %1608 = vmax.xlane.f32.xlu2 %v5118_v36 }
 0x3a9   : > { %v5112_v11 = vpop.f32.mrf.mxu2 }
 0x3b1   : > { %v5116_v33 = vpop.f32.mrf.mxu2 }
 0x3b9   : > { %v5122_v39 = vpop.f32.mrf.mxu2 }
 0x3c1   : > { %v1861_v44 = vpop.f32.mrf.mxu2 }
 0x3c2   : > { %v1862_v47 = vadd.f32 %v4273_v46, %v1861_v44  ;;  %v1607_v3 = vpop.xlane.xlu2 %1606 }
 0x3c3   : > { %v1621_v8 = vsub.f32 %v5088_v13, %v1607_v3 }
 0x3c5   : > { %v1630_v32 = vmul.f32 1.442695, %v1621_v8 }
 0x3c7   : > { %4314 = vpow2.f32 %v1630_v32 }
 0x3c9   : > { %v1863_v20 = vpop.f32.mrf.mxu2 }
 0x3ca   : > { %v1864_v48 = vadd.f32 %v4273_v46, %v1863_v20 }
 0x3cc   : > { %v1881_v10 = vpack.c.bf16 %v1864_v48, %v1862_v47 }
 0x3cd   : > { %v4315_v43 = vpop.eup %4314 }
 0x3ce   : > { %3829 = vmatmul.msk.bf16.vlgmr.msra.gmra.mxu3 %vm733_vm0, %v1881_v10  ;;  %v1660_v44 = vpack.c.bf16 %v4315_v43, %v4313_v38 }
 0x3d0   : > { %1737 = vmatmul.bf16.vlgmr.msra.gmra.mxu0 %v1660_v44  ;;  %v4138_v44 = vld [vmem:[%s4877_s18 + $0xc8] sm:$0xff] }
 0x3d1   : > { %v1866_v54 = vpop.f32.mrf.mxu2 }
 0x3d2   : > { %v1867_v62 = vadd.f32 %v4273_v46, %v1866_v54  ;;  %v1591_v54 = vpop.f32.mrf.mxu1 }
 0x3d9   : > { %v1868_v50 = vpop.f32.mrf.mxu2 }
 0x3da   : > { %v1869_v0 = vadd.f32 %v4273_v46, %v1868_v50  ;;  %v5144_v59 = vpop.f32.mrf.mxu1 }
 0x3dc   : > { %v1882_v61 = vpack.c.bf16 %v1869_v0, %v1867_v62 }
 0x3de   : > { %3830 = vmatmul.msk.bf16.gmra.mxu3 %vm733_vm0, %v1882_v61 }
 0x3e1   : > { %v1871_v37 = vpop.f32.mrf.mxu2 }
 0x3e2   : > { %v1872_v13 = vadd.f32 %v4273_v46, %v1871_v37  ;;  %v5150_v62 = vpop.f32.mrf.mxu1  ;;  %v4142_v37 = vld [vmem:[%s4877_s18 + $0xe8] sm:$0xff] }
 0x3e9   : > { %v1873_v51 = vpop.f32.mrf.mxu2 }
 0x3ea   : > { %v1874_v41 = vadd.f32 %v4273_v46, %v1873_v51  ;;  %v5156_v1 = vpop.f32.mrf.mxu1  ;;  %v4137_v51 = vld [vmem:[%s4877_s18 + $0xc0] sm:$0xff] }
 0x3ec   : > { %v1883_v45 = vpack.c.bf16 %v1874_v41, %v1872_v13 }
 0x3ee   : > { %3831 = vmatmul.msk.bf16.gmra.mxu3 %vm733_vm0, %v1883_v45 }
 0x3f1   : > { %v1876_v20 = vpop.f32.mrf.mxu2 }
 0x3f2   : > { %v1877_v47 = vadd.f32 %v4273_v46, %v1876_v20  ;;  %v5165_v61 = vpop.f32.mrf.mxu1 }
 0x3f9   : > { %v1878_v48 = vpop.f32.mrf.mxu2 }
 0x3fa   : > { %v1879_v49 = vadd.f32 %v4273_v46, %v1878_v48 }
 0x3fc   : > { %v1884_v10 = vpack.c.bf16 %v1879_v49, %v1877_v47 }
 0x3fe   : > { %3832 = vmatmul.msk.bf16.gmra.mxu3 %vm733_vm0, %v1884_v10 }
 0x416   : > { %v1609_v0 = vpop.xlane.xlu2 %1608 }
 0x417   : > { %v1622_v7 = vsub.f32 %v5118_v36, %v1609_v0  ;;  %v4144_v36 = vld [vmem:[%s4877_s18 + $0xf8] sm:$0xff] }
 0x418   : > { %2132 = vmatpush.bf16.msra.mxu1 %v4144_v36 }
 0x419   : > { %v1632_v8 = vmul.f32 1.442695, %v1622_v7 }
 0x41b   : > { %4316 = vpow2.f32 %v1632_v8 }
 0x41c   : > { %2133 = vmatpush.bf16.msra.mxu1 %v4143_v34 }
 0x420   : > { %2134 = vmatpush.bf16.msra.mxu1 %v4142_v37 }
 0x421   : > { %v4317_v28 = vpop.eup %4316 }
 0x451   : > { %v1987_v52 = vpop.f32.mrf.mxu3 }
 0x452   : > { %2007 = vmax.xlane.f32.xlu0 %v1987_v52 }
 0x459   : > { %v1989_v21 = vpop.f32.mrf.mxu3 }
 0x45a   : > { %2009 = vmax.xlane.f32.xlu1 %v1989_v21  ;;  %1610 = vmax.xlane.f32.xlu0 %v1591_v54 }
 0x461   : > { %v5146_v50 = vpop.f32.mrf.mxu3 }
 0x462   : > { %2011 = vmax.xlane.f32.xlu1 %v5146_v50  ;;  %1612 = vmax.xlane.f32.xlu0 %v5144_v59 }
 0x469   : > { %v5152_v46 = vpop.f32.mrf.mxu3 }
 0x46a   : > { %2013 = vmax.xlane.f32.xlu2 %v5152_v46  ;;  %1614 = vmax.xlane.f32.xlu1 %v5150_v62 }
 0x471   : > { %v5158_v3 = vpop.f32.mrf.mxu3 }
 0x472   : > { %2015 = vmax.xlane.f32.xlu2 %v5158_v3  ;;  %1616 = vmax.xlane.f32.xlu1 %v5156_v1 }
 0x479   : > { %v5163_v9 = vpop.f32.mrf.mxu3 }
 0x47a   : > { %2017 = vmax.xlane.f32.xlu0 %v5163_v9  ;;  %1644 = vadd.xlane.f32.xlu1 %v4313_v38  ;;  %v4139_v38 = vld [vmem:[%s4877_s18 + $0xd0] sm:$0xff] }
 0x47b   : > { %1618 = vmax.xlane.f32.xlu2 %v5165_v61 }
 0x481   : > { %v5169_v32 = vpop.f32.mrf.mxu3 }
 0x482   : > { %2019 = vmax.xlane.f32.xlu0 %v5169_v32  ;;  %1648 = vadd.xlane.f32.xlu1 %v4317_v28 }
 0x483   : > { %1241 = vadd.xlane.f32.xlu2 %v4976_v63  ;;  %v4141_v63 = vld [vmem:[%s4877_s18 + $0xe0] sm:$0xff]  ;;  %s4546_s18 = smov 32  }
 0x484   : > { %2135 = vmatpush.bf16.msra.mxu1 %v4141_v63 }
 0x488   : > { %2136 = vmatpush.bf16.msra.mxu1 %v4140_v35 }
 0x48a   : > { %1243 = vadd.xlane.f32.xlu0 %v4978_v55 }
 0x48b   : > { %1646 = vadd.xlane.f32.xlu2 %v4315_v43 }
 0x48c   : > { %2137 = vmatpush.bf16.msra.mxu1 %v4139_v38 }
 0x490   : > { %2138 = vmatpush.bf16.msra.mxu1 %v4138_v44 }
 0x492   : > { %1247 = vadd.xlane.f32.xlu0 %v4992_v18 }
 0x493   : > { %1245 = vadd.xlane.f32.xlu2 %v4990_v14 }
 0x494   : > { %2139 = vmatpush.bf16.msra.mxu1 %v4137_v51 }
 0x49a   : > { %1251 = vadd.xlane.f32.xlu0 %v5063_v31 }
 0x4a2   : > { %841 = vadd.xlane.f32.xlu0 %v4905_v58 }
 0x4c5   : > { %v2008_v55 = vpop.xlane.xlu0 %2007 }
 0x4c6   : > { %v2023_v43 = vsub.f32 %v1987_v52, %v2008_v55 }
 0x4c8   : > { %v2031_v13 = vmul.f32 1.442695, %v2023_v43 }
 0x4ca   : > { %4318 = vpow2.f32 %v2031_v13 }
 0x4cd   : > { %v2010_v18 = vpop.xlane.xlu1 %2009  ;;  %v1611_v41 = vpop.xlane.xlu0 %1610 }
 0x4ce   : > { %v2024_v14 = vsub.f32 %v1989_v21, %v2010_v18  ;;  %v1623_v45 = vsub.f32 %v1591_v54, %v1611_v41 }
 0x4d0   : > { %v2033_v31 = vmul.f32 1.442695, %v2024_v14  ;;  %v1634_v20 = vmul.f32 1.442695, %v1623_v45  ;;  %v4319_v49 = vpop.eup %4318 }
 0x4d2   : > { %4320 = vpow2.f32 %v2033_v31 }
 0x4d3   : > { %4322 = vpow2.f32 %v1634_v20 }
 0x4d5   : > { %v2012_v58 = vpop.xlane.xlu1 %2011  ;;  %v1613_v47 = vpop.xlane.xlu0 %1612 }
 0x4d6   : > { %v1624_v48 = vsub.f32 %v5144_v59, %v1613_v47  ;;  %v2025_v52 = vsub.f32 %v5146_v50, %v2012_v58 }
 0x4d8   : > { %v5187_v10 = vpop.eup %4320  ;;  %v1636_v0 = vmul.f32 1.442695, %v1624_v48  ;;  %v2035_v21 = vmul.f32 1.442695, %v2025_v52 }
 0x4d9   : > { %v4323_v7 = vpop.eup %4322  ;;  %v2063_v8 = vpack.c.bf16 %v5187_v10, %v4319_v49 }
 0x4da   : > { %1650 = vadd.xlane.f32.xlu2 %v4323_v7  ;;  %v1661_v54 = vpack.c.bf16 %v4323_v7, %v4317_v28  ;;  %4324 = vpow2.f32 %v1636_v0 }
 0x4db   : > { %2140 = vmatmul.bf16.vlgmr.msra.gmra.mxu1 %v2063_v8  ;;  %4326 = vpow2.f32 %v2035_v21 }
 0x4dc   : > { %1742 = vmatmul.bf16.gmra.mxu0 %v1661_v54 }
 0x4dd   : > { %v2014_v36 = vpop.xlane.xlu2 %2013  ;;  %v1615_v34 = vpop.xlane.xlu1 %1614 }
 0x4de   : > { %v2026_v37 = vsub.f32 %v5152_v46, %v2014_v36  ;;  %v1625_v59 = vsub.f32 %v5150_v62, %v1615_v34 }
 0x4e0   : > { %v2037_v63 = vmul.f32 1.442695, %v2026_v37  ;;  %v1638_v35 = vmul.f32 1.442695, %v1625_v59  ;;  %v4325_v38 = vpop.eup %4324  ;;  %v5217_v59 = vpop.f32.mrf.mxu3 }
 0x4e1   : > { %1652 = vadd.xlane.f32.xlu1 %v4325_v38  ;;  %v5195_v51 = vpop.eup %4326 }
 0x4e2   : > { %4328 = vpow2.f32 %v2037_v63  ;;  %1249 = vadd.xlane.f32.xlu2 %v5061_v30 }
 0x4e3   : > { %4330 = vpow2.f32 %v1638_v35 }
 0x4e5   : > { %v2016_v50 = vpop.xlane.xlu2 %2015  ;;  %v1617_v28 = vpop.xlane.xlu1 %1616 }
 0x4e6   : > { %v1626_v44 = vsub.f32 %v5156_v1, %v1617_v28  ;;  %v2027_v62 = vsub.f32 %v5158_v3, %v2016_v50 }
 0x4e8   : > { %v5197_v55 = vpop.eup %4328  ;;  %v1640_v46 = vmul.f32 1.442695, %v1626_v44  ;;  %v2039_v18 = vmul.f32 1.442695, %v2027_v62 }
 0x4e9   : > { %v4331_v43 = vpop.eup %4330  ;;  %v2064_v13 = vpack.c.bf16 %v5197_v55, %v5195_v51  ;;  %1253 = vadd.xlane.f32.xlu1 %v5067_v40 }
 0x4ea   : > { %1654 = vadd.xlane.f32.xlu2 %v4331_v43  ;;  %v1662_v30 = vpack.c.bf16 %v4331_v43, %v4325_v38  ;;  %4332 = vpow2.f32 %v1640_v46 }
 0x4eb   : > { %2145 = vmatmul.bf16.gmra.mxu1 %v2064_v13  ;;  %4334 = vpow2.f32 %v2039_v18 }
 0x4ec   : > { %1747 = vmatmul.bf16.gmra.mxu0 %v1662_v30 }
 0x4ed   : > { %v2018_v1 = vpop.xlane.xlu0 %2017  ;;  %v1645_v35 = vpop.xlane.xlu1 %1644 }
 0x4ee   : > { %v2028_v41 = vsub.f32 %v5163_v9, %v2018_v1  ;;  %v1619_v14 = vpop.xlane.xlu2 %1618 }
 0x4ef   : > { %v1627_v45 = vsub.f32 %v5165_v61, %v1619_v14 }
 0x4f0   : > { %v2041_v31 = vmul.f32 1.442695, %v2028_v41  ;;  %v4333_v20 = vpop.eup %4332 }
 0x4f1   : > { %v1642_v3 = vmul.f32 1.442695, %v1627_v45  ;;  %1656 = vadd.xlane.f32.xlu0 %v4333_v20  ;;  %v4335_v47 = vpop.eup %4334 }
 0x4f2   : > { %4336 = vpow2.f32 %v2041_v31  ;;  %839 = vadd.xlane.f32.xlu2 %v4903_v57 }
 0x4f3   : > { %4338 = vpow2.f32 %v1642_v3 }
 0x4f5   : > { %v2020_v40 = vpop.xlane.xlu0 %2019  ;;  %v1649_v14 = vpop.xlane.xlu1 %1648 }
 0x4f6   : > { %v1242_v58 = vpop.xlane.xlu2 %1241  ;;  %v2029_v7 = vsub.f32 %v5169_v32, %v2020_v40 }
 0x4f7   : > { %4340 = vrcp.f32 %v1242_v58 }
 0x4f8   : > { %v5206_v48 = vpop.eup %4336  ;;  %v2043_v8 = vmul.f32 1.442695, %v2029_v7 }
 0x4f9   : > { %v4339_v0 = vpop.eup %4338  ;;  %v2065_v9 = vpack.c.bf16 %v5206_v48, %v4335_v47  ;;  %2047 = vadd.xlane.f32.xlu0 %v4319_v49 }
 0x4fa   : > { %1255 = vadd.xlane.f32.xlu2 %v5069_v42  ;;  %v1663_v61 = vpack.c.bf16 %v4339_v0, %v4333_v20  ;;  %1658 = vadd.xlane.f32.xlu1 %v4339_v0 }
 0x4fb   : > { %2150 = vmatmul.bf16.gmra.mxu1 %v2065_v9 }
 0x4fc   : > { %1752 = vmatmul.bf16.gmra.mxu0 %v1663_v61 }
 0x4fd   : > { %v1244_v57 = vpop.xlane.xlu0 %1243  ;;  %v4341_v52 = vpop.eup %4340 }
 0x4fe   : > { %4342 = vrcp.f32 %v1244_v57  ;;  %v1363_v54 = vmul.f32 %v4341_v52, %v5092_v53  ;;  %v1647_v63 = vpop.xlane.xlu2 %1646  ;;  %v1738_v53 = vpop.f32.mrf.mxu0 }
 0x4ff   : > { %4344 = vpow2.f32 %v2043_v8 }
 0x500   : > { %v1371_v21 = vpack.c.bf16 %v1363_v54, %v1363_v54  ;;  %4346 = vrcp.f32 %v1647_v63 }
 0x501   : > { %4348 = vrcp.f32 %v1645_v35 }
 0x502   : > { %845 = vadd.xlane.f32.xlu2 %v4919_v5  ;;  %843 = vadd.xlane.f32.xlu1 %v4917_v4  ;;  %v2213_v34 = vunpack.c.l.b16 %v1371_v21 }
 0x504   : > { %v4343_v49 = vpop.eup %4342 }
 0x505   : > { %v1364_v42 = vmul.f32 %v4343_v49, %v5096_v56  ;;  %v5215_v32 = vpop.eup %4344  ;;  %v1248_v30 = vpop.xlane.xlu0 %1247 }
 0x506   : > { %v4347_v4 = vpop.eup %4346  ;;  %v1740_v38 = vpop.f32.mrf.mxu0 }
 0x507   : > { %v1372_v36 = vpack.c.bf16 %v1364_v42, %v1364_v42  ;;  %v4349_v56 = vpop.eup %4348  ;;  %v1767_v50 = vmul.f32 %v4347_v4, %v1740_v38  ;;  %v1246_v18 = vpop.xlane.xlu2 %1245 }
 0x508   : > { %v1766_v28 = vmul.f32 %v4349_v56, %v1738_v53 }
 0x509   : > { %v2214_v37 = vunpack.c.l.b16 %v1372_v36  ;;  %v1775_v44 = vpack.c.bf16 %v1767_v50, %v1767_v50 }
 0x50a   : > { %2059 = vadd.xlane.f32.xlu2 %v5215_v32  ;;  %2021 = vmax.xlane.f32.xlu1 %v5217_v59  ;;  %v1774_v46 = vpack.c.bf16 %v1766_v28, %v1766_v28 }
 0x50b   : > { %v2221_v5 = vpack.c.b16 %v2214_v37, %v2213_v34  ;;  %v2242_v43 = vunpack.c.l.b16 %v1775_v44 }
 0x50c   : > { %v2241_v62 = vunpack.c.l.b16 %v1774_v46 }
 0x50d   : > { %2225 = vrot.lane.b32.xlu0 %v2221_v5, %s4546_s18  ;;  %v1252_v41 = vpop.xlane.xlu0 %1251 }
 0x50e   : > { %v2249_v13 = vpack.c.b16 %v2242_v43, %v2241_v62  ;;  %4350 = vrcp.f32 %v1252_v41 }
 0x514   : > { %v4351_v31 = vpop.eup %4350 }
 0x515   : > { %v1368_v3 = vmul.f32 %v4351_v31, %v5112_v11  ;;  %v842_v57 = vpop.xlane.xlu0 %841 }
 0x523   : > { %2253 = vrot.lane.b32.xlu1 %v2249_v13, %s4547_s17 }
 0x537   : > { %2051 = vadd.xlane.f32.xlu0 %v5195_v51 }
 0x53f   : > { %847 = vadd.xlane.f32.xlu0 %v4925_v15 }
 0x547   : > { %2055 = vadd.xlane.f32.xlu0 %v4335_v47 }
 0x54d   : > { %v1651_v1 = vpop.xlane.xlu2 %1650  ;;  %2049 = vadd.xlane.f32.xlu1 %v5187_v10  ;;  %v1376_v10 = vpack.c.bf16 %v1368_v3, %v1368_v3 }
 0x54f   : > { %v5236_v9 = vunpack.c.l.b16 %v1376_v10 }
 0x554   : > { %v5228_v51 = vpop.xlane.xlu1 %1652 }
 0x555   : > { %v1250_v45 = vpop.xlane.xlu2 %1249  ;;  %2053 = vadd.xlane.f32.xlu1 %v5197_v55 }
 0x556   : > { %4352 = vrcp.f32 %v1250_v45 }
 0x557   : > { %4354 = vrcp.f32 %v1248_v30 }
 0x558   : > { %4356 = vrcp.f32 %v1246_v18 }
 0x559   : > { %v1743_v20 = vpop.f32.mrf.mxu0  ;;  %4358 = vrcp.f32 %v1651_v1 }
 0x55c   : > { %v4353_v15 = vpop.eup %4352  ;;  %v5240_v52 = vpop.xlane.xlu1 %1253 }
 0x55d   : > { %v5230_v40 = vpop.xlane.xlu2 %1654  ;;  %2057 = vadd.xlane.f32.xlu1 %v5206_v48  ;;  %v1367_v58 = vmul.f32 %v4353_v15, %v5108_v6  ;;  %v4355_v61 = vpop.eup %4354 }
 0x55e   : > { %v4357_v7 = vpop.eup %4356  ;;  %v1366_v54 = vmul.f32 %v4355_v61, %v5104_v29 }
 0x55f   : > { %v1375_v47 = vpack.c.bf16 %v1367_v58, %v1367_v58  ;;  %v1365_v8 = vmul.f32 %v4357_v7, %v5100_v60  ;;  %v4359_v34 = vpop.eup %4358 }
 0x560   : > { %v1374_v42 = vpack.c.bf16 %v1366_v54, %v1366_v54 }
 0x561   : > { %v1745_v0 = vpop.f32.mrf.mxu0  ;;  %v5234_v55 = vunpack.c.l.b16 %v1375_v47  ;;  %v1373_v49 = vpack.c.bf16 %v1365_v8, %v1365_v8 }
 0x562   : > { %v1769_v53 = vmul.f32 %v4359_v34, %v1745_v0  ;;  %v2216_v4 = vunpack.c.l.b16 %v1374_v42 }
 0x563   : > { %v2223_v11 = vpack.c.b16 %v5236_v9, %v5234_v55  ;;  %v2215_v35 = vunpack.c.l.b16 %v1373_v49 }
 0x564   : > { %v1657_v21 = vpop.xlane.xlu0 %1656  ;;  %v1777_v50 = vpack.c.bf16 %v1769_v53, %v1769_v53 }
 0x565   : > { %v840_v48 = vpop.xlane.xlu2 %839  ;;  %v2222_v28 = vpack.c.b16 %v2216_v4, %v2215_v35 }
 0x566   : > { %4360 = vrcp.f32 %v840_v48  ;;  %v2244_v30 = vunpack.c.l.b16 %v1777_v50 }
 0x567   : > { %4362 = vrcp.f32 %v1649_v14 }
 0x568   : > { %4364 = vrcp.f32 %v842_v57 }
 0x569   : > { %v5242_v6 = vpop.f32.mrf.mxu0  ;;  %4366 = vrcp.f32 %v1657_v21 }
 0x56c   : > { %v4361_v37 = vpop.eup %4360  ;;  %v2048_v62 = vpop.xlane.xlu0 %2047 }
 0x56d   : > { %v1659_v36 = vpop.xlane.xlu1 %1658  ;;  %v4363_v63 = vpop.eup %4362  ;;  %v960_v60 = vmul.f32 %v4361_v37, %v4988_v12 }
 0x56e   : > { %v4365_v56 = vpop.eup %4364  ;;  %v1768_v38 = vmul.f32 %v4363_v63, %v1743_v20  ;;  %4368 = vrcp.f32 %v1659_v36  ;;  %v1256_v42 = vpop.xlane.xlu2 %1255 }
 0x56f   : > { %v961_v29 = vmul.f32 %v4365_v56, %v4996_v16  ;;  %v968_v43 = vpack.c.bf16 %v960_v60, %v960_v60  ;;  %v4367_v14 = vpop.eup %4366 }
 0x570   : > { %v1776_v46 = vpack.c.bf16 %v1768_v38, %v1768_v38 }
 0x571   : > { %v1750_v5 = vpop.f32.mrf.mxu0  ;;  %v969_v13 = vpack.c.bf16 %v961_v29, %v961_v29  ;;  %v2193_v41 = vunpack.c.l.b16 %v968_v43 }
 0x572   : > { %v2243_v1 = vunpack.c.l.b16 %v1776_v46 }
 0x573   : > { %v2194_v45 = vunpack.c.l.b16 %v969_v13 }
 0x574   : > { %v2250_v12 = vpack.c.b16 %v2244_v30, %v2243_v1  ;;  %v4369_v58 = vpop.eup %4368 }
 0x575   : > { %v5248_v44 = vpop.xlane.xlu1 %843  ;;  %v2201_v3 = vpack.c.b16 %v2194_v45, %v2193_v41  ;;  %v4152_v45 = vld [vmem:[%s5763_s5 + $0x38] sm:$0xff] }
 0x576   : > { %2227 = vrot.lane.b32.xlu1 %v2222_v28, %s4546_s18  ;;  %2391 = vmatpush.bf16.msrb.mxu0 %v4152_v45 }
 0x579   : > { %v1753_v18 = vpop.f32.mrf.mxu0 }
 0x57a   : > { %v1772_v16 = vmul.f32 %v4367_v14, %v1753_v18 }
 0x57c   : > { %v1780_v61 = vpack.c.bf16 %v1772_v16, %v1772_v16 }
 0x57d   : > { %v2022_v31 = vpop.xlane.xlu1 %2021 }
 0x57e   : > { %v2030_v20 = vsub.f32 %v5217_v59, %v2022_v31  ;;  %2255 = vrot.lane.b32.xlu1 %v2250_v12, %s4547_s17  ;;  %v5254_v48 = vunpack.c.l.b16 %v1780_v61 }
 0x57f   : > { %v2226_v15 = vpop.permute.xlu0 %2225 }
 0x580   : > { %v2045_v10 = vmul.f32 1.442695, %v2030_v20  ;;  %v2291_v47 = vsel %vm733_vm0, %v2201_v3, %v2226_v15 }
 0x581   : > { %v1755_v0 = vpop.f32.mrf.mxu0 }
 0x582   : > { %v1773_v7 = vmul.f32 %v4369_v58, %v1755_v0  ;;  %4370 = vpow2.f32 %v2045_v10  ;;  %v4151_v0 = vld [vmem:[%s5763_s5 + $0x30] sm:$0xff] }
 0x583   : > { %4372 = vrcp.f32 %v5230_v40  ;;  %2392 = vmatpush.bf16.msrb.mxu0 %v4151_v0 }
 0x584   : > { %v1781_v57 = vpack.c.bf16 %v1773_v7, %v1773_v7  ;;  %4374 = vrcp.f32 %v5228_v51 }
 0x585   : > { %4376 = vrcp.f32 %v1256_v42  ;;  %v4149_v42 = vld [vmem:[%s5763_s5 + $0x20] sm:$0xff] }
 0x586   : > { %v5256_v8 = vunpack.c.l.b16 %v1781_v57  ;;  %4378 = vrcp.f32 %v5240_v52 }
 0x587   : > { %4380 = vrcp.f32 %v2048_v62 }
 0x588   : > { %v2252_v59 = vpack.c.b16 %v5256_v8, %v5254_v48  ;;  %v4371_v54 = vpop.eup %4370 }
 0x589   : > { %2061 = vadd.xlane.f32.xlu0 %v4371_v54  ;;  %v2066_v49 = vpack.c.bf16 %v4371_v54, %v5215_v32  ;;  %v4373_v36 = vpop.eup %4372 }
 0x58a   : > { %v1771_v37 = vmul.f32 %v4373_v36, %v1750_v5  ;;  %v4375_v63 = vpop.eup %4374 }
 0x58b   : > { %2155 = vmatmul.bf16.gmra.mxu1 %v2066_v49  ;;  %v1770_v32 = vmul.f32 %v4375_v63, %v5242_v6  ;;  %v4377_v40 = vpop.eup %4376  ;;  %v2141_v6 = vpop.f32.mrf.mxu1  ;;  %v4150_v49 = vld [vmem:[%s5763_s5 + $0x28] sm:$0xff]  ;;  %v4147_v63 = vld [vmem:[%s5763_s5 + $0x10] sm:$0xff] }
 0x58c   : > { %v1779_v53 = vpack.c.bf16 %v1771_v37, %v1771_v37  ;;  %v1370_v51 = vmul.f32 %v4377_v40, %v5122_v39  ;;  %2393 = vmatpush.bf16.msrb.mxu0 %v4150_v49 }
 0x58d   : > { %v1778_v35 = vpack.c.bf16 %v1770_v32, %v1770_v32  ;;  %v4146_v32 = vld [vmem:[%s5763_s5 + $0x8] sm:$0xff] }
 0x58e   : > { %v2246_v4 = vunpack.c.l.b16 %v1779_v53  ;;  %v1378_v29 = vpack.c.bf16 %v1370_v51, %v1370_v51 }
 0x58f   : > { %v2245_v56 = vunpack.c.l.b16 %v1778_v35  ;;  %v846_v35 = vpop.xlane.xlu2 %845 }
 0x590   : > { %v2220_v50 = vunpack.c.l.b16 %v1378_v29  ;;  %2394 = vmatpush.bf16.msrb.mxu0 %v4149_v42 }
 0x591   : > { %853 = vadd.xlane.f32.xlu0 %v4935_v27  ;;  %v4379_v27 = vpop.eup %4378  ;;  %v2251_v60 = vpack.c.b16 %v2246_v4, %v2245_v56  ;;  %v4145_v4 = vld [vmem:[%s5763_s5] sm:$0xff] }
 0x592   : > { %v1369_v38 = vmul.f32 %v4379_v27, %v5116_v33  ;;  %v4381_v30 = vpop.eup %4380 }
 0x593   : > { %v2143_v46 = vpop.f32.mrf.mxu1  ;;  %v2169_v39 = vmul.f32 %v4381_v30, %v2141_v6 }
 0x594   : > { %v1377_v5 = vpack.c.bf16 %v1369_v38, %v1369_v38 }
 0x595   : > { %v2254_v21 = vpop.permute.xlu1 %2253  ;;  %v2177_v14 = vpack.c.bf16 %v2169_v39, %v2169_v39 }
 0x596   : > { %v5265_v34 = vsel %vm2301_vm1, %v2291_v47, %v2254_v21  ;;  %v2219_v28 = vunpack.c.l.b16 %v1377_v5  ;;  %v4148_v21 = vld [vmem:[%s5763_s5 + $0x18] sm:$0xff] }
 0x597   : > { %v2269_v62 = vunpack.c.l.b16 %v2177_v14  ;;  %2395 = vmatpush.bf16.msrb.mxu0 %v4148_v21 }
 0x598   : > { %v2224_v52 = vpack.c.b16 %v2220_v50, %v2219_v28 }
 0x59b   : > { %v2146_v33 = vpop.f32.mrf.mxu1  ;;  %2396 = vmatpush.bf16.msrb.mxu0 %v4147_v63 }
 0x59f   : > { %2397 = vmatpush.bf16.msrb.mxu0 %v4146_v32 }
 0x5a3   : > { %v2148_v58 = vpop.f32.mrf.mxu1  ;;  %2398 = vmatpush.bf16.msrb.mxu0 %v4145_v4 }
 0x5a5   : > { %2257 = vrot.lane.b32.xlu0 %v2251_v60, %s4547_s17  ;;  %v2060_v60 = vpop.xlane.xlu2 %2059 }
 0x5aa   : > { %v2052_v43 = vpop.xlane.xlu0 %2051 }
 0x5ab   : > { %v2151_v36 = vpop.f32.mrf.mxu1 }
 0x5ad   : > { %2231 = vrot.lane.b32.xlu0 %v2224_v52, %s4546_s18 }
 0x5b2   : > { %v5290_v37 = vpop.xlane.xlu0 %847 }
 0x5b3   : > { %v2153_v40 = vpop.f32.mrf.mxu1 }
 0x5ba   : > { %v2056_v27 = vpop.xlane.xlu0 %2055 }
 0x5c0   : > { %v2050_v13 = vpop.xlane.xlu1 %2049 }
 0x5c1   : > { %4382 = vrcp.f32 %v2050_v13 }
 0x5c2   : > { %4384 = vrcp.f32 %v2052_v43 }
 0x5c7   : > { %v4383_v18 = vpop.eup %4382 }
 0x5c8   : > { %v2054_v1 = vpop.xlane.xlu1 %2053  ;;  %v2170_v41 = vmul.f32 %v4383_v18, %v2143_v46  ;;  %v4385_v12 = vpop.eup %4384 }
 0x5c9   : > { %4386 = vrcp.f32 %v2054_v1  ;;  %v2171_v20 = vmul.f32 %v4385_v12, %v2146_v33 }
 0x5ca   : > { %v2178_v16 = vpack.c.bf16 %v2170_v41, %v2170_v41 }
 0x5cb   : > { %v2179_v47 = vpack.c.bf16 %v2171_v20, %v2171_v20 }
 0x5cc   : > { %v2270_v31 = vunpack.c.l.b16 %v2178_v16 }
 0x5cd   : > { %v2271_v7 = vunpack.c.l.b16 %v2179_v47 }
 0x5ce   : > { %v2277_v3 = vpack.c.b16 %v2270_v31, %v2269_v62 }
 0x5cf   : > { %v4387_v15 = vpop.eup %4386 }
 0x5d0   : > { %2281 = vrot.lane.b32.xlu2 %v2277_v3, %s4548_s27  ;;  %v2172_v10 = vmul.f32 %v4387_v15, %v2148_v58  ;;  %v2058_v53 = vpop.xlane.xlu1 %2057 }
 0x5d1   : > { %4388 = vrcp.f32 %v2058_v53 }
 0x5d2   : > { %v2180_v61 = vpack.c.bf16 %v2172_v10, %v2172_v10  ;;  %4390 = vrcp.f32 %v2056_v27 }
 0x5d4   : > { %v2272_v57 = vunpack.c.l.b16 %v2180_v61 }
 0x5d6   : > { %v2278_v54 = vpack.c.b16 %v2272_v57, %v2271_v7 }
 0x5d8   : > { %2283 = vrot.lane.b32.xlu1 %v2278_v54, %s4548_s27 }
 0x5e8   : > { %v2228_v45 = vpop.permute.xlu1 %2227 }
 0x5f0   : > { %v2256_v62 = vpop.permute.xlu1 %2255 }
 0x5f9   : > { %849 = vadd.xlane.f32.xlu2 %v4927_v17  ;;  %v4389_v17 = vpop.eup %4388 }
 0x5fa   : > { %v4391_v38 = vpop.eup %4390  ;;  %v2174_v29 = vmul.f32 %v4389_v17, %v2153_v40 }
 0x5fb   : > { %v2173_v5 = vmul.f32 %v4391_v38, %v2151_v36 }
 0x5fc   : > { %v2062_v56 = vpop.xlane.xlu0 %2061  ;;  %v2182_v50 = vpack.c.bf16 %v2174_v29, %v2174_v29 }
 0x5fd   : > { %4392 = vrcp.f32 %v2062_v56  ;;  %v2181_v52 = vpack.c.bf16 %v2173_v5, %v2173_v5 }
 0x5fe   : > { %4394 = vrcp.f32 %v2060_v60  ;;  %v2274_v46 = vunpack.c.l.b16 %v2182_v50 }
 0x5ff   : > { %v2273_v30 = vunpack.c.l.b16 %v2181_v52  ;;  %4396 = vrcp.f32 %v846_v35 }
 0x600   : > { %4398 = vrcp.f32 %v5248_v44 }
 0x601   : > { %v2279_v33 = vpack.c.b16 %v2274_v46, %v2273_v30  ;;  %4400 = vrcp.f32 %v5290_v37  ;;  %v4443_v30 = vld [vmem:[%s4737_s16 + $0x8] sm:$0xff] }
 0x602   : > { %851 = vadd.xlane.f32.xlu1 %v4933_v26 }
 0x603   : > { %v4393_v26 = vpop.eup %4392 }
 0x604   : > { %v4395_v43 = vpop.eup %4394  ;;  %v854_v47 = vpop.xlane.xlu0 %853 }
 0x605   : > { %v4397_v14 = vpop.eup %4396 }
 0x606   : > { %v4399_v12 = vpop.eup %4398  ;;  %v963_v48 = vmul.f32 %v4397_v14, %v5001_v22 }
 0x607   : > { %v962_v16 = vmul.f32 %v4399_v12, %v4999_v2  ;;  %v4401_v2 = vpop.eup %4400 }
 0x608   : > { %v2156_v51 = vpop.f32.mrf.mxu1  ;;  %v964_v22 = vmul.f32 %v4401_v2, %v5004_v23 }
 0x609   : > { %v2175_v13 = vmul.f32 %v4395_v43, %v2156_v51  ;;  %v970_v8 = vpack.c.bf16 %v962_v16, %v962_v16  ;;  %v4446_v16 = vld [vmem:[%s4737_s16 + $0x20] sm:$0xff] }
 0x60a   : > { %v972_v61 = vpack.c.bf16 %v964_v22, %v964_v22 }
 0x60b   : > { %v2183_v18 = vpack.c.bf16 %v2175_v13, %v2175_v13  ;;  %v2195_v31 = vunpack.c.l.b16 %v970_v8 }
 0x60c   : > { %v2197_v42 = vunpack.c.l.b16 %v972_v61 }
 0x60d   : > { %v2275_v55 = vunpack.c.l.b16 %v2183_v18 }
 0x610   : > { %v2158_v28 = vpop.f32.mrf.mxu1 }
 0x611   : > { %2229 = vrot.lane.b32.xlu2 %v2223_v11, %s4546_s18  ;;  %v2176_v6 = vmul.f32 %v4393_v26, %v2158_v28 }
 0x613   : > { %v2184_v39 = vpack.c.bf16 %v2176_v6, %v2176_v6  ;;  %v4442_v6 = vld [vmem:[%s4737_s16] sm:$0xff] }
 0x615   : > { %v2276_v1 = vunpack.c.l.b16 %v2184_v39 }
 0x617   : > { %v2280_v9 = vpack.c.b16 %v2276_v1, %v2275_v55  ;;  %v2258_v32 = vpop.permute.xlu0 %2257  ;;  %v4444_v1 = vld [vmem:[%s4737_s16 + $0x10] sm:$0xff] }
 0x619   : > { %2285 = vrot.lane.b32.xlu2 %v2279_v33, %s4548_s27 }
 0x61b   : > { %2259 = vrot.lane.b32.xlu1 %v2252_v59, %s4547_s17  ;;  %v971_v59 = vpack.c.bf16 %v963_v48, %v963_v48  ;;  %s5800_s17 = sld [smem:[#allocation16_spill]] }
 0x61d   : > { %v2196_v20 = vunpack.c.l.b16 %v971_v59 }
 0x61f   : > { %v2202_v3 = vpack.c.b16 %v2196_v20, %v2195_v31  ;;  %v2232_v60 = vpop.permute.xlu0 %2231  ;;  %v4447_v31 = vld [vmem:[%s4737_s16 + $0x28] sm:$0xff] }
 0x621   : > { %2287 = vrot.lane.b32.xlu2 %v2280_v9, %s4548_s27  ;;  %v2294_v15 = vsel %vm733_vm0, %v2202_v3, %v2228_v45  ;;  %s3211_s27 = scalar_lea.hbm %s5800_s17, %s4044_s24  ;;  %s4470_s24 = scalar_lea.hbm %s5800_s17, 256 }
 0x622   : > { %s3214_s21 = sshll.u32 %s3211_s27, 4  ;;  %s3215_s21 = int_to_ptr.hbm [resolvable:$true] %s3214_s21 }
 0x62a   : > { %v2282_v11 = vpop.permute.xlu2 %2281 }
 0x62b   : > { %v2312_v41 = vsel %vm2310_vm2, %v5265_v34, %v2282_v11  ;;  %v2305_v34 = vsel %vm2301_vm1, %v2294_v15, %v2256_v62  ;;  %v4549_v62 = vmov 128.0  }
 0x62c   : > { %2399 = vmatmul.bf16.vlgmr.msrb.gmra.mxu0 %v2312_v41  ;;  %v4445_v41 = vld [vmem:[%s4737_s16 + $0x18] sm:$0xff] }
 0x64a   : > { %v2284_v58 = vpop.permute.xlu1 %2283 }
 0x64b   : > { %v2315_v44 = vsel %vm2310_vm2, %v2305_v34, %v2284_v58 }
 0x64c   : > { %2404 = vmatmul.bf16.gmra.mxu0 %v2315_v44  ;;  %v4448_v44 = vld [vmem:[%s4737_s16 + $0x30] sm:$0xff] }
 0x66c   : > { %v850_v10 = vpop.xlane.xlu2 %849 }
 0x66d   : > { %4402 = vrcp.f32 %v850_v10 }
 0x66e   : > { %4404 = vrcp.f32 %v854_v47 }
 0x673   : > { %v4403_v0 = vpop.eup %4402 }
 0x674   : > { %v965_v7 = vmul.f32 %v4403_v0, %v5006_v24  ;;  %v2230_v57 = vpop.permute.xlu2 %2229  ;;  %v4405_v63 = vpop.eup %4404 }
 0x675   : > { %v852_v54 = vpop.xlane.xlu1 %851  ;;  %v967_v27 = vmul.f32 %v4405_v63, %v5011_v19  ;;  %v4274_v19 = vld [vmem:[%s5764_s6] ss:$0 sm:$0xff] }
 0x676   : > { %v973_v49 = vpack.c.bf16 %v965_v7, %v965_v7  ;;  %4406 = vrcp.f32 %v852_v54 }
 0x677   : > { %v975_v17 = vpack.c.bf16 %v967_v27, %v967_v27  ;;  %4408 = vrcp.f32 %v4549_v62 }
 0x678   : > { %v2198_v21 = vunpack.c.l.b16 %v973_v49 }
 0x679   : > { %v2200_v56 = vunpack.c.l.b16 %v975_v17 }
 0x67a   : > { %v2203_v36 = vpack.c.b16 %v2198_v21, %v2197_v42 }
 0x67c   : > { %v4407_v37 = vpop.eup %4406  ;;  %v2297_v53 = vsel %vm733_vm0, %v2203_v36, %v2230_v57  ;;  %v2286_v40 = vpop.permute.xlu2 %2285 }
 0x67d   : > { %v966_v23 = vmul.f32 %v4407_v37, %v5009_v25  ;;  %v2307_v35 = vsel %vm2301_vm1, %v2297_v53, %v2258_v32  ;;  %v4409_v3 = vpop.eup %4408  ;;  %v4449_v37 = vld [vmem:[%s4737_s16 + $0x38] sm:$0xff]  ;;  %s540_s16 = sand.u32 1, %s4520_s19  }
 0x67e   : > { %v2318_v24 = vsel %vm2310_vm2, %v2307_v35, %v2286_v40  ;;  %v2447_v58 = vmul.f32 128.0, %v4409_v3  ;;  %vm2451_vm3 = vweird.f32 %v4409_v3  ;;  %s3326_s15 = sshll.u32 %s540_s16, 6  ;;  %s3198_s29 = scalar_lea.sflag [#allocation3], %s540_s16 }
 0x67f   : > { %2409 = vmatmul.bf16.gmra.mxu0 %v2318_v24  ;;  %v974_v4 = vpack.c.bf16 %v966_v23, %v966_v23  ;;  %s5675_s23 = scalar_lea.vmem [#allocation2], %s3326_s15 }
 0x680   : > { %v2448_v2 = vsub.f32 1.0, %v2447_v58  ;;  %v4162_v58 = vld [vmem:[%s5765_s7 + $0x44] sm:$0xf0]  ;;  %s3212_s28 = sshll.u32 %s5675_s23, 4  ;;  %s3213_s28 = int_to_ptr.vmem [resolvable:$true] %s3212_s28 }
 0x681   : > { %v2199_v51 = vunpack.c.l.b16 %v974_v4 }
 0x682   : > { %v2449_v22 = vmul.f32 %v4409_v3, %v2448_v2 }
 0x683   : > { %v2204_v38 = vpack.c.b16 %v2200_v56, %v2199_v51 }
 0x684   : > { %v2288_v50 = vpop.permute.xlu2 %2287  ;;  %v2450_v47 = vadd.f32 %v4409_v3, %v2449_v22  ;;  %v3949_v22 = vld [vmem:[%s5765_s7 + $0x48] sm:$0xf0] }
 0x685   : > { %v2300_v29 = vsel %vm733_vm0, %v2204_v38, %v2232_v60 }
 0x686   : > { %v5363_v0 = vsel %vm2451_vm3, %v4409_v3, %v2450_v47  ;;  %v3957_v3 = vld [vmem:[%s5765_s7 + $0x58] sm:$0xf0] }
 0x68d   : > { %v2260_v5 = vpop.permute.xlu1 %2259 }
 0x68e   : > { %v2309_v25 = vsel %vm2301_vm1, %v2300_v29, %v2260_v5 }
 0x68f   : > { %v2321_v28 = vsel %vm2310_vm2, %v2309_v25, %v2288_v50 }
 0x690   : > { %2414 = vmatmul.bf16.gmra.mxu0 %v2321_v28 }
 0x6a9   : > { %v2400_v52 = vpop.f32.mrf.mxu0 }
 0x6aa   : > { %v2401_v26 = vadd.f32 %v4274_v19, %v2400_v52  ;;  %v4168_v52 = vld [vmem:[%s5765_s7 + $0x74] sm:$0xf0] }
 0x6ac   : > { %v5336_v46 = vadd.f32 %v4442_v6, %v2401_v26  ;;  %v4167_v26 = vld [vmem:[%s5765_s7 + $0x74] sm:$0xf] }
 0x6ae   : > { %2430 = vadd.xlane.f32.xlu0 %v5336_v46 }
 0x6b1   : > { %v2402_v43 = vpop.f32.mrf.mxu0 }
 0x6b2   : > { %v2403_v13 = vadd.f32 %v4274_v19, %v2402_v43  ;;  %v3973_v43 = vld [vmem:[%s5765_s7 + $0x78] sm:$0xf0] }
 0x6b4   : > { %v5340_v39 = vadd.f32 %v4443_v30, %v2403_v13  ;;  %v3976_v13 = vor.u32 %v4167_v26, %v3973_v43  ;;  %v3917_v43 = vld [vmem:[%s5765_s7 + $0x8] sm:$0xf0] }
 0x6b6   : > { %2432 = vadd.xlane.f32.xlu2 %v5340_v39  ;;  %2754 = vmatpush.bf16.msrb.mxu3 %v3976_v13 }
 0x6c9   : > { %v2405_v33 = vpop.f32.mrf.mxu0 }
 0x6ca   : > { %v2406_v18 = vadd.f32 %v4274_v19, %v2405_v33  ;;  %v3963_v33 = vld [vmem:[%s5765_s7 + $0x60] sm:$0xf] }
 0x6cc   : > { %v5344_v55 = vadd.f32 %v4444_v1, %v2406_v18  ;;  %v4166_v18 = vld [vmem:[%s5765_s7 + $0x64] sm:$0xf0]  ;;  %v4165_v1 = vld [vmem:[%s5765_s7 + $0x64] sm:$0xf] }
 0x6ce   : > { %2434 = vadd.xlane.f32.xlu1 %v5344_v55 }
 0x6d1   : > { %v2407_v9 = vpop.f32.mrf.mxu0 }
 0x6d2   : > { %v2408_v11 = vadd.f32 %v4274_v19, %v2407_v9 }
 0x6d4   : > { %v5348_v14 = vadd.f32 %v4445_v41, %v2408_v11  ;;  %v3964_v11 = vor.u32 %v4166_v18, %v3963_v33  ;;  %v3965_v41 = vld [vmem:[%s5765_s7 + $0x68] sm:$0xf0] }
 0x6d6   : > { %2436 = vadd.xlane.f32.xlu0 %v5348_v14 }
 0x6fc   : > { %v2410_v12 = vpop.f32.mrf.mxu0 }
 0x6fd   : > { %v2411_v45 = vadd.f32 %v4274_v19, %v2410_v12  ;;  %v3968_v12 = vor.u32 %v4165_v1, %v3965_v41 }
 0x6ff   : > { %v5352_v48 = vadd.f32 %v4446_v16, %v2411_v45  ;;  %2755 = vmatpush.bf16.msrb.mxu3 %v3968_v12  ;;  %v3955_v16 = vld [vmem:[%s5765_s7 + $0x50] sm:$0xf] }
 0x701   : > { %2438 = vadd.xlane.f32.xlu2 %v5352_v48 }
 0x704   : > { %v2412_v8 = vpop.f32.mrf.mxu0 }
 0x705   : > { %v2413_v59 = vadd.f32 %v4274_v19, %v2412_v8  ;;  %v4164_v8 = vld [vmem:[%s5765_s7 + $0x54] sm:$0xf0] }
 0x707   : > { %v5356_v20 = vadd.f32 %v4447_v31, %v2413_v59  ;;  %v4163_v59 = vld [vmem:[%s5765_s7 + $0x54] sm:$0xf]  ;;  %v3956_v31 = vor.u32 %v4164_v8, %v3955_v16 }
 0x709   : > { %2440 = vadd.xlane.f32.xlu0 %v5356_v20 }
 0x70d   : > { %v2415_v15 = vpop.f32.mrf.mxu0 }
 0x70e   : > { %v2416_v34 = vadd.f32 %v4274_v19, %v2415_v15  ;;  %v3960_v15 = vor.u32 %v4163_v59, %v3957_v3 }
 0x710   : > { %v5360_v10 = vadd.f32 %v4448_v44, %v2416_v34  ;;  %2756 = vmatpush.bf16.msrb.mxu3 %v3960_v15  ;;  %v3947_v34 = vld [vmem:[%s5765_s7 + $0x40] sm:$0xf]  ;;  %v4161_v44 = vld [vmem:[%s5765_s7 + $0x44] sm:$0xf] }
 0x711   : > { %v3948_v2 = vor.u32 %v4162_v58, %v3947_v34  ;;  %v3952_v47 = vor.u32 %v4161_v44, %v3949_v22  ;;  %v5518_v22 = vld [vmem:[%s5769_s11] ss:$0 sm:$0xff] }
 0x712   : > { %2442 = vadd.xlane.f32.xlu1 %v5360_v10 }
 0x714   : > { %2757 = vmatpush.bf16.msrb.mxu3 %v3952_v47 }
 0x715   : > { %v2417_v49 = vpop.f32.mrf.mxu0 }
 0x716   : > { %v2418_v21 = vadd.f32 %v4274_v19, %v2417_v49  ;;  %v3971_v19 = vld [vmem:[%s5765_s7 + $0x70] sm:$0xf] }
 0x717   : > { %v3972_v6 = vor.u32 %v4168_v52, %v3971_v19  ;;  %v4154_v19 = vld [vmem:[%s5765_s7 + $0x4] sm:$0xf0]  ;;  %v4153_v52 = vld [vmem:[%s5765_s7 + $0x4] sm:$0xf] }
 0x718   : > { %v5376_v32 = vadd.f32 %v4449_v37, %v2418_v21  ;;  %v4158_v37 = vld [vmem:[%s5765_s7 + $0x24] sm:$0xf0]  ;;  %v3920_v13 = vor.u32 %v4153_v52, %v3917_v43 }
 0x719   : > { %2725 = vmatpush.bf16.msra.mxu2 %v3972_v6 }
 0x71d   : > { %2726 = vmatpush.bf16.msra.mxu2 %v3964_v11 }
 0x721   : > { %v2431_v61 = vpop.xlane.xlu0 %2430  ;;  %2727 = vmatpush.bf16.msra.mxu2 %v3956_v31 }
 0x722   : > { %v2453_v7 = vmul.f32 %v5363_v0, %v2431_v61  ;;  %v3939_v61 = vld [vmem:[%s5765_s7 + $0x30] sm:$0xf] }
 0x724   : > { %v5367_v57 = vsub.f32 %v5336_v46, %v2453_v7  ;;  %v4160_v7 = vld [vmem:[%s5765_s7 + $0x34] sm:$0xf0] }
 0x725   : > { %2728 = vmatpush.bf16.msra.mxu2 %v3948_v2  ;;  %v3940_v49 = vor.u32 %v4160_v7, %v3939_v61 }
 0x726   : > { %v2469_v54 = vmul.f32 %v5367_v57, %v5367_v57 }
 0x728   : > { %2477 = vadd.xlane.f32.xlu2 %v2469_v54  ;;  %v4159_v54 = vld [vmem:[%s5765_s7 + $0x34] sm:$0xf] }
 0x729   : > { %v2433_v42 = vpop.xlane.xlu2 %2432  ;;  %2729 = vmatpush.bf16.msra.mxu2 %v3940_v49 }
 0x72a   : > { %v2454_v36 = vmul.f32 %v5363_v0, %v2433_v42  ;;  %v3941_v42 = vld [vmem:[%s5765_s7 + $0x38] sm:$0xf0] }
 0x72b   : > { %v3944_v21 = vor.u32 %v4159_v54, %v3941_v42  ;;  %v5524_v54 = vld [vmem:[%s5770_s12] ss:$0 sm:$0xff] }
 0x72c   : > { %v5373_v63 = vsub.f32 %v5340_v39, %v2454_v36  ;;  %v3931_v36 = vld [vmem:[%s5765_s7 + $0x20] sm:$0xf] }
 0x72d   : > { %2758 = vmatpush.bf16.msrb.mxu3 %v3944_v21 }
 0x72e   : > { %v2470_v53 = vmul.f32 %v5373_v63, %v5373_v63 }
 0x730   : > { %2444 = vadd.xlane.f32.xlu2 %v5376_v32  ;;  %2479 = vadd.xlane.f32.xlu0 %v2470_v53  ;;  %v4157_v53 = vld [vmem:[%s5765_s7 + $0x24] sm:$0xf] }
 0x741   : > { %v2435_v40 = vpop.xlane.xlu1 %2434 }
 0x742   : > { %v2455_v23 = vmul.f32 %v5363_v0, %v2435_v40  ;;  %v3932_v40 = vor.u32 %v4158_v37, %v3931_v36 }
 0x744   : > { %v5383_v35 = vsub.f32 %v5344_v55, %v2455_v23  ;;  %v3933_v23 = vld [vmem:[%s5765_s7 + $0x28] sm:$0xf0]  ;;  %2730 = vmatpush.bf16.msra.mxu2 %v3932_v40 }
 0x746   : > { %v2471_v24 = vmul.f32 %v5383_v35, %v5383_v35 }
 0x748   : > { %2481 = vadd.xlane.f32.xlu0 %v2471_v24  ;;  %v3936_v24 = vor.u32 %v4157_v53, %v3933_v23 }
 0x749   : > { %v2437_v27 = vpop.xlane.xlu0 %2436 }
 0x74a   : > { %v2456_v4 = vmul.f32 %v5363_v0, %v2437_v27  ;;  %2759 = vmatpush.bf16.msrb.mxu3 %v3936_v24  ;;  %v3923_v27 = vld [vmem:[%s5765_s7 + $0x10] sm:$0xf] }
 0x74c   : > { %v5389_v17 = vsub.f32 %v5348_v14, %v2456_v4  ;;  %v4156_v4 = vld [vmem:[%s5765_s7 + $0x14] sm:$0xf0] }
 0x74e   : > { %v2472_v51 = vmul.f32 %v5389_v17, %v5389_v17 }
 0x750   : > { %2483 = vadd.xlane.f32.xlu1 %v2472_v51  ;;  %v4155_v51 = vld [vmem:[%s5765_s7 + $0x14] sm:$0xf] }
 0x774   : > { %v2439_v56 = vpop.xlane.xlu2 %2438 }
 0x775   : > { %v2457_v38 = vmul.f32 %v5363_v0, %v2439_v56  ;;  %v3924_v56 = vor.u32 %v4156_v4, %v3923_v27 }
 0x777   : > { %v5395_v60 = vsub.f32 %v5352_v48, %v2457_v38  ;;  %v3925_v38 = vld [vmem:[%s5765_s7 + $0x18] sm:$0xf0]  ;;  %2731 = vmatpush.bf16.msra.mxu2 %v3924_v56 }
 0x779   : > { %v2473_v29 = vmul.f32 %v5395_v60, %v5395_v60 }
 0x77b   : > { %2485 = vadd.xlane.f32.xlu2 %v2473_v29 }
 0x77c   : > { %v2441_v5 = vpop.xlane.xlu0 %2440 }
 0x77d   : > { %v2458_v50 = vmul.f32 %v5363_v0, %v2441_v5  ;;  %v3928_v5 = vor.u32 %v4155_v51, %v3925_v38 }
 0x77f   : > { %v5401_v25 = vsub.f32 %v5356_v20, %v2458_v50  ;;  %2760 = vmatpush.bf16.msrb.mxu3 %v3928_v5 }
 0x781   : > { %v2474_v28 = vmul.f32 %v5401_v25, %v5401_v25 }
 0x783   : > { %2487 = vadd.xlane.f32.xlu0 %v2474_v28  ;;  %v3915_v28 = vld [vmem:[%s5765_s7] sm:$0xf]  ;;  %2761 = vmatpush.bf16.msrb.mxu3 %v3920_v13 }
 0x784   : > { %v3916_v6 = vor.u32 %v4154_v19, %v3915_v28 }
 0x785   : > { %v2443_v30 = vpop.xlane.xlu1 %2442 }
 0x786   : > { %v2459_v9 = vmul.f32 %v5363_v0, %v2443_v30  ;;  %2732 = vmatpush.bf16.msra.mxu2 %v3916_v6 }
 0x788   : > { %v5431_v45 = vsub.f32 %v5360_v10, %v2459_v9 }
 0x78a   : > { %v2475_v62 = vmul.f32 %v5431_v45, %v5431_v45 }
 0x78c   : > { %2489 = vadd.xlane.f32.xlu1 %v2475_v62 }
 0x79b   : > { %v2478_v29 = vpop.xlane.xlu2 %2477 }
 0x79c   : > { %v2493_v50 = vmul.f32 %v2478_v29, %v5363_v0 }
 0x79e   : > { %v2501_v26 = vadd.f32 1e-12, %v2493_v50 }
 0x7a0   : > { %4410 = vrsqrt.f32 %v2501_v26  ;;  %vm2515_vm5 = vweird.f32 %v2501_v26 }
 0x7a3   : > { %v2480_v30 = vpop.xlane.xlu0 %2479  ;;  %v2445_v33 = vpop.xlane.xlu2 %2444 }
 0x7a4   : > { %v2494_v18 = vmul.f32 %v2480_v30, %v5363_v0  ;;  %v2460_v1 = vmul.f32 %v5363_v0, %v2445_v33 }
 0x7a6   : > { %v4411_v9 = vpop.eup %4410  ;;  %v2502_v11 = vadd.f32 1e-12, %v2494_v18  ;;  %v5511_v41 = vsub.f32 %v5376_v32, %v2460_v1 }
 0x7a7   : > { %v2510_v12 = vmul.f32 %v4411_v9, %v2501_v26  ;;  %vm2516_vm4 = vweird.f32 %v4411_v9 }
 0x7a8   : > { %4412 = vrsqrt.f32 %v2502_v11  ;;  %v2476_v16 = vmul.f32 %v5511_v41, %v5511_v41  ;;  %vm2517_vm6 = vmor %vm2515_vm5, %vm2516_vm4  ;;  %vm2525_vm8 = vweird.f32 %v2502_v11 }
 0x7a9   : > { %v2511_v8 = vmul.f32 %v4411_v9, %v2510_v12 }
 0x7aa   : > { %2491 = vadd.xlane.f32.xlu2 %v2476_v16 }
 0x7ab   : > { %v2512_v59 = vmul.f32 0.5, %v2511_v8 }
 0x7ad   : > { %v2513_v62 = vsub.f32 1.5, %v2512_v59 }
 0x7ae   : > { %v4413_v31 = vpop.eup %4412 }
 0x7af   : > { %v2514_v3 = vmul.f32 %v4411_v9, %v2513_v62  ;;  %v2520_v15 = vmul.f32 %v4413_v31, %v2502_v11  ;;  %vm2526_vm7 = vweird.f32 %v4413_v31 }
 0x7b0   : > { %vm2527_vm9 = vmor %vm2525_vm8, %vm2526_vm7 }
 0x7b1   : > { %v2521_v34 = vmul.f32 %v4413_v31, %v2520_v15  ;;  %v2518_v58 = vsel %vm2517_vm6, %v4411_v9, %v2514_v3 }
 0x7b2   : > { %v2589_v47 = vmul.f32 %v2518_v58, %v5367_v57 }
 0x7b3   : > { %v2522_v44 = vmul.f32 0.5, %v2521_v34 }
 0x7b4   : > { %v2600_v49 = vmul.f32 %v5518_v22, %v2589_v47 }
 0x7b5   : > { %v2523_v2 = vsub.f32 1.5, %v2522_v44 }
 0x7b6   : > { %v2611_v57 = vadd.f32 %v5524_v54, %v2600_v49 }
 0x7b7   : > { %v2524_v61 = vmul.f32 %v4413_v31, %v2523_v2 }
 0x7b9   : > { %v2528_v7 = vsel %vm2527_vm9, %v4413_v31, %v2524_v61 }
 0x7ba   : > { %v2590_v42 = vmul.f32 %v2528_v7, %v5373_v63 }
 0x7bb   : > { %v2482_v21 = vpop.xlane.xlu0 %2481 }
 0x7bc   : > { %v2601_v36 = vmul.f32 %v5518_v22, %v2590_v42  ;;  %v2495_v37 = vmul.f32 %v2482_v21, %v5363_v0 }
 0x7be   : > { %v2612_v53 = vadd.f32 %v5524_v54, %v2601_v36  ;;  %v2503_v40 = vadd.f32 1e-12, %v2495_v37 }
 0x7c0   : > { %4414 = vrsqrt.f32 %v2503_v40  ;;  %v2619_v23 = vpack.c.bf16 %v2612_v53, %v2611_v57  ;;  %vm2535_vm11 = vweird.f32 %v2503_v40 }
 0x7c2   : > { %2733 = vmatmul.bf16.vlgmr.msra.gmra.mxu2 %v2619_v23  ;;  %2762 = vmatmul.bf16.vlgmr.msrb.gmra.mxu3 %v2619_v23 }
 0x7c3   : > { %v2484_v24 = vpop.xlane.xlu1 %2483 }
 0x7c4   : > { %v2496_v27 = vmul.f32 %v2484_v24, %v5363_v0 }
 0x7c6   : > { %v4415_v4 = vpop.eup %4414  ;;  %v2504_v51 = vadd.f32 1e-12, %v2496_v27 }
 0x7c7   : > { %v2530_v63 = vmul.f32 %v4415_v4, %v2503_v40  ;;  %vm2536_vm10 = vweird.f32 %v4415_v4 }
 0x7c8   : > { %4416 = vrsqrt.f32 %v2504_v51  ;;  %vm2537_vm12 = vmor %vm2535_vm11, %vm2536_vm10  ;;  %vm2545_vm14 = vweird.f32 %v2504_v51 }
 0x7c9   : > { %v2531_v56 = vmul.f32 %v4415_v4, %v2530_v63 }
 0x7cb   : > { %v2532_v38 = vmul.f32 0.5, %v2531_v56  ;;  %v4184_v56 = vld [vmem:[%s5767_s9 + $0x78] sm:$0xff] }
 0x7cc   : > { %2968 = vmatpush.bf16.msra.mxu0 %v4184_v56 }
 0x7cd   : > { %v2533_v29 = vsub.f32 1.5, %v2532_v38  ;;  %v4175_v38 = vld [vmem:[%s5767_s9 + $0x30] sm:$0xff] }
 0x7ce   : > { %v4417_v5 = vpop.eup %4416 }
 0x7cf   : > { %v2534_v50 = vmul.f32 %v4415_v4, %v2533_v29  ;;  %v2540_v28 = vmul.f32 %v4417_v5, %v2504_v51  ;;  %vm2546_vm13 = vweird.f32 %v4417_v5  ;;  %v4183_v29 = vld [vmem:[%s5767_s9 + $0x70] sm:$0xff] }
 0x7d0   : > { %vm2547_vm15 = vmor %vm2545_vm14, %vm2546_vm13  ;;  %2969 = vmatpush.bf16.msra.mxu0 %v4183_v29 }
 0x7d1   : > { %v2541_v19 = vmul.f32 %v4417_v5, %v2540_v28  ;;  %v2538_v52 = vsel %vm2537_vm12, %v4415_v4, %v2534_v50  ;;  %v4174_v50 = vld [vmem:[%s5767_s9 + $0x28] sm:$0xff] }
 0x7d2   : > { %v2591_v43 = vmul.f32 %v2538_v52, %v5383_v35  ;;  %v4182_v28 = vld [vmem:[%s5767_s9 + $0x68] sm:$0xff] }
 0x7d3   : > { %v2542_v26 = vmul.f32 0.5, %v2541_v19 }
 0x7d4   : > { %v2602_v18 = vmul.f32 %v5518_v22, %v2591_v43  ;;  %2970 = vmatpush.bf16.msra.mxu0 %v4182_v28  ;;  %v4181_v43 = vld [vmem:[%s5767_s9 + $0x60] sm:$0xff] }
 0x7d5   : > { %v2543_v6 = vsub.f32 1.5, %v2542_v26 }
 0x7d6   : > { %v2613_v9 = vadd.f32 %v5524_v54, %v2602_v18  ;;  %v4180_v18 = vld [vmem:[%s5767_s9 + $0x58] sm:$0xff] }
 0x7d7   : > { %v2544_v13 = vmul.f32 %v4417_v5, %v2543_v6  ;;  %v4173_v6 = vld [vmem:[%s5767_s9 + $0x20] sm:$0xff] }
 0x7d8   : > { %2971 = vmatpush.bf16.msra.mxu0 %v4181_v43 }
 0x7d9   : > { %v2548_v30 = vsel %vm2547_vm15, %v4417_v5, %v2544_v13 }
 0x7da   : > { %v2592_v33 = vmul.f32 %v2548_v30, %v5389_v17 }
 0x7dc   : > { %v2603_v1 = vmul.f32 %v5518_v22, %v2592_v33  ;;  %v4172_v33 = vld [vmem:[%s5767_s9 + $0x18] sm:$0xff]  ;;  %2972 = vmatpush.bf16.msra.mxu0 %v4180_v18 }
 0x7de   : > { %v2614_v11 = vadd.f32 %v5524_v54, %v2603_v1 }
 0x7e0   : > { %v2620_v12 = vpack.c.bf16 %v2614_v11, %v2613_v9  ;;  %v4171_v11 = vld [vmem:[%s5767_s9 + $0x10] sm:$0xff] }
 0x7e2   : > { %2738 = vmatmul.bf16.gmra.mxu2 %v2620_v12  ;;  %2767 = vmatmul.bf16.gmra.mxu3 %v2620_v12  ;;  %v4179_v12 = vld [vmem:[%s5767_s9 + $0x50] sm:$0xff] }
 0x7e3   : > { %2973 = vmatpush.bf16.msra.mxu0 %v4179_v12 }
 0x7ee   : > { %v2486_v16 = vpop.xlane.xlu2 %2485 }
 0x7ef   : > { %v2497_v35 = vmul.f32 %v2486_v16, %v5363_v0 }
 0x7f1   : > { %v2505_v8 = vadd.f32 1e-12, %v2497_v35 }
 0x7f3   : > { %4418 = vrsqrt.f32 %v2505_v8  ;;  %vm2555_vm1 = vweird.f32 %v2505_v8 }
 0x7f6   : > { %v2488_v59 = vpop.xlane.xlu0 %2487 }
 0x7f7   : > { %v2498_v62 = vmul.f32 %v2488_v59, %v5363_v0  ;;  %v4170_v59 = vld [vmem:[%s5767_s9 + $0x8] sm:$0xff] }
 0x7f9   : > { %v4419_v17 = vpop.eup %4418  ;;  %v2506_v31 = vadd.f32 1e-12, %v2498_v62  ;;  %v4178_v62 = vld [vmem:[%s5767_s9 + $0x48] sm:$0xff] }
 0x7fa   : > { %v2550_v3 = vmul.f32 %v4419_v17, %v2505_v8  ;;  %vm2556_vm0 = vweird.f32 %v4419_v17  ;;  %2974 = vmatpush.bf16.msra.mxu0 %v4178_v62 }
 0x7fb   : > { %4420 = vrsqrt.f32 %v2506_v31  ;;  %vm2557_vm2 = vmor %vm2555_vm1, %vm2556_vm0  ;;  %vm2565_vm4 = vweird.f32 %v2506_v31 }
 0x7fc   : > { %v2551_v15 = vmul.f32 %v4419_v17, %v2550_v3 }
 0x7fe   : > { %v2552_v34 = vmul.f32 0.5, %v2551_v15 }
 0x7ff   : > { %v2490_v7 = vpop.xlane.xlu1 %2489 }
 0x800   : > { %v2553_v58 = vsub.f32 1.5, %v2552_v34  ;;  %v2499_v36 = vmul.f32 %v2490_v7, %v5363_v0  ;;  %v4169_v34 = vld [vmem:[%s5767_s9] sm:$0xff] }
 0x801   : > { %v4421_v44 = vpop.eup %4420 }
 0x802   : > { %v2554_v2 = vmul.f32 %v4419_v17, %v2553_v58  ;;  %v2560_v47 = vmul.f32 %v4421_v44, %v2506_v31  ;;  %vm2566_vm3 = vweird.f32 %v4421_v44  ;;  %v2507_v40 = vadd.f32 1e-12, %v2499_v36  ;;  %v4177_v58 = vld [vmem:[%s5767_s9 + $0x40] sm:$0xff] }
 0x803   : > { %vm2567_vm5 = vmor %vm2565_vm4, %vm2566_vm3  ;;  %2975 = vmatpush.bf16.msra.mxu0 %v4177_v58 }
 0x804   : > { %v2561_v61 = vmul.f32 %v4421_v44, %v2560_v47  ;;  %v2558_v49 = vsel %vm2557_vm2, %v4419_v17, %v2554_v2  ;;  %4422 = vrsqrt.f32 %v2507_v40  ;;  %vm2575_vm7 = vweird.f32 %v2507_v40 }
 0x805   : > { %v2593_v37 = vmul.f32 %v2558_v49, %v5395_v60  ;;  %v4176_v60 = vld [vmem:[%s5767_s9 + $0x38] sm:$0xff] }
 0x806   : > { %v2562_v42 = vmul.f32 0.5, %v2561_v61  ;;  %2939 = vmatpush.bf16.msrb.mxu1 %v4176_v60 }
 0x807   : > { %v2604_v24 = vmul.f32 %v5518_v22, %v2593_v37 }
 0x808   : > { %v2563_v21 = vsub.f32 1.5, %v2562_v42 }
 0x809   : > { %v2615_v4 = vadd.f32 %v5524_v54, %v2604_v24 }
 0x80a   : > { %v2564_v57 = vmul.f32 %v4421_v44, %v2563_v21  ;;  %2940 = vmatpush.bf16.msrb.mxu1 %v4175_v38  ;;  %v2639_v21 = vld [vmem:[%s5766_s8] sm:$0x3] }
 0x80c   : > { %v2568_v53 = vsel %vm2567_vm5, %v4421_v44, %v2564_v57  ;;  %v2641_v57 = vperm.slane %v2639_v21, 0 }
 0x80d   : > { %v2594_v23 = vmul.f32 %v2568_v53, %v5401_v25  ;;  %v4423_v25 = vpop.eup %4422  ;;  %v2642_v53 = vperm.slane %v2639_v21, 1 }
 0x80e   : > { %v2570_v5 = vmul.f32 %v4423_v25, %v2507_v40  ;;  %2941 = vmatpush.bf16.msrb.mxu1 %v4174_v50  ;;  %vm2576_vm6 = vweird.f32 %v4423_v25 }
 0x80f   : > { %v2605_v27 = vmul.f32 %v5518_v22, %v2594_v23  ;;  %vm2577_vm8 = vmor %vm2575_vm7, %vm2576_vm6 }
 0x810   : > { %v2571_v19 = vmul.f32 %v4423_v25, %v2570_v5 }
 0x811   : > { %v2616_v51 = vadd.f32 %v5524_v54, %v2605_v27 }
 0x812   : > { %v2572_v30 = vmul.f32 0.5, %v2571_v19  ;;  %2942 = vmatpush.bf16.msrb.mxu1 %v4173_v6 }
 0x813   : > { %v2621_v63 = vpack.c.bf16 %v2616_v51, %v2615_v4 }
 0x814   : > { %v2573_v1 = vsub.f32 1.5, %v2572_v30 }
 0x815   : > { %2743 = vmatmul.bf16.gmra.mxu2 %v2621_v63  ;;  %2772 = vmatmul.bf16.gmra.mxu3 %v2621_v63 }
 0x816   : > { %2943 = vmatpush.bf16.msrb.mxu1 %v4172_v33  ;;  %v2574_v16 = vmul.f32 %v4423_v25, %v2573_v1 }
 0x818   : > { %v2578_v17 = vsel %vm2577_vm8, %v4423_v25, %v2574_v16 }
 0x819   : > { %v2595_v15 = vmul.f32 %v2578_v17, %v5431_v45 }
 0x81a   : > { %2944 = vmatpush.bf16.msrb.mxu1 %v4171_v11 }
 0x81b   : > { %v2606_v61 = vmul.f32 %v5518_v22, %v2595_v15 }
 0x81d   : > { %v2492_v52 = vpop.xlane.xlu2 %2491  ;;  %v2617_v7 = vadd.f32 %v5524_v54, %v2606_v61 }
 0x81e   : > { %v2500_v26 = vmul.f32 %v2492_v52, %v5363_v0  ;;  %2945 = vmatpush.bf16.msrb.mxu1 %v4170_v59 }
 0x820   : > { %v2508_v13 = vadd.f32 1e-12, %v2500_v26 }
 0x822   : > { %4424 = vrsqrt.f32 %v2508_v13  ;;  %vm2585_vm10 = vweird.f32 %v2508_v13  ;;  %2946 = vmatpush.bf16.msrb.mxu1 %v4169_v34 }
 0x828   : > { %v4425_v9 = vpop.eup %4424 }
 0x829   : > { %v2580_v35 = vmul.f32 %v4425_v9, %v2508_v13  ;;  %vm2586_vm9 = vweird.f32 %v4425_v9 }
 0x82a   : > { %vm2587_vm11 = vmor %vm2585_vm10, %vm2586_vm9 }
 0x82b   : > { %v2581_v8 = vmul.f32 %v4425_v9, %v2580_v35 }
 0x82d   : > { %v2582_v31 = vmul.f32 0.5, %v2581_v8 }
 0x82f   : > { %v2583_v3 = vsub.f32 1.5, %v2582_v31 }
 0x831   : > { %v2584_v44 = vmul.f32 %v4425_v9, %v2583_v3 }
 0x833   : > { %v2588_v2 = vsel %vm2587_vm11, %v4425_v9, %v2584_v44 }
 0x834   : > { %v2596_v47 = vmul.f32 %v2588_v2, %v5511_v41 }
 0x836   : > { %v2607_v45 = vmul.f32 %v5518_v22, %v2596_v47 }
 0x838   : > { %v2618_v49 = vadd.f32 %v5524_v54, %v2607_v45 }
 0x83a   : > { %v2622_v42 = vpack.c.bf16 %v2618_v49, %v2617_v7 }
 0x83c   : > { %2748 = vmatmul.bf16.gmra.mxu2 %v2622_v42  ;;  %2777 = vmatmul.bf16.gmra.mxu3 %v2622_v42 }
 0x845   : > { %v2734_v36 = vpop.f32.mrf.mxu2  ;;  %v2763_v37 = vpop.f32.mrf.mxu3 }
 0x846   : > { %v2735_v41 = vadd.f32 %v2734_v36, %v2641_v57  ;;  %v2764_v40 = vadd.f32 %v2763_v37, %v2642_v53 }
 0x848   : > { %v2783_v4 = vmax.f32 %v2735_v41, 0.0  ;;  %v2784_v51 = vmax.f32 %v2764_v40, 0.0  ;;  %v4277_v40 = vld [vmem:[%s5768_s10] ss:$0 sm:$0xff] }
 0x84d   : > { %v2736_v23 = vpop.f32.mrf.mxu2  ;;  %v2765_v24 = vpop.f32.mrf.mxu3 }
 0x84e   : > { %v2737_v22 = vadd.f32 %v2736_v23, %v2641_v57  ;;  %v2766_v27 = vadd.f32 %v2765_v24, %v2642_v53 }
 0x850   : > { %v2785_v54 = vmax.f32 %v2737_v22, 0.0  ;;  %v2786_v63 = vmax.f32 %v2766_v27, 0.0 }
 0x852   : > { %v2799_v60 = vpack.c.bf16 %v2785_v54, %v2783_v4  ;;  %v2800_v56 = vpack.c.bf16 %v2786_v63, %v2784_v51 }
 0x854   : > { %2947 = vmatmul.bf16.vlgmr.msrb.gmra.mxu1 %v2799_v60  ;;  %2976 = vmatmul.bf16.vlgmr.msra.gmra.mxu0 %v2800_v56 }
 0x865   : > { %v2739_v25 = vpop.f32.mrf.mxu2  ;;  %v2768_v38 = vpop.f32.mrf.mxu3 }
 0x866   : > { %v2740_v29 = vadd.f32 %v2739_v25, %v2641_v57  ;;  %v2769_v5 = vadd.f32 %v2768_v38, %v2642_v53 }
 0x868   : > { %v2787_v26 = vmax.f32 %v2740_v29, 0.0  ;;  %v2788_v6 = vmax.f32 %v2769_v5, 0.0 }
 0x86d   : > { %v2741_v50 = vpop.f32.mrf.mxu2  ;;  %v2770_v28 = vpop.f32.mrf.mxu3 }
 0x86e   : > { %v2742_v19 = vadd.f32 %v2741_v50, %v2641_v57  ;;  %v2771_v52 = vadd.f32 %v2770_v28, %v2642_v53 }
 0x870   : > { %v2789_v43 = vmax.f32 %v2742_v19, 0.0  ;;  %v2790_v13 = vmax.f32 %v2771_v52, 0.0 }
 0x872   : > { %v2801_v30 = vpack.c.bf16 %v2789_v43, %v2787_v26  ;;  %v2802_v33 = vpack.c.bf16 %v2790_v13, %v2788_v6 }
 0x874   : > { %2952 = vmatmul.bf16.gmra.mxu1 %v2801_v30  ;;  %2981 = vmatmul.bf16.gmra.mxu0 %v2802_v33 }
 0x898   : > { %v2744_v18 = vpop.f32.mrf.mxu2  ;;  %v2773_v1 = vpop.f32.mrf.mxu3 }
 0x899   : > { %v2745_v9 = vadd.f32 %v2744_v18, %v2641_v57  ;;  %v2774_v11 = vadd.f32 %v2773_v1, %v2642_v53 }
 0x89b   : > { %v2791_v59 = vmax.f32 %v2745_v9, 0.0  ;;  %v2792_v62 = vmax.f32 %v2774_v11, 0.0 }
 0x8a0   : > { %v2746_v12 = vpop.f32.mrf.mxu2  ;;  %v2775_v16 = vpop.f32.mrf.mxu3 }
 0x8a1   : > { %v2747_v35 = vadd.f32 %v2746_v12, %v2641_v57  ;;  %v2776_v8 = vadd.f32 %v2775_v16, %v2642_v53 }
 0x8a3   : > { %v2793_v17 = vmax.f32 %v2747_v35, 0.0  ;;  %v2794_v31 = vmax.f32 %v2776_v8, 0.0 }
 0x8a5   : > { %v2803_v3 = vpack.c.bf16 %v2793_v17, %v2791_v59  ;;  %v2804_v15 = vpack.c.bf16 %v2794_v31, %v2792_v62 }
 0x8a7   : > { %2957 = vmatmul.bf16.gmra.mxu1 %v2803_v3  ;;  %2986 = vmatmul.bf16.gmra.mxu0 %v2804_v15 }
 0x8bf   : > { %v2749_v34 = vpop.f32.mrf.mxu2  ;;  %v2778_v58 = vpop.f32.mrf.mxu3 }
 0x8c0   : > { %v2750_v44 = vadd.f32 %v2749_v34, %v2641_v57  ;;  %v2779_v2 = vadd.f32 %v2778_v58, %v2642_v53 }
 0x8c2   : > { %v2795_v49 = vmax.f32 %v2750_v44, 0.0  ;;  %v2796_v42 = vmax.f32 %v2779_v2, 0.0 }
 0x8c7   : > { %v2751_v47 = vpop.f32.mrf.mxu2  ;;  %v2780_v61 = vpop.f32.mrf.mxu3 }
 0x8c8   : > { %v2752_v45 = vadd.f32 %v2751_v47, %v2641_v57  ;;  %v2781_v7 = vadd.f32 %v2780_v61, %v2642_v53 }
 0x8ca   : > { %v2797_v21 = vmax.f32 %v2752_v45, 0.0  ;;  %v2798_v36 = vmax.f32 %v2781_v7, 0.0 }
 0x8cc   : > { %v2805_v37 = vpack.c.bf16 %v2797_v21, %v2795_v49  ;;  %v2806_v41 = vpack.c.bf16 %v2798_v36, %v2796_v42 }
 0x8ce   : > { %2962 = vmatmul.bf16.gmra.mxu1 %v2805_v37  ;;  %2991 = vmatmul.bf16.gmra.mxu0 %v2806_v41 }
 0x8d1   : > { %v2948_v23 = vpop.f32.mrf.mxu1  ;;  %v2977_v24 = vpop.f32.mrf.mxu0 }
 0x8d2   : > { %v2949_v22 = vadd.f32 %v4277_v40, %v2948_v23 }
 0x8d4   : > { %v2978_v27 = vadd.f32 %v2977_v24, %v2949_v22 }
 0x8d6   : > { %v2997_v4 = vadd.f32 %v2978_v27, %v5336_v46 }
 0x8d8   : > { %3007 = vadd.xlane.f32.xlu0 %v2997_v4 }
 0x8d9   : > { %v2950_v57 = vpop.f32.mrf.mxu1  ;;  %v2979_v51 = vpop.f32.mrf.mxu0 }
 0x8da   : > { %v2951_v53 = vadd.f32 %v4277_v40, %v2950_v57 }
 0x8dc   : > { %v2980_v54 = vadd.f32 %v2979_v51, %v2951_v53 }
 0x8de   : > { %v2998_v63 = vadd.f32 %v2980_v54, %v5340_v39 }
 0x8e0   : > { %3009 = vadd.xlane.f32.xlu1 %v2998_v63 }
 0x8f1   : > { %v2953_v60 = vpop.f32.mrf.mxu1  ;;  %v2982_v56 = vpop.f32.mrf.mxu0 }
 0x8f2   : > { %v2954_v25 = vadd.f32 %v4277_v40, %v2953_v60 }
 0x8f4   : > { %v2983_v38 = vadd.f32 %v2982_v56, %v2954_v25 }
 0x8f6   : > { %v2999_v29 = vadd.f32 %v2983_v38, %v5344_v55 }
 0x8f8   : > { %3011 = vadd.xlane.f32.xlu2 %v2999_v29 }
 0x8f9   : > { %v2955_v5 = vpop.f32.mrf.mxu1  ;;  %v2984_v28 = vpop.f32.mrf.mxu0 }
 0x8fa   : > { %v2956_v50 = vadd.f32 %v4277_v40, %v2955_v5 }
 0x8fc   : > { %v2985_v19 = vadd.f32 %v2984_v28, %v2956_v50 }
 0x8fe   : > { %v3000_v46 = vadd.f32 %v2985_v19, %v5348_v14 }
 0x900   : > { %3013 = vadd.xlane.f32.xlu0 %v3000_v46 }
 0x924   : > { %v2958_v52 = vpop.f32.mrf.mxu1  ;;  %v2987_v26 = vpop.f32.mrf.mxu0 }
 0x925   : > { %v2959_v6 = vadd.f32 %v4277_v40, %v2958_v52 }
 0x927   : > { %v2988_v43 = vadd.f32 %v2987_v26, %v2959_v6 }
 0x929   : > { %v3001_v39 = vadd.f32 %v2988_v43, %v5352_v48  ;;  %v5663_v43 = vld [vmem:[%s5771_s13] ss:$0 sm:$0xff] }
 0x92b   : > { %3015 = vadd.xlane.f32.xlu1 %v3001_v39 }
 0x92c   : > { %v2960_v13 = vpop.f32.mrf.mxu1  ;;  %v2989_v33 = vpop.f32.mrf.mxu0 }
 0x92d   : > { %v2961_v30 = vadd.f32 %v4277_v40, %v2960_v13 }
 0x92f   : > { %v2990_v18 = vadd.f32 %v2989_v33, %v2961_v30  ;;  %v5668_v30 = vld [vmem:[%s5799_s26] ss:$0 sm:$0xff]  ;;  %s4464_s26 = sshra.s32 %s3215_s21, 4  ;;  %s4465_s26 = int_to_ptr.hbm [resolvable:$true] %s4464_s26 }
 0x930   : > { %s4466_s15 = scalar_lea.hbm %s4465_s26, 64  ;;  %p4471_p4 = scmp.lt.s32.totalorder %s4465_s26, %s5800_s17 }
 0x931   : > { %v3002_v55 = vadd.f32 %v2990_v18, %v5356_v20  ;;  %p4467_p0 = scmp.ne.s32.totalorder %s4465_s26, %s4466_s15  ;;  %p4472_p5 = scmp.lt.s32.totalorder %s4470_s24, %s4466_s15 }
 0x933   : > { %3017 = vadd.xlane.f32.xlu2 %v3002_v55  ;;  %p4468_p1 = pnand %p4467_p0, %p4683_p3  ;;  %p4473_p6 = por %p4472_p5, %p4471_p4 }
 0x935   : > { %p4469_p2 = pneg %p4468_p1 }
 0x937   : > { %p4474_p7 = pnand %p4473_p6, %p4469_p2 }
 0x94b   : > { %v3008_v1 = vpop.xlane.xlu0 %3007  ;;  %v2963_v9 = vpop.f32.mrf.mxu1 }
 0x94c   : > { %v3023_v11 = vmul.f32 %v3008_v1, %v5363_v0  ;;  %v2964_v14 = vadd.f32 %v4277_v40, %v2963_v9  ;;  %v2992_v12 = vpop.f32.mrf.mxu0 }
 0x94e   : > { %v5616_v16 = vsub.f32 %v2997_v4, %v3023_v11  ;;  %v2993_v35 = vadd.f32 %v2992_v12, %v2964_v14 }
 0x950   : > { %v3039_v48 = vmul.f32 %v5616_v16, %v5616_v16  ;;  %v3003_v8 = vadd.f32 %v2993_v35, %v5360_v10 }
 0x952   : > { %3047 = vadd.xlane.f32.xlu2 %v3039_v48  ;;  %3019 = vadd.xlane.f32.xlu0 %v3003_v8 }
 0x953   : > { %v3010_v59 = vpop.xlane.xlu1 %3009  ;;  %v2965_v62 = vpop.f32.mrf.mxu1 }
 0x954   : > { %v3024_v20 = vmul.f32 %v3010_v59, %v5363_v0  ;;  %v2966_v17 = vadd.f32 %v4277_v40, %v2965_v62  ;;  %v2994_v31 = vpop.f32.mrf.mxu0 }
 0x956   : > { %v5622_v3 = vsub.f32 %v2998_v63, %v3024_v20  ;;  %v2995_v15 = vadd.f32 %v2994_v31, %v2966_v17 }
 0x958   : > { %v3004_v34 = vadd.f32 %v2995_v15, %v5376_v32  ;;  %v3040_v58 = vmul.f32 %v5622_v3, %v5622_v3 }
 0x95a   : > { %3021 = vadd.xlane.f32.xlu1 %v3004_v34  ;;  %3049 = vadd.xlane.f32.xlu0 %v3040_v58 }
 0x96b   : > { %v3012_v44 = vpop.xlane.xlu2 %3011 }
 0x96c   : > { %v3025_v10 = vmul.f32 %v3012_v44, %v5363_v0 }
 0x96e   : > { %v5628_v2 = vsub.f32 %v2999_v29, %v3025_v10 }
 0x970   : > { %v3041_v47 = vmul.f32 %v5628_v2, %v5628_v2 }
 0x972   : > { %3051 = vadd.xlane.f32.xlu1 %v3041_v47 }
 0x973   : > { %v3014_v61 = vpop.xlane.xlu0 %3013 }
 0x974   : > { %v3026_v45 = vmul.f32 %v3014_v61, %v5363_v0 }
 0x976   : > { %v5633_v7 = vsub.f32 %v3000_v46, %v3026_v45 }
 0x978   : > { %v3042_v32 = vmul.f32 %v5633_v7, %v5633_v7 }
 0x97a   : > { %3053 = vadd.xlane.f32.xlu2 %v3042_v32 }
 0x99e   : > { %v3016_v49 = vpop.xlane.xlu1 %3015 }
 0x99f   : > { %v3027_v42 = vmul.f32 %v3016_v49, %v5363_v0 }
 0x9a1   : > { %v5638_v21 = vsub.f32 %v3001_v39, %v3027_v42 }
 0x9a3   : > { %v3043_v36 = vmul.f32 %v5638_v21, %v5638_v21 }
 0x9a5   : > { %3055 = vadd.xlane.f32.xlu0 %v3043_v36 }
 0x9a6   : > { %v3018_v37 = vpop.xlane.xlu2 %3017 }
 0x9a7   : > { %v3028_v41 = vmul.f32 %v3018_v37, %v5363_v0 }
 0x9a9   : > { %v5643_v40 = vsub.f32 %v3002_v55, %v3028_v41 }
 0x9ab   : > { %v3044_v23 = vmul.f32 %v5643_v40, %v5643_v40 }
 0x9ad   : > { %3057 = vadd.xlane.f32.xlu1 %v3044_v23 }
 0x9c5   : > { %v3020_v24 = vpop.xlane.xlu0 %3019  ;;  %v3048_v22 = vpop.xlane.xlu2 %3047 }
 0x9c6   : > { %v3029_v27 = vmul.f32 %v3020_v24, %v5363_v0  ;;  %v3063_v4 = vmul.f32 %v3048_v22, %v5363_v0 }
 0x9c8   : > { %v5649_v57 = vsub.f32 %v3003_v8, %v3029_v27  ;;  %v3071_v53 = vadd.f32 1e-12, %v3063_v4 }
 0x9ca   : > { %4426 = vrsqrt.f32 %v3071_v53  ;;  %v3045_v51 = vmul.f32 %v5649_v57, %v5649_v57  ;;  %vm3085_vm13 = vweird.f32 %v3071_v53 }
 0x9cc   : > { %3059 = vadd.xlane.f32.xlu2 %v3045_v51 }
 0x9cd   : > { %v3022_v54 = vpop.xlane.xlu1 %3021  ;;  %v3050_v63 = vpop.xlane.xlu0 %3049 }
 0x9ce   : > { %v3030_v60 = vmul.f32 %v3022_v54, %v5363_v0  ;;  %v3064_v56 = vmul.f32 %v3050_v63, %v5363_v0 }
 0x9d0   : > { %v4427_v25 = vpop.eup %4426  ;;  %v5655_v38 = vsub.f32 %v3004_v34, %v3030_v60  ;;  %v3072_v29 = vadd.f32 1e-12, %v3064_v56 }
 0x9d1   : > { %v3080_v5 = vmul.f32 %v4427_v25, %v3071_v53  ;;  %vm3086_vm12 = vweird.f32 %v4427_v25 }
 0x9d2   : > { %4428 = vrsqrt.f32 %v3072_v29  ;;  %v3046_v50 = vmul.f32 %v5655_v38, %v5655_v38  ;;  %vm3087_vm14 = vmor %vm3085_vm13, %vm3086_vm12  ;;  %vm3095_vm0 = vweird.f32 %v3072_v29 }
 0x9d3   : > { %v3081_v28 = vmul.f32 %v4427_v25, %v3080_v5 }
 0x9d4   : > { %3061 = vadd.xlane.f32.xlu0 %v3046_v50 }
 0x9d5   : > { %v3082_v19 = vmul.f32 0.5, %v3081_v28 }
 0x9d7   : > { %v3083_v46 = vsub.f32 1.5, %v3082_v19 }
 0x9d8   : > { %v4429_v52 = vpop.eup %4428 }
 0x9d9   : > { %v3084_v26 = vmul.f32 %v4427_v25, %v3083_v46  ;;  %v3090_v6 = vmul.f32 %v4429_v52, %v3072_v29  ;;  %vm3096_vm15 = vweird.f32 %v4429_v52 }
 0x9da   : > { %vm3097_vm1 = vmor %vm3095_vm0, %vm3096_vm15 }
 0x9db   : > { %v3088_v39 = vsel %vm3087_vm14, %v4427_v25, %v3084_v26  ;;  %v3091_v13 = vmul.f32 %v4429_v52, %v3090_v6 }
 0x9dc   : > { %v3159_v33 = vmul.f32 %v3088_v39, %v5616_v16 }
 0x9dd   : > { %v3092_v18 = vmul.f32 0.5, %v3091_v13 }
 0x9de   : > { %v3170_v55 = vmul.f32 %v5663_v43, %v3159_v33 }
 0x9df   : > { %v3093_v1 = vsub.f32 1.5, %v3092_v18 }
 0x9e0   : > { %v3181_v9 = vadd.f32 %v5668_v30, %v3170_v55 }
 0x9e1   : > { %v3094_v11 = vmul.f32 %v4429_v52, %v3093_v1 }
 0x9e2   : > { %3189 = vst [vmem:[%s5675_s23] sm:$0xff] %v3181_v9 }
 0x9e3   : > { %v3098_v14 = vsel %vm3097_vm1, %v4429_v52, %v3094_v11 }
 0x9e4   : > { %v3160_v12 = vmul.f32 %v3098_v14, %v5622_v3 }
 0x9e5   : > { %v3052_v35 = vpop.xlane.xlu1 %3051 }
 0x9e6   : > { %v3171_v16 = vmul.f32 %v5663_v43, %v3160_v12  ;;  %v3065_v48 = vmul.f32 %v3052_v35, %v5363_v0 }
 0x9e8   : > { %v3182_v8 = vadd.f32 %v5668_v30, %v3171_v16  ;;  %v3073_v59 = vadd.f32 1e-12, %v3065_v48 }
 0x9ea   : > { %3190 = vst [vmem:[%s5675_s23 + $0x8] sm:$0xff] %v3182_v8  ;;  %4430 = vrsqrt.f32 %v3073_v59  ;;  %vm3105_vm3 = vweird.f32 %v3073_v59 }
 0x9ed   : > { %v3054_v62 = vpop.xlane.xlu2 %3053 }
 0x9ee   : > { %v3066_v20 = vmul.f32 %v3054_v62, %v5363_v0 }
 0x9f0   : > { %v4431_v17 = vpop.eup %4430  ;;  %v3074_v31 = vadd.f32 1e-12, %v3066_v20 }
 0x9f1   : > { %v3100_v15 = vmul.f32 %v4431_v17, %v3073_v59  ;;  %vm3106_vm2 = vweird.f32 %v4431_v17 }
 0x9f2   : > { %4432 = vrsqrt.f32 %v3074_v31  ;;  %vm3107_vm4 = vmor %vm3105_vm3, %vm3106_vm2  ;;  %vm3115_vm6 = vweird.f32 %v3074_v31 }
 0x9f3   : > { %v3101_v34 = vmul.f32 %v4431_v17, %v3100_v15 }
 0x9f5   : > { %v3102_v58 = vmul.f32 0.5, %v3101_v34 }
 0x9f7   : > { %v3103_v3 = vsub.f32 1.5, %v3102_v58 }
 0x9f8   : > { %v4433_v44 = vpop.eup %4432 }
 0x9f9   : > { %v3104_v10 = vmul.f32 %v4431_v17, %v3103_v3  ;;  %v3110_v47 = vmul.f32 %v4433_v44, %v3074_v31  ;;  %vm3116_vm5 = vweird.f32 %v4433_v44 }
 0x9fa   : > { %vm3117_vm7 = vmor %vm3115_vm6, %vm3116_vm5 }
 0x9fb   : > { %v3108_v61 = vsel %vm3107_vm4, %v4431_v17, %v3104_v10  ;;  %v3111_v45 = vmul.f32 %v4433_v44, %v3110_v47 }
 0x9fc   : > { %v3161_v32 = vmul.f32 %v3108_v61, %v5628_v2 }
 0x9fd   : > { %v3112_v49 = vmul.f32 0.5, %v3111_v45 }
 0x9fe   : > { %v3172_v42 = vmul.f32 %v5663_v43, %v3161_v32 }
 0x9ff   : > { %v3113_v36 = vsub.f32 1.5, %v3112_v49 }
 0xa00   : > { %v3183_v37 = vadd.f32 %v5668_v30, %v3172_v42 }
 0xa01   : > { %v3114_v41 = vmul.f32 %v4433_v44, %v3113_v36 }
 0xa02   : > { %3191 = vst [vmem:[%s5675_s23 + $0x10] sm:$0xff] %v3183_v37 }
 0xa03   : > { %v3118_v23 = vsel %vm3117_vm7, %v4433_v44, %v3114_v41 }
 0xa04   : > { %v3162_v24 = vmul.f32 %v3118_v23, %v5633_v7 }
 0xa06   : > { %v3173_v22 = vmul.f32 %v5663_v43, %v3162_v24 }
 0xa08   : > { %v3184_v27 = vadd.f32 %v5668_v30, %v3173_v22 }
 0xa0a   : > { %3192 = vst [vmem:[%s5675_s23 + $0x18] sm:$0xff] %v3184_v27 }
 0xa18   : > { %v3056_v2 = vpop.xlane.xlu0 %3055 }
 0xa19   : > { %v3067_v4 = vmul.f32 %v3056_v2, %v5363_v0 }
 0xa1b   : > { %v3075_v53 = vadd.f32 1e-12, %v3067_v4 }
 0xa1d   : > { %4434 = vrsqrt.f32 %v3075_v53  ;;  %vm3125_vm9 = vweird.f32 %v3075_v53 }
 0xa20   : > { %v3058_v51 = vpop.xlane.xlu1 %3057 }
 0xa21   : > { %v3068_v54 = vmul.f32 %v3058_v51, %v5363_v0 }
 0xa23   : > { %v4435_v63 = vpop.eup %4434  ;;  %v3076_v60 = vadd.f32 1e-12, %v3068_v54 }
 0xa24   : > { %v3120_v56 = vmul.f32 %v4435_v63, %v3075_v53  ;;  %vm3126_vm8 = vweird.f32 %v4435_v63 }
 0xa25   : > { %4436 = vrsqrt.f32 %v3076_v60  ;;  %vm3127_vm10 = vmor %vm3125_vm9, %vm3126_vm8  ;;  %vm3135_vm12 = vweird.f32 %v3076_v60 }
 0xa26   : > { %v3121_v25 = vmul.f32 %v4435_v63, %v3120_v56 }
 0xa28   : > { %v3122_v29 = vmul.f32 0.5, %v3121_v25 }
 0xa2a   : > { %v3123_v7 = vsub.f32 1.5, %v3122_v29 }
 0xa2b   : > { %v4437_v5 = vpop.eup %4436 }
 0xa2c   : > { %v3124_v50 = vmul.f32 %v4435_v63, %v3123_v7  ;;  %v3130_v28 = vmul.f32 %v4437_v5, %v3076_v60  ;;  %vm3136_vm11 = vweird.f32 %v4437_v5 }
 0xa2d   : > { %vm3137_vm13 = vmor %vm3135_vm12, %vm3136_vm11 }
 0xa2e   : > { %v3128_v19 = vsel %vm3127_vm10, %v4435_v63, %v3124_v50  ;;  %v3131_v46 = vmul.f32 %v4437_v5, %v3130_v28 }
 0xa2f   : > { %v3163_v52 = vmul.f32 %v3128_v19, %v5638_v21 }
 0xa30   : > { %v3132_v26 = vmul.f32 0.5, %v3131_v46 }
 0xa31   : > { %v3174_v6 = vmul.f32 %v5663_v43, %v3163_v52 }
 0xa32   : > { %v3133_v39 = vsub.f32 1.5, %v3132_v26 }
 0xa33   : > { %v3185_v13 = vadd.f32 %v5668_v30, %v3174_v6 }
 0xa34   : > { %v3134_v33 = vmul.f32 %v4437_v5, %v3133_v39 }
 0xa35   : > { %3193 = vst [vmem:[%s5675_s23 + $0x20] sm:$0xff] %v3185_v13 }
 0xa36   : > { %v3138_v18 = vsel %vm3137_vm13, %v4437_v5, %v3134_v33 }
 0xa37   : > { %v3164_v55 = vmul.f32 %v3138_v18, %v5643_v40 }
 0xa39   : > { %v3175_v1 = vmul.f32 %v5663_v43, %v3164_v55 }
 0xa3b   : > { %v3186_v9 = vadd.f32 %v5668_v30, %v3175_v1 }
 0xa3d   : > { %3194 = vst [vmem:[%s5675_s23 + $0x28] sm:$0xff] %v3186_v9 }
 0xa3f   : > { %v3060_v21 = vpop.xlane.xlu2 %3059 }
 0xa40   : > { %v3069_v11 = vmul.f32 %v3060_v21, %v5363_v0 }
 0xa42   : > { %v3077_v14 = vadd.f32 1e-12, %v3069_v11 }
 0xa44   : > { %4438 = vrsqrt.f32 %v3077_v14  ;;  %vm3145_vm15 = vweird.f32 %v3077_v14 }
 0xa47   : > { %v3062_v12 = vpop.xlane.xlu0 %3061 }
 0xa48   : > { %v3070_v35 = vmul.f32 %v3062_v12, %v5363_v0 }
 0xa4a   : > { %v4439_v16 = vpop.eup %4438  ;;  %v3078_v48 = vadd.f32 1e-12, %v3070_v35 }
 0xa4b   : > { %v3140_v8 = vmul.f32 %v4439_v16, %v3077_v14  ;;  %vm3146_vm14 = vweird.f32 %v4439_v16 }
 0xa4c   : > { %4440 = vrsqrt.f32 %v3078_v48  ;;  %vm3147_vm0 = vmor %vm3145_vm15, %vm3146_vm14  ;;  %vm3155_vm2 = vweird.f32 %v3078_v48 }
 0xa4d   : > { %v3141_v40 = vmul.f32 %v4439_v16, %v3140_v8 }
 0xa4f   : > { %v3142_v59 = vmul.f32 0.5, %v3141_v40 }
 0xa51   : > { %v3143_v62 = vsub.f32 1.5, %v3142_v59 }
 0xa52   : > { %v4441_v20 = vpop.eup %4440 }
 0xa53   : > { %v3144_v17 = vmul.f32 %v4439_v16, %v3143_v62  ;;  %v3150_v31 = vmul.f32 %v4441_v20, %v3078_v48  ;;  %vm3156_vm1 = vweird.f32 %v4441_v20 }
 0xa54   : > { %vm3157_vm3 = vmor %vm3155_vm2, %vm3156_vm1 }
 0xa55   : > { %v3148_v15 = vsel %vm3147_vm0, %v4439_v16, %v3144_v17  ;;  %v3151_v34 = vmul.f32 %v4441_v20, %v3150_v31 }
 0xa56   : > { %v3165_v0 = vmul.f32 %v3148_v15, %v5649_v57 }
 0xa57   : > { %v3152_v58 = vmul.f32 0.5, %v3151_v34 }
 0xa58   : > { %v3176_v3 = vmul.f32 %v5663_v43, %v3165_v0 }
 0xa59   : > { %v3153_v44 = vsub.f32 1.5, %v3152_v58 }
 0xa5a   : > { %v3187_v10 = vadd.f32 %v5668_v30, %v3176_v3 }
 0xa5b   : > { %v3154_v47 = vmul.f32 %v4441_v20, %v3153_v44 }
 0xa5c   : > { %3195 = vst [vmem:[%s5675_s23 + $0x30] sm:$0xff] %v3187_v10 }
 0xa5d   : > { %v3158_v57 = vsel %vm3157_vm3, %v4441_v20, %v3154_v47 }
 0xa5e   : > { %v3166_v61 = vmul.f32 %v3158_v57, %v5655_v38 }
 0xa60   : > { %v3177_v45 = vmul.f32 %v5663_v43, %v3166_v61 }
 0xa62   : > { %v3188_v32 = vadd.f32 %v5668_v30, %v3177_v45 }
 0xa64   : > { %3196 = vst [vmem:[%s5675_s23 + $0x38] sm:$0xff] %v3188_v32 }
 0xa65   : > { %4477 = shalt.err (!%p4474_p7)
}
 0xa66   : > { %s4550_s16 = smov 128   ;;  %s4551_s23 = smov 8  }
 0xa67   : > { %4193 = dma.vmem_to_hbm [thread:$0]  (%p4683_p3), %s3213_s28, 1024, %s3215_s21, %s3198_s29, %s4550_s16, %s4550_s16, %s4551_s23  }
 0xa68 PF: > { %s5802_s27 = sld [smem:[#allocation5_spill]]  ;;  %p4199_p9 = scmp.ge.s32.totalorder %s4544_s25, 2 }
 0xa6a   : > { %p4196_p10 = pnand %p4199_p9, %p4692_p8 }
 0xa6c   : > { %p4197_p11 = pneg %p4196_p10 }
 0xa6e   : > { %s3229_s20 = sand.u32 1, %s5802_s27  }
 0xa6f   : > { %s3230_s30 = scalar_lea.sflag [#allocation3], %s3229_s20 }
 0xa70   : > { %4511 = dma.done.wait (%p4197_p11), %s3230_s30, 1024  }
 0xa71   : > { %4513 = vsyncadd (%p4197_p11), %s3230_s30, 4294966272  ;;  %s28_s25 = sadd.s32 1, %s4544_s25   ;;  %s5804_s26 = sld [smem:[#allocation6_spill]] }
 0xa72   : > { %p25_p12 = scmp.ge.s32.totalorder %s28_s25, 6   ;;  %s5805_s20 = sld [smem:[#allocation13_spill]] }
 0xa73   : > { %s5806_s21 = sld [smem:[#allocation7_spill]]  ;;  %s5810_s18 = smov %s4520_s19 }
 0xa74   : > { %s5807_s22 = sld [smem:[#allocation8_spill]]  ;;  %27 = sbr.rel (!%p25_p12) target bundleno = 9 (0x9), region = 133 }
 0xa75   : > { %s5808_s23 = sld [smem:[#allocation9_spill]] }
 0xa76   : > { %s5809_s24 = sld [smem:[#allocation11_spill]] }
 0xa77   : > { %s5811_s19 = smov %s5804_s26 }
 0xa79   :  { %3236 = vsyncpa [#allocation3], 1 }
 0xa7a   :  { %3238 = vsyncpa [#allocation3 + $0x1], 1 }

</bundles_post_ra>
